<compile_context>
chip_gen: v5e
topology: v5e:2x2
jax: 0.10.0
libtpu: 0.0.40
codegen_flags: <defaults>
</compile_context>

<pallas_src>
import math
import functools

import jax
import jax.numpy as jnp
from jax.experimental import pallas as pl
from jax.experimental.pallas import tpu as pltpu


def _layernorm(h, gamma, beta, eps=1e-5):
    mean = jnp.mean(h, axis=-1, keepdims=True)
    var = jnp.mean((h - mean) ** 2, axis=-1, keepdims=True)
    return (h - mean) * jax.lax.rsqrt(var + eps) * gamma + beta


def gcn_v2_kernel(theta, alpha,
                  adj_ref, xc_ref, xi_ref, rs_ref,
                  wea_ref, wg_ref, bg_ref,
                  w1_ref, b1_ref, g1_ref, bb1_ref,
                  w2_ref, b2_ref, g2_ref, bb2_ref,
                  w3_ref, b3_ref,
                  out_ref,
                  acc_ref):
    f32 = jnp.float32
    bf16 = jnp.bfloat16
    k = pl.program_id(1)

    @pl.when(k == 0)
    def _():
        acc_ref[...] = jnp.zeros_like(acc_ref)

    # --- HBM-bound main loop: raw bf16 adjacency tile straight into the MXU. ---
    tk = adj_ref.shape[1]
    koff = pl.multiple_of(k * tk, tk)
    acc_ref[...] += jnp.dot(adj_ref[...], xc_ref[pl.ds(koff, tk), :],
                            preferred_element_type=f32)

    # --- Finalize on the last k step of each row tile. ---
    @pl.when(k == pl.num_programs(1) - 1)
    def _():
        rs = rs_ref[...]                      # (tm, 1) d^-1/2 for this row tile
        wea = wea_ref[...]                    # (F+1, H) = [We ; be]  (bf16)

        # embed_layer: h0 = X @ We + be  ([X | 1] @ [We ; be]); dropout p=0 is identity.
        h0 = jnp.dot(xi_ref[...], wea, preferred_element_type=f32)

        # acc = [adj @ (d^-1/2 X) | adj @ d^-1/2];  row-scale -> [A_norm@X | rowsum(A_norm)].
        # A_hat @ h  with  A_hat = D^-1/2 (A+I) D^-1/2, h = X@We + be:
        #   = (A_norm@X)@We + rowsum(A_norm)*be + d^-1 * h0
        agg = (rs * acc_ref[...]).astype(bf16)
        hi = jnp.dot(agg, wea, preferred_element_type=f32) + (rs * rs) * h0

        # GCN2Conv (variant=False, residual=False, bias=True), layer l=1.
        support = (1.0 - alpha) * hi + alpha * h0
        g = (theta * jnp.dot(support.astype(bf16), wg_ref[...],
                             preferred_element_type=f32)
             + (1.0 - theta) * support + bg_ref[...])
        h = jnp.maximum(g, 0.0)               # ReLU

        # pred_head: 3-layer MLP, LayerNorm + ReLU after the first two linears.
        h = jnp.dot(h.astype(bf16), w1_ref[...], preferred_element_type=f32) + b1_ref[...]
        h = _layernorm(h, g1_ref[...], bb1_ref[...])
        h = jnp.maximum(h, 0.0)

        h = jnp.dot(h.astype(bf16), w2_ref[...], preferred_element_type=f32) + b2_ref[...]
        h = _layernorm(h, g2_ref[...], bb2_ref[...])
        h = jnp.maximum(h, 0.0)

        h = jnp.dot(h.astype(bf16), w3_ref[...], preferred_element_type=f32) + b3_ref[...]
        out_ref[...] = h


def gcn_v2_forward(x, adj, params, *, lamda=1.0, alpha=0.1, tm=256, tk=1024):
    """x: [N, F] float32 node features, adj: [N, N] float32 adjacency (no self-loops)."""
    N, F = x.shape
    H = params["We"].shape[1]

    # theta for GCN layer index l=1 (num_layers=1): log(lamda / l + 1)
    theta = math.log(lamda / 1.0 + 1.0)

    # Degrees with self-loops; normalization itself is folded into X below.
    deg = jnp.sum(adj, axis=1) + 1.0
    d_inv_sqrt = jax.lax.rsqrt(jnp.maximum(deg, 1e-12)).astype(jnp.float32)

    def rup(a, b):
        return ((a + b - 1) // b) * b

    tm = min(tm, rup(N, 8))
    tk = min(tk, rup(N, 128))
    Np_m = rup(N, tm)          # padded rows
    Np_k = rup(N, tk)          # padded cols (contraction axis)

    # Adjacency stream as bf16 (exact for {0,1}); pad (if any) fused with downcast.
    adj_bf = adj.astype(jnp.bfloat16)
    if (Np_m > N) or (Np_k > N):
        adj_bf = jnp.pad(adj_bf, ((0, Np_m - N), (0, Np_k - N)))

    # Contraction operand with normalization folded in: [d^-1/2 * X | d^-1/2].
    xc = jnp.concatenate([d_inv_sqrt[:, None] * x, d_inv_sqrt[:, None]],
                         axis=1).astype(jnp.bfloat16)
    if Np_k > N:
        xc = jnp.pad(xc, ((0, Np_k - N), (0, 0)))        # zero rows -> no contribution

    # Residual anchor rows: [X | 1]  ->  h0 = [X|1] @ [We; be]
    xi = jnp.concatenate([x, jnp.ones((N, 1), jnp.float32)],
                         axis=1).astype(jnp.bfloat16)
    if Np_m > N:
        xi = jnp.pad(xi, ((0, Np_m - N), (0, 0)))

    rs = d_inv_sqrt[:, None]
    if Np_m > N:
        rs = jnp.pad(rs, ((0, Np_m - N), (0, 0)), constant_values=1.0)

    bf16 = jnp.bfloat16
    we_aug = jnp.concatenate([params["We"], params["be"]], axis=0).astype(bf16)
    weights = (we_aug,
               params["Wg"].astype(bf16), params["bg"],
               params["W1"].astype(bf16), params["b1"], params["g1"], params["bb1"],
               params["W2"].astype(bf16), params["b2"], params["g2"], params["bb2"],
               params["W3"].astype(bf16), params["b3"])

    grid = (Np_m // tm, Np_k // tk)
    const = lambda i, k: (0, 0)

    kernel = functools.partial(gcn_v2_kernel, float(theta), float(alpha))

    flops = (2 * Np_m * Np_k * (F + 1)       # adj @ X_aug
             + 4 * Np_m * (F + 1) * H        # two [We; be] matmuls
             + 8 * Np_m * H * H)             # Wg, W1, W2, W3
    bytes_accessed = (2 * Np_m * Np_k                       # bf16 adj
                      + 2 * Np_k * (F + 1) + 2 * Np_m * (F + 1)
                      + 4 * Np_m + 4 * Np_m * H
                      + 2 * (F + 1) * H + 2 * 4 * H * H + 9 * 4 * H)
    cost = pl.CostEstimate(flops=flops, transcendentals=2 * Np_m,
                           bytes_accessed=bytes_accessed)

    out = pl.pallas_call(
        kernel,
        out_shape=jax.ShapeDtypeStruct((Np_m, H), jnp.float32),
        grid_spec=pltpu.PrefetchScalarGridSpec(
            num_scalar_prefetch=0,
            grid=grid,
            in_specs=[
                pl.BlockSpec((tm, tk), lambda i, k: (i, k)),     # adj tile (bf16)
                pl.BlockSpec((Np_k, F + 1), const),              # X_aug (VMEM-resident)
                pl.BlockSpec((tm, F + 1), lambda i, k: (i, 0)),  # [X | 1] row anchor
                pl.BlockSpec((tm, 1), lambda i, k: (i, 0)),      # d^-1/2 row scale
            ] + [pl.BlockSpec(w.shape, const) for w in weights], # resident params
            out_specs=pl.BlockSpec((tm, H), lambda i, k: (i, 0)),
            scratch_shapes=[
                pltpu.VMEM((tm, F + 1), jnp.float32),            # acc: adj @ X_aug
            ],
        ),
        compiler_params=pltpu.CompilerParams(
            dimension_semantics=("parallel", "arbitrary"),
            vmem_limit_bytes=48 * 1024 * 1024),
        cost_estimate=cost,
    )(adj_bf, xc, xi, rs, *weights)

    return out[:N]


def init_params(key, input_size, hidden_size):
    ks = jax.random.split(key, 8)
    f32 = jnp.float32

    def lin(k, fan_in, fan_out):
        return 0.1 * jax.random.normal(k, (fan_in, fan_out), dtype=f32)

    return {
        # embed_layer
        "We": lin(ks[0], input_size, hidden_size),
        "be": jnp.zeros((1, hidden_size), f32),
        # GCN2Conv weight / bias
        "Wg": lin(ks[1], hidden_size, hidden_size),
        "bg": jnp.zeros((1, hidden_size), f32),
        # pred_head (3-layer MLP, LayerNorm params after linears 1 & 2)
        "W1": lin(ks[2], hidden_size, hidden_size),
        "b1": jnp.zeros((1, hidden_size), f32),
        "g1": jnp.ones((1, hidden_size), f32),
        "bb1": jnp.zeros((1, hidden_size), f32),
        "W2": lin(ks[3], hidden_size, hidden_size),
        "b2": jnp.zeros((1, hidden_size), f32),
        "g2": jnp.ones((1, hidden_size), f32),
        "bb2": jnp.zeros((1, hidden_size), f32),
        "W3": lin(ks[4], hidden_size, hidden_size),
        "b3": jnp.zeros((1, hidden_size), f32),
    }


if __name__ == "__main__":
    # Lane-dense hidden size (128) and enough nodes to exercise the 2-D grid.
    N, F, H = 512, 16, 128

    key = jax.random.PRNGKey(0)
    kx, kadj, kp = jax.random.split(key, 3)

    x = jax.random.normal(kx, (N, F), dtype=jnp.float32)
    # symmetric random {0,1} adjacency (no self-loops assumed)
    a = (jax.random.uniform(kadj, (N, N)) > 0.9).astype(jnp.float32)
    adj = jnp.maximum(a, a.T)

    params = init_params(kp, F, H)

    out = gcn_v2_forward(x, adj, params, lamda=1.0, alpha=0.1, tm=256, tk=1024)
    out = jax.block_until_ready(out)

    assert out.shape == (N, H) and out.dtype == jnp.float32
    assert bool(jnp.all(jnp.isfinite(out)))
    print("KERNEL_OK")
</pallas_src>

<mosaic_0001>
module attributes {stable_mosaic.version = 11 : i64} {
  func.func @gcn_v2_kernel(%arg0: i32, %arg1: i32, %arg2: memref<256x512xbf16, #tpu.memory_space<vmem>>, %arg3: memref<512x17xbf16, #tpu.memory_space<vmem>>, %arg4: memref<256x17xbf16, #tpu.memory_space<vmem>>, %arg5: memref<256x1xf32, #tpu.memory_space<vmem>>, %arg6: memref<17x128xbf16, #tpu.memory_space<vmem>>, %arg7: memref<128x128xbf16, #tpu.memory_space<vmem>>, %arg8: memref<1x128xf32, #tpu.memory_space<vmem>>, %arg9: memref<128x128xbf16, #tpu.memory_space<vmem>>, %arg10: memref<1x128xf32, #tpu.memory_space<vmem>>, %arg11: memref<1x128xf32, #tpu.memory_space<vmem>>, %arg12: memref<1x128xf32, #tpu.memory_space<vmem>>, %arg13: memref<128x128xbf16, #tpu.memory_space<vmem>>, %arg14: memref<1x128xf32, #tpu.memory_space<vmem>>, %arg15: memref<1x128xf32, #tpu.memory_space<vmem>>, %arg16: memref<1x128xf32, #tpu.memory_space<vmem>>, %arg17: memref<128x128xbf16, #tpu.memory_space<vmem>>, %arg18: memref<1x128xf32, #tpu.memory_space<vmem>>, %arg19: memref<256x128xf32, #tpu.memory_space<vmem>>, %arg20: memref<256x17xf32, #tpu.memory_space<vmem>>) attributes {dimension_semantics = [#tpu.dimension_semantics<parallel>, #tpu.dimension_semantics<arbitrary>], iteration_bounds = array<i64: 2, 1>, scalar_prefetch = 0 : i64, scratch_operands = 1 : i64, tpu.core_type = #tpu.core_type<tc>, window_params = [{transform_indices = @transform_0, window_bounds = array<i64: 256, 512>}, {pipeline_mode = #tpu.pipeline_mode<synchronous>, transform_indices = @transform_1, window_bounds = array<i64: 512, 17>}, {transform_indices = @transform_2, window_bounds = array<i64: 256, 17>}, {transform_indices = @transform_3, window_bounds = array<i64: 256, 1>}, {pipeline_mode = #tpu.pipeline_mode<synchronous>, transform_indices = @transform_4, window_bounds = array<i64: 17, 128>}, {pipeline_mode = #tpu.pipeline_mode<synchronous>, transform_indices = @transform_5, window_bounds = array<i64: 128, 128>}, {pipeline_mode = #tpu.pipeline_mode<synchronous>, transform_indices = @transform_6, window_bounds = array<i64: 1, 128>}, {pipeline_mode = #tpu.pipeline_mode<synchronous>, transform_indices = @transform_7, window_bounds = array<i64: 128, 128>}, {pipeline_mode = #tpu.pipeline_mode<synchronous>, transform_indices = @transform_8, window_bounds = array<i64: 1, 128>}, {pipeline_mode = #tpu.pipeline_mode<synchronous>, transform_indices = @transform_9, window_bounds = array<i64: 1, 128>}, {pipeline_mode = #tpu.pipeline_mode<synchronous>, transform_indices = @transform_10, window_bounds = array<i64: 1, 128>}, {pipeline_mode = #tpu.pipeline_mode<synchronous>, transform_indices = @transform_11, window_bounds = array<i64: 128, 128>}, {pipeline_mode = #tpu.pipeline_mode<synchronous>, transform_indices = @transform_12, window_bounds = array<i64: 1, 128>}, {pipeline_mode = #tpu.pipeline_mode<synchronous>, transform_indices = @transform_13, window_bounds = array<i64: 1, 128>}, {pipeline_mode = #tpu.pipeline_mode<synchronous>, transform_indices = @transform_14, window_bounds = array<i64: 1, 128>}, {pipeline_mode = #tpu.pipeline_mode<synchronous>, transform_indices = @transform_15, window_bounds = array<i64: 128, 128>}, {pipeline_mode = #tpu.pipeline_mode<synchronous>, transform_indices = @transform_16, window_bounds = array<i64: 1, 128>}, {transform_indices = @transform_17, window_bounds = array<i64: 256, 128>}]} {
    %c0_i32 = arith.constant 0 : i32
    %0 = arith.cmpi eq, %arg1, %c0_i32 : i32
    %1 = arith.extui %0 : i1 to i32
    %c0_i32_0 = arith.constant 0 : i32
    %2 = arith.cmpi ne, %1, %c0_i32_0 : i32
    scf.if %2 {
      %cst_9 = arith.constant 0.000000e+00 : f32
      %15 = vector.broadcast %cst_9 : f32 to vector<256x17xf32>
      %c0_10 = arith.constant 0 : index
      %c0_11 = arith.constant 0 : index
      %16 = vector.load %arg20[%c0_10, %c0_11] : memref<256x17xf32, #tpu.memory_space<vmem>>, vector<256x17xf32>
      tpu.vector_store %arg20[%c0_10, %c0_11], %15 {strides = array<i32>} : memref<256x17xf32, #tpu.memory_space<vmem>>, vector<256x17xf32>,
    } else {
    }
    %c512_i32 = arith.constant 512 : i32
    %3 = arith.muli %arg1, %c512_i32 : i32
    %4 = tpu.assume_multiple %3, 512 : i32
    %c0 = arith.constant 0 : index
    %c0_1 = arith.constant 0 : index
    %5 = vector.load %arg20[%c0, %c0_1] : memref<256x17xf32, #tpu.memory_space<vmem>>, vector<256x17xf32>
    %c0_2 = arith.constant 0 : index
    %c0_3 = arith.constant 0 : index
    %6 = vector.load %arg2[%c0_2, %c0_3] : memref<256x512xbf16, #tpu.memory_space<vmem>>, vector<256x512xbf16>
    %7 = arith.index_cast %4 : i32 to index
    %c0_4 = arith.constant 0 : index
    %8 = vector.load %arg3[%7, %c0_4] : memref<512x17xbf16, #tpu.memory_space<vmem>>, vector<512x17xbf16>
    %cst = arith.constant dense<0.000000e+00> : vector<256x17xf32>
    %9 = tpu.matmul %6, %8, %cst {dimension_numbers = #tpu.dot_dimension_numbers<[1], [0], [0], [1], [0, 0, 1, 1], [], []>} : vector<256x512xbf16>, vector<512x17xbf16>, vector<256x17xf32> -> vector<256x17xf32>
    %10 = arith.addf %5, %9 : vector<256x17xf32>
    %c0_5 = arith.constant 0 : index
    %c0_6 = arith.constant 0 : index
    %11 = vector.load %arg20[%c0_5, %c0_6] : memref<256x17xf32, #tpu.memory_space<vmem>>, vector<256x17xf32>
    tpu.vector_store %arg20[%c0_5, %c0_6], %10 {strides = array<i32>} : memref<256x17xf32, #tpu.memory_space<vmem>>, vector<256x17xf32>,
    %c0_i32_7 = arith.constant 0 : i32
    %12 = arith.cmpi eq, %arg1, %c0_i32_7 : i32
    %13 = arith.extui %12 : i1 to i32
    %c0_i32_8 = arith.constant 0 : i32
    %14 = arith.cmpi ne, %13, %c0_i32_8 : i32
    scf.if %14 {
      %c0_9 = arith.constant 0 : index
      %c0_10 = arith.constant 0 : index
      %15 = vector.load %arg5[%c0_9, %c0_10] : memref<256x1xf32, #tpu.memory_space<vmem>>, vector<256x1xf32>
      %c0_11 = arith.constant 0 : index
      %c0_12 = arith.constant 0 : index
      %16 = vector.load %arg6[%c0_11, %c0_12] : memref<17x128xbf16, #tpu.memory_space<vmem>>, vector<17x128xbf16>
      %c0_13 = arith.constant 0 : index
      %c0_14 = arith.constant 0 : index
      %17 = vector.load %arg4[%c0_13, %c0_14] : memref<256x17xbf16, #tpu.memory_space<vmem>>, vector<256x17xbf16>
      %cst_15 = arith.constant dense<0.000000e+00> : vector<256x128xf32>
      %18 = tpu.matmul %17, %16, %cst_15 {dimension_numbers = #tpu.dot_dimension_numbers<[1], [0], [0], [1], [0, 0, 1, 1], [], []>} : vector<256x17xbf16>, vector<17x128xbf16>, vector<256x128xf32> -> vector<256x128xf32>
      %c0_16 = arith.constant 0 : index
      %c0_17 = arith.constant 0 : index
      %19 = vector.load %arg20[%c0_16, %c0_17] : memref<256x17xf32, #tpu.memory_space<vmem>>, vector<256x17xf32>
      %20 = vector.broadcast %15 : vector<256x1xf32> to vector<256x17xf32>
      %21 = arith.mulf %20, %19 : vector<256x17xf32>
      %22 = arith.truncf %21 : vector<256x17xf32> to vector<256x17xbf16>
      %cst_18 = arith.constant dense<0.000000e+00> : vector<256x128xf32>
      %23 = tpu.matmul %22, %16, %cst_18 {dimension_numbers = #tpu.dot_dimension_numbers<[1], [0], [0], [1], [0, 0, 1, 1], [], []>} : vector<256x17xbf16>, vector<17x128xbf16>, vector<256x128xf32> -> vector<256x128xf32>
      %24 = arith.mulf %15, %15 : vector<256x1xf32>
      %25 = vector.broadcast %24 : vector<256x1xf32> to vector<256x128xf32>
      %26 = arith.mulf %25, %18 : vector<256x128xf32>
      %27 = arith.addf %23, %26 : vector<256x128xf32>
      %cst_19 = arith.constant 0.899999976 : f32
      %28 = vector.broadcast %cst_19 : f32 to vector<256x128xf32>
      %29 = arith.mulf %28, %27 : vector<256x128xf32>
      %cst_20 = arith.constant 1.000000e-01 : f32
      %30 = vector.broadcast %cst_20 : f32 to vector<256x128xf32>
      %31 = arith.mulf %30, %18 : vector<256x128xf32>
      %32 = arith.addf %29, %31 : vector<256x128xf32>
      %33 = arith.truncf %32 : vector<256x128xf32> to vector<256x128xbf16>
      %c0_21 = arith.constant 0 : index
      %c0_22 = arith.constant 0 : index
      %34 = vector.load %arg7[%c0_21, %c0_22] : memref<128x128xbf16, #tpu.memory_space<vmem>>, vector<128x128xbf16>
      %cst_23 = arith.constant dense<0.000000e+00> : vector<256x128xf32>
      %35 = tpu.matmul %33, %34, %cst_23 {dimension_numbers = #tpu.dot_dimension_numbers<[1], [0], [0], [1], [0, 0, 1, 1], [], []>} : vector<256x128xbf16>, vector<128x128xbf16>, vector<256x128xf32> -> vector<256x128xf32>
      %cst_24 = arith.constant 0.693147182 : f32
      %36 = vector.broadcast %cst_24 : f32 to vector<256x128xf32>
      %37 = arith.mulf %36, %35 : vector<256x128xf32>
      %cst_25 = arith.constant 0.306852818 : f32
      %38 = vector.broadcast %cst_25 : f32 to vector<256x128xf32>
      %39 = arith.mulf %38, %32 : vector<256x128xf32>
      %40 = arith.addf %37, %39 : vector<256x128xf32>
      %c0_26 = arith.constant 0 : index
      %c0_27 = arith.constant 0 : index
      %41 = vector.load %arg8[%c0_26, %c0_27] : memref<1x128xf32, #tpu.memory_space<vmem>>, vector<1x128xf32>
      %42 = vector.broadcast %41 : vector<1x128xf32> to vector<256x128xf32>
      %43 = arith.addf %40, %42 : vector<256x128xf32>
      %cst_28 = arith.constant 0.000000e+00 : f32
      %44 = vector.broadcast %cst_28 : f32 to vector<256x128xf32>
      %45 = arith.maximumf %43, %44 : vector<256x128xf32>
      %46 = arith.truncf %45 : vector<256x128xf32> to vector<256x128xbf16>
      %c0_29 = arith.constant 0 : index
      %c0_30 = arith.constant 0 : index
      %47 = vector.load %arg9[%c0_29, %c0_30] : memref<128x128xbf16, #tpu.memory_space<vmem>>, vector<128x128xbf16>
      %cst_31 = arith.constant dense<0.000000e+00> : vector<256x128xf32>
      %48 = tpu.matmul %46, %47, %cst_31 {dimension_numbers = #tpu.dot_dimension_numbers<[1], [0], [0], [1], [0, 0, 1, 1], [], []>} : vector<256x128xbf16>, vector<128x128xbf16>, vector<256x128xf32> -> vector<256x128xf32>
      %c0_32 = arith.constant 0 : index
      %c0_33 = arith.constant 0 : index
      %49 = vector.load %arg10[%c0_32, %c0_33] : memref<1x128xf32, #tpu.memory_space<vmem>>, vector<1x128xf32>
      %50 = vector.broadcast %49 : vector<1x128xf32> to vector<256x128xf32>
      %51 = arith.addf %48, %50 : vector<256x128xf32>
      %c0_34 = arith.constant 0 : index
      %c0_35 = arith.constant 0 : index
      %52 = vector.load %arg11[%c0_34, %c0_35] : memref<1x128xf32, #tpu.memory_space<vmem>>, vector<1x128xf32>
      %c0_36 = arith.constant 0 : index
      %c0_37 = arith.constant 0 : index
      %53 = vector.load %arg12[%c0_36, %c0_37] : memref<1x128xf32, #tpu.memory_space<vmem>>, vector<1x128xf32>
      %cst_38 = arith.constant dense<0.000000e+00> : vector<256xf32>
      %54 = vector.multi_reduction <add>, %51, %cst_38 [1] : vector<256x128xf32> to vector<256xf32>
      %55 = vector.shape_cast %54 : vector<256xf32> to vector<256x1xf32>
      %cst_39 = arith.constant 1.280000e+02 : f32
      %56 = vector.broadcast %cst_39 : f32 to vector<256x1xf32>
      %57 = arith.divf %55, %56 : vector<256x1xf32>
      %58 = vector.broadcast %57 : vector<256x1xf32> to vector<256x128xf32>
      %59 = arith.subf %51, %58 : vector<256x128xf32>
      %60 = arith.mulf %59, %59 : vector<256x128xf32>
      %cst_40 = arith.constant dense<0.000000e+00> : vector<256xf32>
      %61 = vector.multi_reduction <add>, %60, %cst_40 [1] : vector<256x128xf32> to vector<256xf32>
      %62 = vector.shape_cast %61 : vector<256xf32> to vector<256x1xf32>
      %cst_41 = arith.constant 1.280000e+02 : f32
      %63 = vector.broadcast %cst_41 : f32 to vector<256x1xf32>
      %64 = arith.divf %62, %63 : vector<256x1xf32>
      %65 = vector.broadcast %57 : vector<256x1xf32> to vector<256x128xf32>
      %66 = arith.subf %51, %65 : vector<256x128xf32>
      %cst_42 = arith.constant 9.99999974E-6 : f32
      %67 = vector.broadcast %cst_42 : f32 to vector<256x1xf32>
      %68 = arith.addf %64, %67 : vector<256x1xf32>
      %69 = math.rsqrt %68 : vector<256x1xf32>
      %70 = vector.broadcast %69 : vector<256x1xf32> to vector<256x128xf32>
      %71 = arith.mulf %66, %70 : vector<256x128xf32>
      %72 = vector.broadcast %52 : vector<1x128xf32> to vector<256x128xf32>
      %73 = arith.mulf %71, %72 : vector<256x128xf32>
      %74 = vector.broadcast %53 : vector<1x128xf32> to vector<256x128xf32>
      %75 = arith.addf %73, %74 : vector<256x128xf32>
      %cst_43 = arith.constant 0.000000e+00 : f32
      %76 = vector.broadcast %cst_43 : f32 to vector<256x128xf32>
      %77 = arith.maximumf %75, %76 : vector<256x128xf32>
      %78 = arith.truncf %77 : vector<256x128xf32> to vector<256x128xbf16>
      %c0_44 = arith.constant 0 : index
      %c0_45 = arith.constant 0 : index
      %79 = vector.load %arg13[%c0_44, %c0_45] : memref<128x128xbf16, #tpu.memory_space<vmem>>, vector<128x128xbf16>
      %cst_46 = arith.constant dense<0.000000e+00> : vector<256x128xf32>
      %80 = tpu.matmul %78, %79, %cst_46 {dimension_numbers = #tpu.dot_dimension_numbers<[1], [0], [0], [1], [0, 0, 1, 1], [], []>} : vector<256x128xbf16>, vector<128x128xbf16>, vector<256x128xf32> -> vector<256x128xf32>
      %c0_47 = arith.constant 0 : index
      %c0_48 = arith.constant 0 : index
      %81 = vector.load %arg14[%c0_47, %c0_48] : memref<1x128xf32, #tpu.memory_space<vmem>>, vector<1x128xf32>
      %82 = vector.broadcast %81 : vector<1x128xf32> to vector<256x128xf32>
      %83 = arith.addf %80, %82 : vector<256x128xf32>
      %c0_49 = arith.constant 0 : index
      %c0_50 = arith.constant 0 : index
      %84 = vector.load %arg15[%c0_49, %c0_50] : memref<1x128xf32, #tpu.memory_space<vmem>>, vector<1x128xf32>
      %c0_51 = arith.constant 0 : index
      %c0_52 = arith.constant 0 : index
      %85 = vector.load %arg16[%c0_51, %c0_52] : memref<1x128xf32, #tpu.memory_space<vmem>>, vector<1x128xf32>
      %cst_53 = arith.constant dense<0.000000e+00> : vector<256xf32>
      %86 = vector.multi_reduction <add>, %83, %cst_53 [1] : vector<256x128xf32> to vector<256xf32>
      %87 = vector.shape_cast %86 : vector<256xf32> to vector<256x1xf32>
      %cst_54 = arith.constant 1.280000e+02 : f32
      %88 = vector.broadcast %cst_54 : f32 to vector<256x1xf32>
      %89 = arith.divf %87, %88 : vector<256x1xf32>
      %90 = vector.broadcast %89 : vector<256x1xf32> to vector<256x128xf32>
      %91 = arith.subf %83, %90 : vector<256x128xf32>
      %92 = arith.mulf %91, %91 : vector<256x128xf32>
      %cst_55 = arith.constant dense<0.000000e+00> : vector<256xf32>
      %93 = vector.multi_reduction <add>, %92, %cst_55 [1] : vector<256x128xf32> to vector<256xf32>
      %94 = vector.shape_cast %93 : vector<256xf32> to vector<256x1xf32>
      %cst_56 = arith.constant 1.280000e+02 : f32
      %95 = vector.broadcast %cst_56 : f32 to vector<256x1xf32>
      %96 = arith.divf %94, %95 : vector<256x1xf32>
      %97 = vector.broadcast %89 : vector<256x1xf32> to vector<256x128xf32>
      %98 = arith.subf %83, %97 : vector<256x128xf32>
      %cst_57 = arith.constant 9.99999974E-6 : f32
      %99 = vector.broadcast %cst_57 : f32 to vector<256x1xf32>
      %100 = arith.addf %96, %99 : vector<256x1xf32>
      %101 = math.rsqrt %100 : vector<256x1xf32>
      %102 = vector.broadcast %101 : vector<256x1xf32> to vector<256x128xf32>
      %103 = arith.mulf %98, %102 : vector<256x128xf32>
      %104 = vector.broadcast %84 : vector<1x128xf32> to vector<256x128xf32>
      %105 = arith.mulf %103, %104 : vector<256x128xf32>
      %106 = vector.broadcast %85 : vector<1x128xf32> to vector<256x128xf32>
      %107 = arith.addf %105, %106 : vector<256x128xf32>
      %cst_58 = arith.constant 0.000000e+00 : f32
      %108 = vector.broadcast %cst_58 : f32 to vector<256x128xf32>
      %109 = arith.maximumf %107, %108 : vector<256x128xf32>
      %110 = arith.truncf %109 : vector<256x128xf32> to vector<256x128xbf16>
      %c0_59 = arith.constant 0 : index
      %c0_60 = arith.constant 0 : index
      %111 = vector.load %arg17[%c0_59, %c0_60] : memref<128x128xbf16, #tpu.memory_space<vmem>>, vector<128x128xbf16>
      %cst_61 = arith.constant dense<0.000000e+00> : vector<256x128xf32>
      %112 = tpu.matmul %110, %111, %cst_61 {dimension_numbers = #tpu.dot_dimension_numbers<[1], [0], [0], [1], [0, 0, 1, 1], [], []>} : vector<256x128xbf16>, vector<128x128xbf16>, vector<256x128xf32> -> vector<256x128xf32>
      %c0_62 = arith.constant 0 : index
      %c0_63 = arith.constant 0 : index
      %113 = vector.load %arg18[%c0_62, %c0_63] : memref<1x128xf32, #tpu.memory_space<vmem>>, vector<1x128xf32>
      %114 = vector.broadcast %113 : vector<1x128xf32> to vector<256x128xf32>
      %115 = arith.addf %112, %114 : vector<256x128xf32>
      %c0_64 = arith.constant 0 : index
      %c0_65 = arith.constant 0 : index
      %116 = vector.load %arg19[%c0_64, %c0_65] : memref<256x128xf32, #tpu.memory_space<vmem>>, vector<256x128xf32>
      tpu.vector_store %arg19[%c0_64, %c0_65], %115 {strides = array<i32>} : memref<256x128xf32, #tpu.memory_space<vmem>>, vector<256x128xf32>,
    } else {
    }
    return
  }
  func.func @transform_0(%arg0: i32, %arg1: i32) -> (i32, i32) {
    %c0_i32 = arith.constant 0 : i32
    return %arg0, %arg1 : i32, i32
  }
  func.func @transform_1(%arg0: i32, %arg1: i32) -> (i32, i32) {
    %c0_i32 = arith.constant 0 : i32
    %c0_i32_0 = arith.constant 0 : i32
    %c0_i32_1 = arith.constant 0 : i32
    return %c0_i32, %c0_i32_0 : i32, i32
  }
  func.func @transform_2(%arg0: i32, %arg1: i32) -> (i32, i32) {
    %c0_i32 = arith.constant 0 : i32
    %c0_i32_0 = arith.constant 0 : i32
    return %arg0, %c0_i32 : i32, i32
  }
  func.func @transform_3(%arg0: i32, %arg1: i32) -> (i32, i32) {
    %c0_i32 = arith.constant 0 : i32
    %c0_i32_0 = arith.constant 0 : i32
    return %arg0, %c0_i32 : i32, i32
  }
  func.func @transform_4(%arg0: i32, %arg1: i32) -> (i32, i32) {
    %c0_i32 = arith.constant 0 : i32
    %c0_i32_0 = arith.constant 0 : i32
    %c0_i32_1 = arith.constant 0 : i32
    return %c0_i32, %c0_i32_0 : i32, i32
  }
  func.func @transform_5(%arg0: i32, %arg1: i32) -> (i32, i32) {
    %c0_i32 = arith.constant 0 : i32
    %c0_i32_0 = arith.constant 0 : i32
    %c0_i32_1 = arith.constant 0 : i32
    return %c0_i32, %c0_i32_0 : i32, i32
  }
  func.func @transform_6(%arg0: i32, %arg1: i32) -> (i32, i32) {
    %c0_i32 = arith.constant 0 : i32
    %c0_i32_0 = arith.constant 0 : i32
    %c0_i32_1 = arith.constant 0 : i32
    return %c0_i32, %c0_i32_0 : i32, i32
  }
  func.func @transform_7(%arg0: i32, %arg1: i32) -> (i32, i32) {
    %c0_i32 = arith.constant 0 : i32
    %c0_i32_0 = arith.constant 0 : i32
    %c0_i32_1 = arith.constant 0 : i32
    return %c0_i32, %c0_i32_0 : i32, i32
  }
  func.func @transform_8(%arg0: i32, %arg1: i32) -> (i32, i32) {
    %c0_i32 = arith.constant 0 : i32
    %c0_i32_0 = arith.constant 0 : i32
    %c0_i32_1 = arith.constant 0 : i32
    return %c0_i32, %c0_i32_0 : i32, i32
  }
  func.func @transform_9(%arg0: i32, %arg1: i32) -> (i32, i32) {
    %c0_i32 = arith.constant 0 : i32
    %c0_i32_0 = arith.constant 0 : i32
    %c0_i32_1 = arith.constant 0 : i32
    return %c0_i32, %c0_i32_0 : i32, i32
  }
  func.func @transform_10(%arg0: i32, %arg1: i32) -> (i32, i32) {
    %c0_i32 = arith.constant 0 : i32
    %c0_i32_0 = arith.constant 0 : i32
    %c0_i32_1 = arith.constant 0 : i32
    return %c0_i32, %c0_i32_0 : i32, i32
  }
  func.func @transform_11(%arg0: i32, %arg1: i32) -> (i32, i32) {
    %c0_i32 = arith.constant 0 : i32
    %c0_i32_0 = arith.constant 0 : i32
    %c0_i32_1 = arith.constant 0 : i32
    return %c0_i32, %c0_i32_0 : i32, i32
  }
  func.func @transform_12(%arg0: i32, %arg1: i32) -> (i32, i32) {
    %c0_i32 = arith.constant 0 : i32
    %c0_i32_0 = arith.constant 0 : i32
    %c0_i32_1 = arith.constant 0 : i32
    return %c0_i32, %c0_i32_0 : i32, i32
  }
  func.func @transform_13(%arg0: i32, %arg1: i32) -> (i32, i32) {
    %c0_i32 = arith.constant 0 : i32
    %c0_i32_0 = arith.constant 0 : i32
    %c0_i32_1 = arith.constant 0 : i32
    return %c0_i32, %c0_i32_0 : i32, i32
  }
  func.func @transform_14(%arg0: i32, %arg1: i32) -> (i32, i32) {
    %c0_i32 = arith.constant 0 : i32
    %c0_i32_0 = arith.constant 0 : i32
    %c0_i32_1 = arith.constant 0 : i32
    return %c0_i32, %c0_i32_0 : i32, i32
  }
  func.func @transform_15(%arg0: i32, %arg1: i32) -> (i32, i32) {
    %c0_i32 = arith.constant 0 : i32
    %c0_i32_0 = arith.constant 0 : i32
    %c0_i32_1 = arith.constant 0 : i32
    return %c0_i32, %c0_i32_0 : i32, i32
  }
  func.func @transform_16(%arg0: i32, %arg1: i32) -> (i32, i32) {
    %c0_i32 = arith.constant 0 : i32
    %c0_i32_0 = arith.constant 0 : i32
    %c0_i32_1 = arith.constant 0 : i32
    return %c0_i32, %c0_i32_0 : i32, i32
  }
  func.func @transform_17(%arg0: i32, %arg1: i32) -> (i32, i32) {
    %c0_i32 = arith.constant 0 : i32
    %c0_i32_0 = arith.constant 0 : i32
    return %arg0, %c0_i32 : i32, i32
  }
}

</mosaic_0001>

<bundles_post_ra>
// kernel: tpu_custom_call.1
= control target key start
LH: loop header
LB: loop body
LE: loop exit
PB: predicated region body
PF: predicated region fallthrough
CT: control target
= control target key end

     0   :  { %s8805_s0 = inlined_call_operand.vmem [shape: bf16[512,512], index: 0, kind: input, shape index: {}]   ;;  %s8806_s1 = inlined_call_operand.vmem [shape: bf16[512,17], index: 1, kind: input, shape index: {}]   ;;  %s8807_s2 = inlined_call_operand.vmem [shape: bf16[512,17], index: 2, kind: input, shape index: {}]   ;;  %s8808_s3 = inlined_call_operand.vmem [shape: f32[512,1], index: 3, kind: input, shape index: {}]   ;;  %s8809_s4 = inlined_call_operand.vmem [shape: bf16[17,128], index: 4, kind: input, shape index: {}]   ;;  %s8810_s5 = inlined_call_operand.vmem [shape: bf16[128,128], index: 5, kind: input, shape index: {}]   ;;  %s8811_s6 = inlined_call_operand.vmem [shape: f32[1,128], index: 6, kind: input, shape index: {}]   ;;  %s8812_s7 = inlined_call_operand.hbm [shape: bf16[128,128], index: 7, kind: input, shape index: {}]   ;;  %s8813_s8 = inlined_call_operand.vmem [shape: f32[1,128], index: 8, kind: input, shape index: {}]   ;;  %s8814_s9 = inlined_call_operand.vmem [shape: f32[1,128], index: 9, kind: input, shape index: {}]   ;;  %s8815_s10 = inlined_call_operand.vmem [shape: f32[1,128], index: 10, kind: input, shape index: {}]   ;;  %s8816_s11 = inlined_call_operand.hbm [shape: bf16[128,128], index: 11, kind: input, shape index: {}]   ;;  %s8817_s12 = inlined_call_operand.vmem [shape: f32[1,128], index: 12, kind: input, shape index: {}]   ;;  %s8818_s13 = inlined_call_operand.vmem [shape: f32[1,128], index: 13, kind: input, shape index: {}]   ;;  %s8819_s14 = inlined_call_operand.vmem [shape: f32[1,128], index: 14, kind: input, shape index: {}]   ;;  %s8820_s15 = inlined_call_operand.hbm [shape: bf16[128,128], index: 15, kind: input, shape index: {}]   ;;  %s8821_s16 = inlined_call_operand.vmem [shape: f32[1,128], index: 16, kind: input, shape index: {}]   ;;  %s8822_s17 = inlined_call_operand.hbm [shape: f32[512,128], index: 17, kind: output, shape index: {}]  }
   0x1   :  { %8838 = sst [smem:[#allocation22_spill]] %s8805_s0 }
   0x2   :  { %8839 = sst [smem:[#allocation23_spill]] %s8806_s1 }
   0x3   :  { %8840 = sst [smem:[#allocation24_spill]] %s8816_s11 }
   0x4   :  { %8841 = sst [smem:[#allocation25_spill]] %s8821_s16 }
   0x5   :  { %8842 = sst [smem:[#allocation26_spill]] %s8822_s17 }
   0x6   :  { %22 = vsyncpa [#allocation4], 0 }
   0x7   :  { %23 = vsyncpa [#allocation7], 0 }
   0x8   :  { %24 = vsyncpa [#allocation5], 0 }
   0x9   :  { %26 = vsyncpa [#allocation5 + $0x1], 0  ;;  %s6656_s24 = smov 0   ;;  %s6658_s25 = smov 0  }
   0xa   :  { %s6660_s26 = smov 0   ;;  %s6662_s27 = smov 0  }
   0xb   :  { %s6664_s28 = smov 0   ;;  %s6666_s29 = smov 0  }
   0xc LB: > { %8843 = sst [smem:[#allocation13_spill]] %s6534_s24  ;;  %s5338_s0 = sadd.s32 4294967295, %s6554_s29   ;;  %s6554_s29 = sphi %s6666_s29, %s32_s29   ;;  %s6550_s28 = sphi %s6664_s28, %s8874_s28   ;;  %s6546_s27 = sphi %s6662_s27, %s8873_s27   ;;  %s6542_s26 = sphi %s6660_s26, %s8872_s26   ;;  %s6538_s25 = sphi %s6658_s25, %s8871_s25   ;;  %s6534_s24 = sphi %s6656_s24, %s8870_s24  }
   0xd   : > { %8844 = sst [smem:[#allocation14_spill]] %s6538_s25  ;;  %s5339_s30 = sadd.s32 4294967294, %s6554_s29  }
   0xe   : > { %8845 = sst [smem:[#allocation15_spill]] %s6542_s26  ;;  %s44_s18 = sadd.s32 1, %s6550_s28 }
   0xf   : > { %8846 = sst [smem:[#allocation16_spill]] %s6550_s28  ;;  %s425_s19 = sadd.s32 1, %s6542_s26 }
  0x10   : > { %8847 = sst [smem:[#allocation17_spill]] %s6554_s29  ;;  %p46_p0 = scmp.ge.s32.totalorder %s44_s18, 2 }
  0x11   : > { %p435_p1 = scmp.ne.s32.totalorder %s6542_s26, %s6538_s25  ;;  %p436_p2 = scmp.eq.s32.totalorder %s5338_s0, 1 }
  0x12   : > { %p441_p3 = scmp.ne.s32.totalorder %s6538_s25, %s6534_s24  ;;  %s8876_s18 = smov (%p46_p0, %s44_s18), 0 }
  0x13   : > { %8848 = sst [smem:[#allocation18_spill]] %s8876_s18  ;;  %p6696_p4 = por %p436_p2, %p435_p1 }
  0x14   : > { %p442_p5 = scmp.eq.s32.totalorder %s5339_s30, 1  ;;  %s422_s20 = ssub.s32 %s6550_s28, %s8876_s18 }
  0x15   : > { %s8849_s1 = scalar_select %p6696_p4, 1, 0 }
  0x16   : > { %p5340_p6 = scmp.ge.s32.totalorder %s6554_s29, 1  ;;  %p423_p7 = scmp.eq.s32.totalorder %s422_s20, 0 }
  0x17   : > { %8850 = sst [smem:[#allocation19_spill]] %s8849_s1  ;;  %p6703_p8 = por %p442_p5, %p441_p3 }
  0x18   : > { %p449_p9 = scmp.lt.s32.totalorder %s6554_s29, 3  ;;  %p6715_p11 = scmp.eq.s32.totalorder %s5338_s0, 0 }
  0x19   : > { %s8851_s21 = scalar_select %p6703_p8, 1, 0 }
  0x1a   : > { %s6709_s22 = scalar_select %p423_p7, %s6542_s26, %s425_s19  }
  0x1b   : > { %8852 = sst [smem:[#allocation20_spill]] %s8851_s21  ;;  %p6711_p10 = pnand %p5340_p6, %p449_p9 }
  0x1c   : > { %8853 = sst [smem:[#allocation21_spill]] %s6709_s22  ;;  %s6556_s28 = smov [#allocation6]  }
  0x1d   : > { %p6151_p12 = pneg %p6711_p10  ;;  %s8856_s11 = sld [smem:[#allocation24_spill]] }
  0x1e   : > { %s497_s0 = sshll.u32 %s6556_s28, 4  ;;  %s6557_s22 = smov 64   ;;  %s498_s0 = int_to_ptr.vmem [resolvable:$true] %s497_s0 }
  0x1f   : > { %p6726_p13 = pnand %p6715_p11, %p6151_p12  ;;  %s6558_s26 = smov 4  }
  0x20   : > { %s472_s30 = sshll.u32 %s8812_s7, 4  ;;  %s6559_s20 = smov [#allocation3]   ;;  %s473_s30 = int_to_ptr.hbm [resolvable:$true] %s472_s30 }
  0x21   : > { %s518_s16 = sshll.u32 %s8820_s15, 4  ;;  %s6560_s28 = smov [#allocation8]   ;;  %s519_s16 = int_to_ptr.hbm [resolvable:$true] %s518_s16 }
  0x22   : > { %s520_s25 = sshll.u32 %s6560_s28, 4  ;;  %572 = sbr.rel (%p6711_p10) target bundleno = 2298 (0x8fa), region = 88  ;;  %s521_s25 = int_to_ptr.vmem [resolvable:$true] %s520_s25 }
  0x23   : > { %s495_s18 = sshll.u32 %s8856_s11, 4  ;;  %s474_s11 = sshll.u32 %s6559_s20, 4  ;;  %s496_s18 = int_to_ptr.hbm [resolvable:$true] %s495_s18  ;;  %s475_s11 = int_to_ptr.vmem [resolvable:$true] %s474_s11 }
  0x24   : > { %6157 = dma.hbm_to_vmem [thread:$0]  (!%p6726_p13), %s496_s18, 1024, %s498_s0, [#allocation7], %s6557_s22, %s6557_s22, %s6558_s26  }
  0x25   : > { %6154 = dma.hbm_to_vmem [thread:$0]  (!%p6726_p13), %s473_s30, 1024, %s475_s11, [#allocation4], %s6557_s22, %s6557_s22, %s6558_s26  }
  0x26   : > { %6160 = dma.hbm_to_vmem [thread:$0]  (!%p6726_p13), %s519_s16, 1024, %s521_s25, [#allocation7], %s6557_s22, %s6557_s22, %s6558_s26  }
  0x27   : > { %6521 = dma.done.wait (%p6715_p11), [#allocation4], 1024  }
  0x28   : > { %6523 = vsyncadd (%p6715_p11), [#allocation4], 4294966272 }
  0x29   : > { %6525 = dma.done.wait (%p6715_p11), [#allocation7], 2048  }
  0x2a   : > { %6527 = vsyncadd (%p6715_p11), [#allocation7], 4294965248  ;;  %s5350_s11 = sshll.u32 %s6546_s27, 5  ;;  %v6561_v0 = vmov 0   ;;  %s8858_s26 = sld [smem:[#allocation23_spill]]  ;;  %vm2018_vm0 = vcmask 1040384  }
  0x2b   : > { %6230 = vset.pattern.permute.xlu0 %v6561_v0  ;;  %p652_p0 = scmp.lt.s32.totalorder %s5350_s11, 63  ;;  %6231 = vset.pattern.permute.xlu1 %v6561_v0  ;;  %vm680_vm1 = vcmask 138240   ;;  %s6120_s25 = sshll.u32 %s6546_s27, 8 }
  0x2c   : > { %6232 = vset.pattern.permute.xlu2 %v6561_v0  ;;  %s8866_s23 = sld [smem:[#allocation26_spill]] }
  0x2d   : > { %s8878_s11 = smov (!%p652_p0, %s5350_s11), 63 }
  0x2e   : > { %s5356_s16 = sshll.u32 %s8878_s11, 3  ;;  %s5354_s0 = sshll.u32 %s8878_s11, 2 }
  0x2f   : > { %s6768_s22 = scalar_lea.vmem %s8808_s3, %s5356_s16  ;;  %s5974_s16 = sshll.u32 %s8878_s11, 4 }
  0x30   : > { %s8859_s18 = smov %s8858_s26  ;;  %v6046_v1 = vld [vmem:[%s8858_s26 + $0x38] sm:$0xff]  ;;  %v6777_v5 = vld [vmem:[%s6768_s22] sm:$0xff]  ;;  %v6793_v10 = vld [vmem:[%s6768_s22 + $0x8] sm:$0xff]  ;;  %s8860_s26 = sld [smem:[#allocation22_spill]] }
  0x31   : > { %v6054_v2 = vld [vmem:[%s8859_s18 + $0x78] sm:$0xff]  ;;  %1390 = vmatpush.bf16.msra.mxu0 %v6046_v1  ;;  %6121 = vmatpush.bf16.msra.mxu2 %v6046_v1  ;;  %v6045_v3 = vld [vmem:[%s8859_s18 + $0x30] sm:$0xff]  ;;  %v6044_v6 = vld [vmem:[%s8859_s18 + $0x28] sm:$0xff]  ;;  %v2353_v47 = vmul.f32 %v6777_v5, %v6777_v5  ;;  %s7030_s28 = scalar_lea.vmem %s8807_s2, %s5354_s0  ;;  %s8864_s0 = sld [smem:[#allocation25_spill]] }
  0x32   : > { %6129 = vmatpush.bf16.msra.mxu3 %v6054_v2  ;;  %v6053_v4 = vld [vmem:[%s8859_s18 + $0x70] sm:$0xff]  ;;  %1479 = vmatpush.bf16.msra.mxu1 %v6054_v2  ;;  %v6052_v7 = vld [vmem:[%s8859_s18 + $0x68] sm:$0xff]  ;;  %v6043_v8 = vld [vmem:[%s8859_s18 + $0x20] sm:$0xff]  ;;  %s5201_s19 = scalar_lea.hbm %s8866_s23, %s6120_s25  ;;  %s6488_s25 = scalar_lea.hbm %s8866_s23, 512 }
  0x33   : > { %2147 = vperm.xlu0 %6230, %v6777_v5   ;;  %v6051_v9 = vld [vmem:[%s8859_s18 + $0x60] sm:$0xff]  ;;  %v6042_v11 = vld [vmem:[%s8859_s18 + $0x18] sm:$0xff]  ;;  %v6041_v13 = vld [vmem:[%s8859_s18 + $0x10] sm:$0xff]  ;;  %s5204_s11 = sshll.u32 %s5201_s19, 4  ;;  %s5205_s11 = int_to_ptr.hbm [resolvable:$true] %s5204_s11 }
  0x34   : > { %v6050_v12 = vld [vmem:[%s8859_s18 + $0x58] sm:$0xff]  ;;  %v6806_v14 = vld [vmem:[%s6768_s22 + $0x30] sm:$0xff]  ;;  %v6040_v16 = vld [vmem:[%s8859_s18 + $0x8] sm:$0xff]  ;;  %s6482_s27 = sshra.s32 %s5205_s11, 4  ;;  %s6483_s27 = int_to_ptr.hbm [resolvable:$true] %s6482_s27 }
  0x35   : > { %1391 = vmatpush.bf16.msra.mxu0 %v6045_v3  ;;  %6122 = vmatpush.bf16.msra.mxu2 %v6045_v3  ;;  %v6049_v15 = vld [vmem:[%s8859_s18 + $0x50] sm:$0xff]  ;;  %v6048_v17 = vld [vmem:[%s8859_s18 + $0x48] sm:$0xff]  ;;  %v6039_v18 = vld [vmem:[%s8859_s18] sm:$0xff]  ;;  %p6489_p5 = scmp.lt.s32.totalorder %s6483_s27, %s8866_s23 }
  0x36   : > { %6130 = vmatpush.bf16.msra.mxu3 %v6053_v4  ;;  %1480 = vmatpush.bf16.msra.mxu1 %v6053_v4  ;;  %s6816_s24 = scalar_lea.vmem %s8860_s26, %s5974_s16  ;;  %v6047_v19 = vld [vmem:[%s8859_s18 + $0x40] sm:$0xff]  ;;  %v6835_v24 = vld [vmem:[%s6768_s22 + $0x48] sm:$0xff]  ;;  %v6062_v27 = vld [vmem:[%s8859_s18 + $0xb8] sm:$0xff] }
  0x37   : > { %v5359_v20 = vld [vmem:[%s6816_s24] sm:$0xf]  ;;  %v5977_v21 = vld [vmem:[%s6816_s24 + $0xc] sm:$0xf0]  ;;  %v6007_v25 = vld [vmem:[%s6816_s24 + $0x104] sm:$0xf] }
  0x38   : > { %v5487_v22 = vld [vmem:[%s6816_s24 + $0x100] sm:$0xf]  ;;  %v6009_v23 = vld [vmem:[%s6816_s24 + $0x10c] sm:$0xf0]  ;;  %v5489_v26 = vld [vmem:[%s6816_s24 + $0x110] sm:$0xf0]  ;;  %v5360_v29 = vor.u32 %v5977_v21, %v5359_v20 }
  0x39   : > { %1392 = vmatpush.bf16.msra.mxu0 %v6044_v6  ;;  %6123 = vmatpush.bf16.msra.mxu2 %v6044_v6  ;;  %v6070_v28 = vld [vmem:[%s8859_s18 + $0xf8] sm:$0xff]  ;;  %v5488_v30 = vor.u32 %v6009_v23, %v5487_v22  ;;  %v5492_v31 = vor.u32 %v6007_v25, %v5489_v26  ;;  %v6061_v32 = vld [vmem:[%s8859_s18 + $0xb0] sm:$0xff]  ;;  %v6853_v34 = vld [vmem:[%s6768_s22 + $0x60] sm:$0xff] }
  0x3a   : > { %6131 = vmatpush.bf16.msra.mxu3 %v6052_v7  ;;  %1481 = vmatpush.bf16.msra.mxu1 %v6052_v7  ;;  %v6069_v33 = vld [vmem:[%s8859_s18 + $0xf0] sm:$0xff]  ;;  %v6060_v35 = vld [vmem:[%s8859_s18 + $0xa8] sm:$0xff]  ;;  %v5375_v37 = vld [vmem:[%s6816_s24 + $0x20] sm:$0xf] }
  0x3b   : > { %2152 = vperm.xlu0 %6230, %v6793_v10   ;;  %v6068_v36 = vld [vmem:[%s8859_s18 + $0xe8] sm:$0xff]  ;;  %v5981_v38 = vld [vmem:[%s6816_s24 + $0x2c] sm:$0xf0]  ;;  %v5503_v39 = vld [vmem:[%s6816_s24 + $0x120] sm:$0xf] }
  0x3c   : > { %v6013_v40 = vld [vmem:[%s6816_s24 + $0x12c] sm:$0xf0]  ;;  %v6867_v41 = vld [vmem:[%s6768_s22 + $0x78] sm:$0xff]  ;;  %v6011_v42 = vld [vmem:[%s6816_s24 + $0x124] sm:$0xf]  ;;  %v5376_v44 = vor.u32 %v5981_v38, %v5375_v37 }
  0x3d   : > { %1393 = vmatpush.bf16.msra.mxu0 %v6043_v8  ;;  %6124 = vmatpush.bf16.msra.mxu2 %v6043_v8  ;;  %v5505_v43 = vld [vmem:[%s6816_s24 + $0x130] sm:$0xf0]  ;;  %v5504_v45 = vor.u32 %v6013_v40, %v5503_v39  ;;  %v6059_v48 = vld [vmem:[%s8859_s18 + $0xa0] sm:$0xff]  ;;  %v5985_v51 = vld [vmem:[%s6816_s24 + $0x4c] sm:$0xf0] }
  0x3e   : > { %6132 = vmatpush.bf16.msra.mxu3 %v6051_v9  ;;  %1482 = vmatpush.bf16.msra.mxu1 %v6051_v9  ;;  %v5508_v46 = vor.u32 %v6011_v42, %v5505_v43  ;;  %v6067_v49 = vld [vmem:[%s8859_s18 + $0xe0] sm:$0xff]  ;;  %v6017_v53 = vld [vmem:[%s6816_s24 + $0x14c] sm:$0xf0]  ;;  %v6885_v54 = vld [vmem:[%s6768_s22 + $0x98] sm:$0xff] }
  0x3f   : > { %v5391_v50 = vld [vmem:[%s6816_s24 + $0x40] sm:$0xf]  ;;  %v6015_v55 = vld [vmem:[%s6816_s24 + $0x144] sm:$0xf]  ;;  %v5521_v56 = vld [vmem:[%s6816_s24 + $0x150] sm:$0xf0] }
  0x40   : > { %v5519_v52 = vld [vmem:[%s6816_s24 + $0x140] sm:$0xf]  ;;  %v5392_v57 = vor.u32 %v5985_v51, %v5391_v50  ;;  %v5524_v59 = vor.u32 %v6015_v55, %v5521_v56  ;;  %v6058_v61 = vld [vmem:[%s8859_s18 + $0x98] sm:$0xff]  ;;  %v6901_v63 = vld [vmem:[%s6768_s22 + $0x28] sm:$0xff] }
  0x41   : > { %1394 = vmatpush.bf16.msra.mxu0 %v6042_v11  ;;  %6125 = vmatpush.bf16.msra.mxu2 %v6042_v11  ;;  %v5520_v58 = vor.u32 %v6017_v53, %v5519_v52  ;;  %v6891_v60 = vld [vmem:[%s6768_s22 + $0xa0] sm:$0xff]  ;;  %v6066_v62 = vld [vmem:[%s8859_s18 + $0xd8] sm:$0xff]  ;;  %v2358_v2 = vmul.f32 %v6901_v63, %v6901_v63  ;;  %v5989_v3 = vld [vmem:[%s6816_s24 + $0x6c] sm:$0xf0]  ;;  %v2020_v52 = vsel %vm2018_vm0, 65535, %v6561_v0 }
  0x42   : > { %6133 = vmatpush.bf16.msra.mxu3 %v6050_v12  ;;  %1483 = vmatpush.bf16.msra.mxu1 %v6050_v12  ;;  %v5407_v1 = vld [vmem:[%s6816_s24 + $0x60] sm:$0xf]  ;;  %v6021_v5 = vld [vmem:[%s6816_s24 + $0x16c] sm:$0xf0]  ;;  %v6019_v6 = vld [vmem:[%s6816_s24 + $0x164] sm:$0xf]  ;;  %v2359_v12 = vmul.f32 %v6806_v14, %v6806_v14 }
  0x43   : > { %2177 = vperm.xlu0 %6230, %v6806_v14   ;;  %v5535_v4 = vld [vmem:[%s6816_s24 + $0x160] sm:$0xf]  ;;  %v5537_v7 = vld [vmem:[%s6816_s24 + $0x170] sm:$0xf0]  ;;  %v5408_v8 = vor.u32 %v5989_v3, %v5407_v1  ;;  %v6928_v20 = vld [vmem:[%s6768_s22 + $0xc8] sm:$0xff] }
  0x44   : > { %v5536_v9 = vor.u32 %v6021_v5, %v5535_v4  ;;  %v5540_v11 = vor.u32 %v6019_v6, %v5537_v7  ;;  %v5423_v14 = vld [vmem:[%s6816_s24 + $0x80] sm:$0xf]  ;;  %v6023_v21 = vld [vmem:[%s6816_s24 + $0x184] sm:$0xf]  ;;  %v5553_v22 = vld [vmem:[%s6816_s24 + $0x190] sm:$0xf0] }
  0x45   : > { %1395 = vmatpush.bf16.msra.mxu0 %v6041_v13  ;;  %6126 = vmatpush.bf16.msra.mxu2 %v6041_v13  ;;  %v6057_v13 = vld [vmem:[%s8859_s18 + $0x90] sm:$0xff]  ;;  %v5556_v26 = vor.u32 %v6023_v21, %v5553_v22  ;;  %v5567_v37 = vld [vmem:[%s6816_s24 + $0x1a0] sm:$0xf]  ;;  %v6027_v39 = vld [vmem:[%s6816_s24 + $0x1a4] sm:$0xf] }
  0x46   : > { %6134 = vmatpush.bf16.msra.mxu3 %v6049_v15  ;;  %1484 = vmatpush.bf16.msra.mxu1 %v6049_v15  ;;  %v6065_v15 = vld [vmem:[%s8859_s18 + $0xd0] sm:$0xff]  ;;  %v5975_v50 = vld [vmem:[%s6816_s24 + $0x4] sm:$0xf]  ;;  %v6981_v56 = vld [vmem:[%s6768_s22 + $0x68] sm:$0xff] }
  0x47   : > { %v6029_v38 = vld [vmem:[%s6816_s24 + $0x1ac] sm:$0xf0]  ;;  %v5569_v40 = vld [vmem:[%s6816_s24 + $0x1b0] sm:$0xf0]  ;;  %v6988_v1 = vld [vmem:[%s6768_s22 + $0xf8] sm:$0xff] }
  0x48   : > { %v5568_v43 = vor.u32 %v6029_v38, %v5567_v37  ;;  %v5361_v51 = vld [vmem:[%s6816_s24 + $0x10] sm:$0xf0]  ;;  %v6071_v5 = vld [vmem:[%s8809_s4] sm:$0xff]  ;;  %v5976_v37 = vld [vmem:[%s6816_s24 + $0xc] sm:$0xf] }
  0x49   : > { %1396 = vmatpush.bf16.msra.mxu0 %v6040_v16  ;;  %6127 = vmatpush.bf16.msra.mxu2 %v6040_v16  ;;  %v6920_v16 = vld [vmem:[%s6768_s22 + $0x10] sm:$0xff]  ;;  %v5364_v53 = vor.u32 %v5975_v50, %v5361_v51  ;;  %v1830_v7 = vld [vmem:[%s6768_s22 + $0x80] sm:$0xff]  ;;  %v5369_v38 = vld [vmem:[%s6816_s24 + $0x18] sm:$0xf0] }
  0x4a   : > { %6135 = vmatpush.bf16.msra.mxu3 %v6048_v17  ;;  %1485 = vmatpush.bf16.msra.mxu1 %v6048_v17  ;;  %v5993_v17 = vld [vmem:[%s6816_s24 + $0x8c] sm:$0xf0]  ;;  %v5585_v3 = vld [vmem:[%s6816_s24 + $0x1d0] sm:$0xf0]  ;;  %v7054_v51 = vld [vmem:[%s6768_s22 + $0x88] sm:$0xff] }
  0x4b   : > { %2192 = vperm.xlu0 %6230, %v6835_v24   ;;  %2157 = vperm.xlu1 %6231, %v6920_v16   ;;  %v5424_v23 = vor.u32 %v5993_v17, %v5423_v14  ;;  %v5599_v14 = vld [vmem:[%s6816_s24 + $0x1e0] sm:$0xf]  ;;  %v6037_v17 = vld [vmem:[%s6816_s24 + $0x1ec] sm:$0xf0] }
  0x4c   : > { %v5600_v22 = vor.u32 %v6037_v17, %v5599_v14  ;;  %v7085_v17 = vld [vmem:[%s6768_s22 + $0xd8] sm:$0xff] }
  0x4d   : > { %1397 = vmatpush.bf16.msra.mxu0 %v6039_v18  ;;  %6128 = vmatpush.bf16.msra.mxu2 %v6039_v18  ;;  %v5551_v18 = vld [vmem:[%s6816_s24 + $0x180] sm:$0xf] }
  0x4e   : > { %6136 = vmatpush.bf16.msra.mxu3 %v6047_v19  ;;  %1486 = vmatpush.bf16.msra.mxu1 %v6047_v19  ;;  %v6025_v19 = vld [vmem:[%s6816_s24 + $0x18c] sm:$0xf0] }
  0x4f   : > { %v5552_v25 = vor.u32 %v6025_v19, %v5551_v18  ;;  %v6035_v18 = vld [vmem:[%s6816_s24 + $0x1e4] sm:$0xf]  ;;  %v5601_v19 = vld [vmem:[%s6816_s24 + $0x1f0] sm:$0xf0] }
  0x50   : > { %1398 = vmatmul.bf16.vlgmr.msra.gmra.mxu0 %v5360_v29  ;;  %1438 = vmatmul.bf16.vlgmr.msra.gmra.mxu2 %v5488_v30  ;;  %v6940_v29 = vld [vmem:[%s6768_s22 + $0x18] sm:$0xff]  ;;  %v6064_v30 = vld [vmem:[%s8859_s18 + $0xc8] sm:$0xff] }
  0x51   : > { %1568 = vmatpush.bf16.msrb.mxu2 %v6062_v27  ;;  %1527 = vmatmul.bf16.vlgmr.msra.gmra.mxu3 %v5492_v31  ;;  %v6934_v27 = vld [vmem:[%s6768_s22 + $0xd0] sm:$0xff]  ;;  %v6948_v31 = vld [vmem:[%s6768_s22 + $0x58] sm:$0xff]  ;;  %v2356_v14 = vmul.f32 %v6940_v29, %v6940_v29 }
  0x52   : > { %1657 = vmatpush.bf16.msrb.mxu3 %v6070_v28  ;;  %v6056_v28 = vld [vmem:[%s8859_s18 + $0x88] sm:$0xff]  ;;  %1487 = vmatmul.bf16.vlgmr.msra.gmra.mxu1 %v5364_v53 }
  0x53   : > { %2207 = vperm.xlu0 %6230, %v6853_v34   ;;  %2162 = vperm.xlu1 %6231, %v6940_v29   ;;  %v5383_v53 = vld [vmem:[%s6816_s24 + $0x28] sm:$0xf] }
  0x55   : > { %1569 = vmatpush.bf16.msrb.mxu2 %v6061_v32  ;;  %v6951_v32 = vld [vmem:[%s6768_s22 + $0x38] sm:$0xff] }
  0x56   : > { %1658 = vmatpush.bf16.msrb.mxu3 %v6069_v33  ;;  %v5439_v33 = vld [vmem:[%s6816_s24 + $0xa0] sm:$0xf]  ;;  %v2360_v50 = vmul.f32 %v6951_v32, %v6951_v32 }
  0x59   : > { %1570 = vmatpush.bf16.msrb.mxu2 %v6060_v35  ;;  %v2364_v35 = vmul.f32 %v6948_v31, %v6948_v31 }
  0x5a   : > { %1659 = vmatpush.bf16.msrb.mxu3 %v6068_v36  ;;  %v5997_v36 = vld [vmem:[%s6816_s24 + $0xac] sm:$0xf0] }
  0x5b   : > { %2222 = vperm.xlu0 %6230, %v6867_v41   ;;  %2182 = vperm.xlu1 %6231, %v6951_v32   ;;  %v5440_v42 = vor.u32 %v5997_v36, %v5439_v33  ;;  %v7021_v33 = vld [vmem:[%s6768_s22 + $0xa8] sm:$0xff]  ;;  %v5978_v36 = vld [vmem:[%s6816_s24 + $0x14] sm:$0xf0] }
  0x5d   : > { %1571 = vmatpush.bf16.msrb.mxu2 %v6059_v48  ;;  %v6063_v48 = vld [vmem:[%s8859_s18 + $0xc0] sm:$0xff] }
  0x5e   : > { %1660 = vmatpush.bf16.msrb.mxu3 %v6067_v49 }
  0x60   : > { %1403 = vmatmul.bf16.gmra.mxu0 %v5376_v44  ;;  %1443 = vmatmul.bf16.gmra.mxu2 %v5504_v45  ;;  %v5572_v44 = vor.u32 %v6027_v39, %v5569_v40  ;;  %v2365_v45 = vmul.f32 %v6853_v34, %v6853_v34  ;;  %v1848_v34 = vld [vmem:[%s8809_s4 + $0x8] sm:$0x1]  ;;  %v6072_v40 = vld [vmem:[%s7030_s28] sm:$0xff] }
  0x61   : > { %1532 = vmatmul.bf16.gmra.mxu3 %v5508_v46  ;;  %1572 = vmatpush.bf16.msrb.mxu2 %v6058_v61  ;;  %v6055_v46 = vld [vmem:[%s8859_s18 + $0x80] sm:$0xff]  ;;  %v1966_v49 = vunpack.c.l.b16 %v1848_v34 }
  0x62   : > { %1661 = vmatpush.bf16.msrb.mxu3 %v6066_v62  ;;  %v5583_v61 = vld [vmem:[%s6816_s24 + $0x1c0] sm:$0xf]  ;;  %v6033_v62 = vld [vmem:[%s6816_s24 + $0x1cc] sm:$0xf0] }
  0x63   : > { %2387 = vperm.xlu0 %6230, %v2353_v47   ;;  %v6968_v47 = vld [vmem:[%s6768_s22 + $0x50] sm:$0xff]  ;;  %v1968_v55 = vpack.c.b16 %v1966_v49, %v1966_v49  ;;  %v5584_v4 = vor.u32 %v6033_v62, %v5583_v61 }
  0x64   : > { %2197 = vperm.xlu1 %6231, %v6968_v47  }
  0x65   : > { %1573 = vmatpush.bf16.msrb.mxu2 %v6057_v13  ;;  %v5471_v13 = vld [vmem:[%s6816_s24 + $0xe0] sm:$0xf] }
  0x66   : > { %1662 = vmatpush.bf16.msrb.mxu3 %v6065_v15  ;;  %v6005_v15 = vld [vmem:[%s6816_s24 + $0xec] sm:$0xf0] }
  0x67   : > { %v5472_v21 = vor.u32 %v6005_v15, %v5471_v13 }
  0x69   : > { %1574 = vmatpush.bf16.msrb.mxu2 %v6056_v28  ;;  %v5377_v28 = vld [vmem:[%s6816_s24 + $0x30] sm:$0xf0] }
  0x6a   : > { %1663 = vmatpush.bf16.msrb.mxu3 %v6064_v30 }
  0x6b   : > { %2242 = vperm.xlu0 %6230, %v6885_v54  }
  0x6c   : > { %2212 = vperm.xlu1 %6231, %v6981_v56  }
  0x6d   : > { %1575 = vmatpush.bf16.msrb.mxu2 %v6055_v46 }
  0x6e   : > { %1664 = vmatpush.bf16.msrb.mxu3 %v6063_v48 }
  0x70   : > { %1408 = vmatmul.bf16.gmra.mxu0 %v5392_v57  ;;  %1448 = vmatmul.bf16.gmra.mxu2 %v5520_v58  ;;  %v2022_v57 = vand.u32 %v2020_v52, %v1968_v55  ;;  %v5455_v58 = vld [vmem:[%s6816_s24 + $0xc0] sm:$0xf]  ;;  %v2384_v52 = vmul.f32 %v6988_v1, %v6988_v1  ;;  %v5982_v55 = vld [vmem:[%s6816_s24 + $0x34] sm:$0xf0] }
  0x71   : > { %1537 = vmatmul.bf16.gmra.mxu3 %v5524_v59  ;;  %v6001_v59 = vld [vmem:[%s6816_s24 + $0xcc] sm:$0xf0]  ;;  %v5384_v32 = vor.u32 %v5982_v55, %v5383_v53  ;;  %v7124_v55 = vld [vmem:[%s6768_s22 + $0xc0] sm:$0xff] }
  0x72   : > { %2030 = vmatpush.bf16.msrb.mxu0 %v2022_v57  ;;  %2631 = vmatpush.bf16.msrb.mxu1 %v2022_v57  ;;  %v5456_v0 = vor.u32 %v6001_v59, %v5455_v58  ;;  %v5980_v58 = vld [vmem:[%s6816_s24 + $0x2c] sm:$0xf]  ;;  %v5385_v59 = vld [vmem:[%s6816_s24 + $0x38] sm:$0xf0] }
  0x73   : > { %2247 = vperm.xlu0 %6230, %v6891_v60  }
  0x74   : > { %2227 = vperm.xlu1 %6231, %v1830_v7  }
  0x76   : > { %2031 = vmatpush.bf16.msrb.mxu0 %v6071_v5  ;;  %2632 = vmatpush.bf16.msrb.mxu1 %v6071_v5  ;;  %v7073_v5 = vld [vmem:[%s6768_s22 + $0x90] sm:$0xff] }
  0x7b   : > { %2412 = vperm.xlu0 %6230, %v2358_v2   ;;  %v6031_v2 = vld [vmem:[%s6816_s24 + $0x1c4] sm:$0xf] }
  0x7c   : > { %v5588_v6 = vor.u32 %v6031_v2, %v5585_v3  ;;  %v6073_v2 = vld [vmem:[%s7030_s28 + $0x8] sm:$0xff] }
  0x80   : > { %1413 = vmatmul.bf16.gmra.mxu0 %v5408_v8  ;;  %1453 = vmatmul.bf16.gmra.mxu2 %v5536_v9  ;;  %v2369_v8 = vmul.f32 %v1830_v7, %v1830_v7  ;;  %v6999_v9 = vld [vmem:[%s6768_s22 + $0x20] sm:$0xff]  ;;  %v5409_v7 = vld [vmem:[%s6816_s24 + $0x70] sm:$0xf0] }
  0x81   : > { %1542 = vmatmul.bf16.gmra.mxu3 %v5540_v11  ;;  %2167 = vperm.xlu2 %6232, %v6999_v9   ;;  %v2354_v11 = vmul.f32 %v6793_v10, %v6793_v10  ;;  %v5604_v10 = vor.u32 %v6035_v18, %v5601_v19  ;;  %v5399_v18 = vld [vmem:[%s6816_s24 + $0x48] sm:$0xf]  ;;  %v5986_v19 = vld [vmem:[%s6816_s24 + $0x54] sm:$0xf0]  ;;  %v2357_v29 = vmul.f32 %v6999_v9, %v6999_v9 }
  0x83   : > { %2417 = vperm.xlu0 %6230, %v2359_v12   ;;  %v2372_v12 = vmul.f32 %v6885_v54, %v6885_v54  ;;  %2392 = vperm.xlu1 %6231, %v2354_v11   ;;  %v2355_v54 = vmul.f32 %v6920_v16, %v6920_v16  ;;  %v2378_v16 = vmul.f32 %v6928_v20, %v6928_v20 }
  0x89   : > { %2172 = vperm.xlu2 %6232, %v6901_v63   ;;  %v5979_v63 = vld [vmem:[%s6816_s24 + $0x24] sm:$0xf] }
  0x8a   : > { %v5380_v30 = vor.u32 %v5979_v63, %v5377_v28 }
  0x8b   : > { %2272 = vperm.xlu0 %6230, %v6928_v20   ;;  %2397 = vperm.xlu1 %6231, %v2355_v54   ;;  %v5372_v20 = vor.u32 %v5976_v37, %v5369_v38  ;;  %v5400_v54 = vor.u32 %v5986_v19, %v5399_v18  ;;  %v2366_v38 = vmul.f32 %v6981_v56, %v6981_v56  ;;  %v6094_v56 = vld [vmem:[%s8810_s5 + $0x30] sm:$0xff]  ;;  %v6076_v19 = vld [vmem:[%s7030_s28 + $0x20] sm:$0xff] }
  0x8c   : > { %1492 = vmatmul.bf16.gmra.mxu1 %v5380_v30  ;;  %v5991_v30 = vld [vmem:[%s6816_s24 + $0x84] sm:$0xf] }
  0x90   : > { %1418 = vmatmul.bf16.gmra.mxu0 %v5424_v23  ;;  %1458 = vmatmul.bf16.gmra.mxu2 %v5552_v25  ;;  %v1836_v23 = vld [vmem:[%s6768_s22 + $0xb0] sm:$0xff] }
  0x91   : > { %1547 = vmatmul.bf16.gmra.mxu3 %v5556_v26  ;;  %v2375_v25 = vmul.f32 %v1836_v23, %v1836_v23  ;;  %v1822_v26 = vld [vmem:[%s6768_s22 + $0x40] sm:$0xff] }
  0x92   : > { %2187 = vperm.xlu2 %6232, %v1822_v26  }
  0x93   : > { %2277 = vperm.xlu0 %6230, %v6934_v27   ;;  %2252 = vperm.xlu1 %6231, %v7021_v33  }
  0x9a   : > { %2202 = vperm.xlu2 %6232, %v6948_v31   ;;  %v5983_v31 = vld [vmem:[%s6816_s24 + $0x44] sm:$0xf] }
  0x9b   : > { %2442 = vperm.xlu0 %6230, %v2364_v35   ;;  %v5367_v35 = vld [vmem:[%s6816_s24 + $0x8] sm:$0xf]  ;;  %2257 = vperm.xlu1 %6231, %v1836_v23  }
  0x9c   : > { %v5368_v39 = vor.u32 %v5978_v36, %v5367_v35 }
  0xa0   : > { %1423 = vmatmul.bf16.gmra.mxu0 %v5440_v42  ;;  %1463 = vmatmul.bf16.gmra.mxu2 %v5568_v43  ;;  %v7038_v42 = vld [vmem:[%s6768_s22 + $0xe0] sm:$0xff] }
  0xa1   : > { %1552 = vmatmul.bf16.gmra.mxu3 %v5572_v44  ;;  %v2381_v43 = vmul.f32 %v7038_v42, %v7038_v42  ;;  %v7044_v44 = vld [vmem:[%s6768_s22 + $0x70] sm:$0xff] }
  0xa2   : > { %2217 = vperm.xlu2 %6232, %v7044_v44   ;;  %v2367_v53 = vmul.f32 %v7044_v44, %v7044_v44 }
  0xa3   : > { %2447 = vperm.xlu0 %6230, %v2365_v45   ;;  %v5393_v45 = vld [vmem:[%s6816_s24 + $0x50] sm:$0xf0]  ;;  %2422 = vperm.xlu1 %6231, %v2360_v50  }
  0xa4   : > { %v5396_v48 = vor.u32 %v5983_v31, %v5393_v45  ;;  %v5988_v31 = vld [vmem:[%s6816_s24 + $0x6c] sm:$0xf] }
  0xa6   : > { %1497 = vmatmul.bf16.gmra.mxu1 %v5396_v48 }
  0xaa   : > { %2232 = vperm.xlu2 %6232, %v7054_v51  }
  0xab   : > { %2302 = vperm.xlu0 %6230, %v6988_v1   ;;  %v5388_v1 = vor.u32 %v5980_v58, %v5385_v59  ;;  %v5995_v59 = vld [vmem:[%s6816_s24 + $0xa4] sm:$0xf] }
  0xb0   : > { %1428 = vmatmul.bf16.gmra.mxu0 %v5456_v0  ;;  %1468 = vmatmul.bf16.gmra.mxu2 %v5584_v4  ;;  %v6095_v0 = vld [vmem:[%s8810_s5 + $0x38] sm:$0xff]  ;;  %v2361_v4 = vmul.f32 %v1822_v26, %v1822_v26 }
  0xb1   : > { %1557 = vmatmul.bf16.gmra.mxu3 %v5588_v6  ;;  %2890 = vmatpush.bf16.msra.mxu2 %v6095_v0  ;;  %v5987_v6 = vld [vmem:[%s6816_s24 + $0x64] sm:$0xf]  ;;  %v2370_v0 = vmul.f32 %v7054_v51, %v7054_v51  ;;  %v2373_v51 = vmul.f32 %v6891_v60, %v6891_v60 }
  0xb2   : > { %2237 = vperm.xlu2 %6232, %v7073_v5   ;;  %2427 = vperm.xlu1 %6231, %v2361_v4   ;;  %v5412_v11 = vor.u32 %v5987_v6, %v5409_v7  ;;  %v5431_v4 = vld [vmem:[%s6816_s24 + $0x88] sm:$0xf]  ;;  %v5994_v6 = vld [vmem:[%s6816_s24 + $0x94] sm:$0xf0]  ;;  %v5992_v7 = vld [vmem:[%s6816_s24 + $0x8c] sm:$0xf] }
  0xb3   : > { %2467 = vperm.xlu0 %6230, %v2369_v8   ;;  %v5432_v18 = vor.u32 %v5994_v6, %v5431_v4  ;;  %v6000_v4 = vld [vmem:[%s6816_s24 + $0xcc] sm:$0xf]  ;;  %v5465_v6 = vld [vmem:[%s6816_s24 + $0xd8] sm:$0xf0] }
  0xb5   : > { %2891 = vmatpush.bf16.msra.mxu2 %v6094_v56  ;;  %v5473_v56 = vld [vmem:[%s6816_s24 + $0xf0] sm:$0xf0] }
  0xb6   : > { %1502 = vmatmul.bf16.gmra.mxu1 %v5412_v11 }
  0xba   : > { %2402 = vperm.xlu2 %6232, %v2356_v14   ;;  %2282 = vperm.xlu1 %6231, %v7085_v17  }
  0xbb   : > { %2482 = vperm.xlu0 %6230, %v2372_v12  }
  0xc0   : > { %1433 = vmatmul.bf16.gmra.mxu0 %v5472_v21  ;;  %1473 = vmatmul.bf16.gmra.mxu2 %v5600_v22  ;;  %v5984_v21 = vld [vmem:[%s6816_s24 + $0x4c] sm:$0xf]  ;;  %v5401_v22 = vld [vmem:[%s6816_s24 + $0x58] sm:$0xf0] }
  0xc1   : > { %1562 = vmatmul.bf16.gmra.mxu3 %v5604_v10  ;;  %v5404_v63 = vor.u32 %v5984_v21, %v5401_v22  ;;  %v2363_v22 = vmul.f32 %v6968_v47, %v6968_v47 }
  0xc2   : > { %2407 = vperm.xlu2 %6232, %v2357_v29   ;;  %2287 = vperm.xlu1 %6231, %v7038_v42   ;;  %v5417_v42 = vld [vmem:[%s6816_s24 + $0x78] sm:$0xf0] }
  0xc3   : > { %2497 = vperm.xlu0 %6230, %v2375_v25   ;;  %v6074_v25 = vld [vmem:[%s7030_s28 + $0x10] sm:$0xff] }
  0xca   : > { %2452 = vperm.xlu1 %6231, %v2366_v38  }
  0xcb   : > { %2512 = vperm.xlu0 %6230, %v2378_v16   ;;  %v5425_v16 = vld [vmem:[%s6816_s24 + $0x90] sm:$0xf0] }
  0xcc   : > { %v5428_v36 = vor.u32 %v5991_v30, %v5425_v16  ;;  %v1843_v30 = vld [vmem:[%s6768_s22 + $0xe8] sm:$0xff] }
  0xcd   : > { %v7060_v57 = vpop.f32.mrf.mxu0  ;;  %v5447_v16 = vld [vmem:[%s6816_s24 + $0xa8] sm:$0xf] }
  0xce   : > { %1507 = vmatmul.bf16.gmra.mxu1 %v5428_v36  ;;  %v5996_v36 = vld [vmem:[%s6816_s24 + $0xac] sm:$0xf] }
  0xd0   : > { %1576 = vmatmul.bf16.vlgmr.msrb.gmra.mxu2 %v5368_v39  ;;  %5809 = vmatmul.msk.bf16.vlgmr.msrb.gmra.mxu0 %vm680_vm1, %v6072_v40  ;;  %v1837_v39 = vld [vmem:[%s6768_s22 + $0xb8] sm:$0xff] }
  0xd1   : > { %1665 = vmatmul.bf16.vlgmr.msrb.gmra.mxu3 %v5372_v20  ;;  %v5415_v20 = vld [vmem:[%s6816_s24 + $0x68] sm:$0xf]  ;;  %2262 = vperm.xlu2 %6232, %v1837_v39   ;;  %v2376_v29 = vmul.f32 %v1837_v39, %v1837_v39 }
  0xd2   : > { %2457 = vperm.xlu1 %6231, %v2367_v53   ;;  %v6093_v39 = vld [vmem:[%s8810_s5 + $0x28] sm:$0xff] }
  0xd3   : > { %v1439_v46 = vpop.f32.mrf.mxu2  ;;  %2527 = vperm.xlu0 %6230, %v2381_v43   ;;  %v5990_v43 = vld [vmem:[%s6816_s24 + $0x74] sm:$0xf0]  ;;  %2892 = vmatpush.bf16.msra.mxu2 %v6093_v39 }
  0xd4   : > { %v1528_v34 = vpop.f32.mrf.mxu3  ;;  %v5416_v48 = vor.u32 %v5990_v43, %v5415_v20 }
  0xd5   : > { %v7049_v49 = vadd.f32 %v1528_v34, %v1439_v46  ;;  %v7078_v12 = vpop.f32.mrf.mxu0  ;;  %v6075_v34 = vld [vmem:[%s7030_s28 + $0x18] sm:$0xff] }
  0xd9   : > { %2267 = vperm.xlu2 %6232, %v7124_v55  }
  0xda   : > { %2472 = vperm.xlu1 %6231, %v2370_v0  }
  0xdb   : > { %v1441_v61 = vpop.f32.mrf.mxu2  ;;  %2542 = vperm.xlu0 %6230, %v2384_v52   ;;  %v5420_v52 = vor.u32 %v5988_v31, %v5417_v42  ;;  %v6077_v31 = vld [vmem:[%s7030_s28 + $0x28] sm:$0xff] }
  0xdc   : > { %v1530_v62 = vpop.f32.mrf.mxu3 }
  0xdd   : > { %v7066_v3 = vadd.f32 %v1530_v62, %v1441_v61  ;;  %v7097_v28 = vpop.f32.mrf.mxu0  ;;  %v5441_v61 = vld [vmem:[%s6816_s24 + $0xb0] sm:$0xf0] }
  0xde   : > { %v5444_v44 = vor.u32 %v5995_v59, %v5441_v61 }
  0xe0   : > { %1581 = vmatmul.bf16.gmra.mxu2 %v5384_v32  ;;  %5810 = vmatmul.msk.bf16.gmra.mxu0 %vm680_vm1, %v6073_v2 }
  0xe1   : > { %1670 = vmatmul.bf16.gmra.mxu3 %v5388_v1  ;;  %1512 = vmatmul.bf16.gmra.mxu1 %v5444_v44  ;;  %v2362_v1 = vmul.f32 %v6835_v24, %v6835_v24  ;;  %v2382_v44 = vmul.f32 %v1843_v30, %v1843_v30 }
  0xe2   : > { %2487 = vperm.xlu1 %6231, %v2373_v51   ;;  %v6562_v51 = vmov 0.0  }
  0xe3   : > { %v1444_v8 = vpop.f32.mrf.mxu2  ;;  %2432 = vperm.xlu2 %6232, %v2362_v1   ;;  %v6002_v1 = vld [vmem:[%s6816_s24 + $0xd4] sm:$0xf0]  ;;  %681 = vst.msk [vmem:[#allocation2] sm:$0xff] %vm680_vm1, %v6562_v51 }
  0xe4   : > { %v1533_v13 = vpop.f32.mrf.mxu3  ;;  %682 = vst.msk [vmem:[#allocation2 + $0x8] sm:$0xff] %vm680_vm1, %v6562_v51 }
  0xe5   : > { %v7080_v15 = vadd.f32 %v1533_v13, %v1444_v8  ;;  %v7108_v40 = vpop.f32.mrf.mxu0  ;;  %v5433_v8 = vld [vmem:[%s6816_s24 + $0x98] sm:$0xf0]  ;;  %683 = vst.msk [vmem:[#allocation2 + $0x10] sm:$0xff] %vm680_vm1, %v6562_v51 }
  0xe6   : > { %v5436_v24 = vor.u32 %v5992_v7, %v5433_v8  ;;  %684 = vst.msk [vmem:[#allocation2 + $0x18] sm:$0xff] %vm680_vm1, %v6562_v51 }
  0xe7   : > { %685 = vst.msk [vmem:[#allocation2 + $0x20] sm:$0xff] %vm680_vm1, %v6562_v51 }
  0xe8   : > { %686 = vst.msk [vmem:[#allocation2 + $0x28] sm:$0xff] %vm680_vm1, %v6562_v51 }
  0xe9   : > { %687 = vst.msk [vmem:[#allocation2 + $0x30] sm:$0xff] %vm680_vm1, %v6562_v51 }
  0xea   : > { %2502 = vperm.xlu1 %6231, %v2376_v29   ;;  %688 = vst.msk [vmem:[#allocation2 + $0x38] sm:$0xff] %vm680_vm1, %v6562_v51  ;;  %v6004_v29 = vld [vmem:[%s6816_s24 + $0xec] sm:$0xf] }
  0xeb   : > { %v1446_v10 = vpop.f32.mrf.mxu2  ;;  %2437 = vperm.xlu2 %6232, %v2363_v22   ;;  %689 = vst.msk [vmem:[#allocation2 + $0x40] sm:$0xff] %vm680_vm1, %v6562_v51 }
  0xec   : > { %v1535_v23 = vpop.f32.mrf.mxu3  ;;  %690 = vst.msk [vmem:[#allocation2 + $0x48] sm:$0xff] %vm680_vm1, %v6562_v51 }
  0xed   : > { %v7093_v26 = vadd.f32 %v1535_v23, %v1446_v10  ;;  %v7126_v58 = vpop.f32.mrf.mxu0  ;;  %v5999_v10 = vld [vmem:[%s6816_s24 + $0xc4] sm:$0xf]  ;;  %v5457_v23 = vld [vmem:[%s6816_s24 + $0xd0] sm:$0xf0]  ;;  %691 = vst.msk [vmem:[#allocation2 + $0x50] sm:$0xff] %vm680_vm1, %v6562_v51 }
  0xee   : > { %692 = vst.msk [vmem:[#allocation2 + $0x58] sm:$0xff] %vm680_vm1, %v6562_v51 }
  0xef   : > { %693 = vst.msk [vmem:[#allocation2 + $0x60] sm:$0xff] %vm680_vm1, %v6562_v51 }
  0xf0   : > { %1586 = vmatmul.bf16.gmra.mxu2 %v5400_v54  ;;  %5811 = vmatmul.msk.bf16.gmra.mxu0 %vm680_vm1, %v6074_v25  ;;  %v5460_v25 = vor.u32 %v5999_v10, %v5457_v23  ;;  %694 = vst.msk [vmem:[#allocation2 + $0x68] sm:$0xff] %vm680_vm1, %v6562_v51 }
  0xf1   : > { %1675 = vmatmul.bf16.gmra.mxu3 %v5404_v63  ;;  %695 = vst.msk [vmem:[#allocation2 + $0x70] sm:$0xff] %vm680_vm1, %v6562_v51 }
  0xf2   : > { %1517 = vmatmul.bf16.gmra.mxu1 %v5460_v25  ;;  %v5479_v25 = vld [vmem:[%s6816_s24 + $0xe8] sm:$0xf]  ;;  %696 = vst.msk [vmem:[#allocation2 + $0x78] sm:$0xff] %vm680_vm1, %v6562_v51 }
  0xf3   : > { %v1449_v35 = vpop.f32.mrf.mxu2  ;;  %2292 = vperm.xlu2 %6232, %v1843_v30   ;;  %v5481_v30 = vld [vmem:[%s6816_s24 + $0xf8] sm:$0xf0]  ;;  %697 = vst.msk [vmem:[#allocation2 + $0x80] sm:$0xff] %vm680_vm1, %v6562_v51 }
  0xf4   : > { %v1538_v37 = vpop.f32.mrf.mxu3  ;;  %698 = vst.msk [vmem:[#allocation2 + $0x88] sm:$0xff] %vm680_vm1, %v6562_v51 }
  0xf5   : > { %v7103_v9 = vadd.f32 %v1538_v37, %v1449_v35  ;;  %v7141_v13 = vpop.f32.mrf.mxu0  ;;  %v5998_v35 = vld [vmem:[%s6816_s24 + $0xb4] sm:$0xf0]  ;;  %v5449_v37 = vld [vmem:[%s6816_s24 + $0xb8] sm:$0xf0]  ;;  %699 = vst.msk [vmem:[#allocation2 + $0x90] sm:$0xff] %vm680_vm1, %v6562_v51 }
  0xf6   : > { %v5448_v43 = vor.u32 %v5998_v35, %v5447_v16  ;;  %700 = vst.msk [vmem:[#allocation2 + $0x98] sm:$0xff] %vm680_vm1, %v6562_v51 }
  0xf7   : > { %701 = vst.msk [vmem:[#allocation2 + $0xa0] sm:$0xff] %vm680_vm1, %v6562_v51 }
  0xf8   : > { %702 = vst.msk [vmem:[#allocation2 + $0xa8] sm:$0xff] %vm680_vm1, %v6562_v51 }
  0xf9   : > { %703 = vst.msk [vmem:[#allocation2 + $0xb0] sm:$0xff] %vm680_vm1, %v6562_v51 }
  0xfa   : > { %704 = vst.msk [vmem:[#allocation2 + $0xb8] sm:$0xff] %vm680_vm1, %v6562_v51 }
  0xfb   : > { %v1451_v45 = vpop.f32.mrf.mxu2  ;;  %705 = vst.msk [vmem:[#allocation2 + $0xc0] sm:$0xff] %vm680_vm1, %v6562_v51 }
  0xfc   : > { %v1540_v46 = vpop.f32.mrf.mxu3  ;;  %706 = vst.msk [vmem:[#allocation2 + $0xc8] sm:$0xff] %vm680_vm1, %v6562_v51 }
  0xfd   : > { %v7115_v50 = vadd.f32 %v1540_v46, %v1451_v45  ;;  %v7155_v47 = vpop.f32.mrf.mxu0  ;;  %v5452_v45 = vor.u32 %v5996_v36, %v5449_v37  ;;  %v2379_v46 = vmul.f32 %v6934_v27, %v6934_v27  ;;  %v6079_v37 = vld [vmem:[%s7030_s28 + $0x38] sm:$0xff]  ;;  %707 = vst.msk [vmem:[#allocation2 + $0xd0] sm:$0xff] %vm680_vm1, %v6562_v51 }
  0xfe   : > { %708 = vst.msk [vmem:[#allocation2 + $0xd8] sm:$0xff] %vm680_vm1, %v6562_v51 }
  0xff   : > { %2517 = vperm.xlu1 %6231, %v2379_v46   ;;  %709 = vst.msk [vmem:[#allocation2 + $0xe0] sm:$0xff] %vm680_vm1, %v6562_v51 }
 0x100   : > { %1591 = vmatmul.bf16.gmra.mxu2 %v5416_v48  ;;  %5812 = vmatmul.msk.bf16.gmra.mxu0 %vm680_vm1, %v6075_v34  ;;  %v7174_v34 = vld [vmem:[%s6768_s22 + $0xf0] sm:$0xff]  ;;  %710 = vst.msk [vmem:[#allocation2 + $0xe8] sm:$0xff] %vm680_vm1, %v6562_v51  ;;  %s8861_s22 = sld [smem:[#allocation14_spill]] }
 0x101   : > { %1680 = vmatmul.bf16.gmra.mxu3 %v5420_v52  ;;  %2297 = vperm.xlu2 %6232, %v7174_v34   ;;  %v6003_v52 = vld [vmem:[%s6816_s24 + $0xe4] sm:$0xf]  ;;  %711 = vst.msk [vmem:[#allocation2 + $0xf0] sm:$0xff] %vm680_vm1, %v6562_v51 }
 0x102   : > { %v5476_v27 = vor.u32 %v6003_v52, %v5473_v56  ;;  %v2380_v56 = vmul.f32 %v7085_v17, %v7085_v17  ;;  %712 = vst.msk [vmem:[#allocation2 + $0xf8] sm:$0xff] %vm680_vm1, %v6562_v51  ;;  %v6012_v51 = vld [vmem:[%s6816_s24 + $0x12c] sm:$0xf] }
 0x103   : > { %v1454_v62 = vpop.f32.mrf.mxu2 }
 0x104   : > { %v1543_v32 = vpop.f32.mrf.mxu3  ;;  %1522 = vmatmul.bf16.gmra.mxu1 %v5476_v27  ;;  %v5495_v27 = vld [vmem:[%s6816_s24 + $0x108] sm:$0xf] }
 0x105   : > { %v7131_v2 = vadd.f32 %v1543_v32, %v1454_v62  ;;  %v7170_v48 = vpop.f32.mrf.mxu0  ;;  %v2368_v62 = vmul.f32 %v6867_v41, %v6867_v41  ;;  %v5463_v32 = vld [vmem:[%s6816_s24 + $0xc8] sm:$0xf]  ;;  %v7195_v41 = vpop.f32.mrf.mxu1 }
 0x106   : > { %s647_s1 = sand.u32 1, %s8861_s22  }
 0x107   : > { %2532 = vperm.xlu1 %6231, %v2382_v44   ;;  %v5497_v44 = vld [vmem:[%s6816_s24 + $0x118] sm:$0xf0]  ;;  %s5349_s21 = sshll.u32 %s647_s1, 8  ;;  %s5190_s16 = scalar_lea.sflag [#allocation5], %s647_s1 }
 0x108   : > { %s8464_s30 = scalar_lea.vmem [#allocation9], %s5349_s21 }
 0x109   : > { %2462 = vperm.xlu2 %6232, %v2368_v62   ;;  %v6008_v62 = vld [vmem:[%s6816_s24 + $0x10c] sm:$0xf]  ;;  %s5202_s20 = sshll.u32 %s8464_s30, 4  ;;  %s5203_s20 = int_to_ptr.vmem [resolvable:$true] %s5202_s20 }
 0x10b   : > { %v1456_v11 = vpop.f32.mrf.mxu2 }
 0x10c   : > { %v1545_v14 = vpop.f32.mrf.mxu3 }
 0x10d   : > { %v7144_v21 = vadd.f32 %v1545_v14, %v1456_v11  ;;  %v7185_v0 = vpop.f32.mrf.mxu0  ;;  %v5464_v11 = vor.u32 %v6002_v1, %v5463_v32  ;;  %v6078_v14 = vld [vmem:[%s7030_s28 + $0x30] sm:$0xff]  ;;  %v7227_v16 = vpop.f32.mrf.mxu1 }
 0x110   : > { %1596 = vmatmul.bf16.gmra.mxu2 %v5432_v18  ;;  %5813 = vmatmul.msk.bf16.gmra.mxu0 %vm680_vm1, %v6076_v19  ;;  %v5468_v19 = vor.u32 %v6000_v4, %v5465_v6  ;;  %v6080_v4 = vld [vmem:[%s7030_s28 + $0x40] sm:$0xff] }
 0x111   : > { %1685 = vmatmul.bf16.gmra.mxu3 %v5436_v24  ;;  %v2371_v24 = vmul.f32 %v7073_v5, %v7073_v5 }
 0x113   : > { %v1459_v54 = vpop.f32.mrf.mxu2  ;;  %2477 = vperm.xlu2 %6232, %v2371_v24  }
 0x114   : > { %v1548_v60 = vpop.f32.mrf.mxu3 }
 0x115   : > { %v7153_v63 = vadd.f32 %v1548_v60, %v1459_v54  ;;  %v7203_v5 = vpop.f32.mrf.mxu0  ;;  %v2374_v54 = vmul.f32 %v7021_v33, %v7021_v33  ;;  %v6006_v60 = vld [vmem:[%s6816_s24 + $0xf4] sm:$0xf0]  ;;  %v7258_v39 = vpop.f32.mrf.mxu1 }
 0x116   : > { %v5480_v36 = vor.u32 %v6006_v60, %v5479_v25  ;;  %v6014_v60 = vld [vmem:[%s6816_s24 + $0x134] sm:$0xf0] }
 0x11b   : > { %v1461_v38 = vpop.f32.mrf.mxu2  ;;  %2492 = vperm.xlu2 %6232, %v2374_v54  }
 0x11c   : > { %v1550_v20 = vpop.f32.mrf.mxu3 }
 0x11d   : > { %v7163_v42 = vadd.f32 %v1550_v20, %v1461_v38  ;;  %v5484_v20 = vor.u32 %v6004_v29, %v5481_v30  ;;  %v1491_v29 = vadd.f32 %v7227_v16, %v7078_v12  ;;  %v5513_v30 = vld [vmem:[%s6816_s24 + $0x138] sm:$0xf0]  ;;  %v2148_v12 = vpop.permute.xlu0 %2147 }
 0x120   : > { %1601 = vmatmul.bf16.gmra.mxu2 %v5448_v43  ;;  %5814 = vmatmul.msk.bf16.gmra.mxu0 %vm680_vm1, %v6077_v31  ;;  %v7238_v43 = vpop.f32.mrf.mxu0  ;;  %v2377_v31 = vmul.f32 %v7124_v55, %v7124_v55  ;;  %v6092_v55 = vld [vmem:[%s8810_s5 + $0x20] sm:$0xff] }
 0x121   : > { %1690 = vmatmul.bf16.gmra.mxu3 %v5452_v45  ;;  %2893 = vmatpush.bf16.msra.mxu2 %v6092_v55  ;;  %v6091_v55 = vld [vmem:[%s8810_s5 + $0x18] sm:$0xff] }
 0x123   : > { %v1464_v53 = vpop.f32.mrf.mxu2  ;;  %2507 = vperm.xlu2 %6232, %v2377_v31   ;;  %v6081_v31 = vld [vmem:[%s7030_s28 + $0x48] sm:$0xff] }
 0x124   : > { %v1553_v59 = vpop.f32.mrf.mxu3 }
 0x125   : > { %v7179_v61 = vadd.f32 %v1553_v59, %v1464_v53  ;;  %v6010_v59 = vld [vmem:[%s6816_s24 + $0x114] sm:$0xf0]  ;;  %2894 = vmatpush.bf16.msra.mxu2 %v6091_v55 }
 0x126   : > { %v5496_v1 = vor.u32 %v6010_v59, %v5495_v27  ;;  %v1494_v27 = vadd.f32 %v7258_v39, %v7097_v28  ;;  %v2153_v28 = vpop.permute.xlu0 %2152 }
 0x128   : > { %v7272_v53 = vpop.f32.mrf.mxu0 }
 0x12b   : > { %v1466_v7 = vpop.f32.mrf.mxu2  ;;  %2522 = vperm.xlu2 %6232, %v2380_v56  }
 0x12c   : > { %v1555_v8 = vpop.f32.mrf.mxu3 }
 0x12d   : > { %v7190_v18 = vadd.f32 %v1555_v8, %v1466_v7  ;;  %v5500_v7 = vor.u32 %v6008_v62, %v5497_v44  ;;  %v1495_v8 = vpop.f32.mrf.mxu1 }
 0x130   : > { %1606 = vmatmul.bf16.gmra.mxu2 %v5464_v11  ;;  %5815 = vmatmul.msk.bf16.gmra.mxu0 %vm680_vm1, %v6078_v14  ;;  %v2383_v11 = vmul.f32 %v7174_v34, %v7174_v34  ;;  %v1489_v14 = vadd.f32 %v7195_v41, %v7060_v57  ;;  %v7304_v34 = vpop.f32.mrf.mxu0  ;;  %v5511_v41 = vld [vmem:[%s6816_s24 + $0x128] sm:$0xf] }
 0x131   : > { %1695 = vmatmul.bf16.gmra.mxu3 %v5468_v19 }
 0x133   : > { %v1469_v22 = vpop.f32.mrf.mxu2  ;;  %2537 = vperm.xlu2 %6232, %v2383_v11  }
 0x134   : > { %v1558_v10 = vpop.f32.mrf.mxu3 }
 0x135   : > { %v7207_v23 = vadd.f32 %v1558_v10, %v1469_v22  ;;  %v714_v10 = vld [vmem:[#allocation2] sm:$0xff]  ;;  %v1498_v25 = vpop.f32.mrf.mxu1 }
 0x13b   : > { %v1471_v33 = vpop.f32.mrf.mxu2 }
 0x13c   : > { %v1560_v35 = vpop.f32.mrf.mxu3 }
 0x13d   : > { %v7234_v38 = vadd.f32 %v1560_v35, %v1471_v33  ;;  %v7313_v35 = vpop.f32.mrf.mxu0  ;;  %v1500_v59 = vpop.f32.mrf.mxu1 }
 0x140   : > { %1611 = vmatmul.bf16.gmra.mxu2 %v5480_v36  ;;  %5816 = vmatmul.msk.bf16.gmra.mxu0 %vm680_vm1, %v6079_v37 }
 0x141   : > { %1700 = vmatmul.bf16.gmra.mxu3 %v5484_v20  ;;  %v5512_v20 = vor.u32 %v6014_v60, %v5511_v41 }
 0x143   : > { %v1474_v45 = vpop.f32.mrf.mxu2 }
 0x144   : > { %v1563_v46 = vpop.f32.mrf.mxu3 }
 0x145   : > { %v7262_v52 = vadd.f32 %v1563_v46, %v1474_v45  ;;  %v715_v45 = vld [vmem:[#allocation2 + $0x8] sm:$0xff]  ;;  %v5516_v46 = vor.u32 %v6012_v51, %v5513_v30  ;;  %v1503_v60 = vpop.f32.mrf.mxu1 }
 0x14b   : > { %v1476_v17 = vpop.f32.mrf.mxu2 }
 0x14c   : > { %v1565_v32 = vpop.f32.mrf.mxu3 }
 0x14d   : > { %v7289_v6 = vadd.f32 %v1565_v32, %v1476_v17  ;;  %v716_v32 = vld [vmem:[#allocation2 + $0x10] sm:$0xff] }
 0x150   : > { %1616 = vmatmul.bf16.gmra.mxu2 %v5496_v1  ;;  %5817 = vmatmul.msk.bf16.gmra.mxu0 %vm680_vm1, %v6080_v4  ;;  %v7323_v1 = vpop.f32.mrf.mxu0 }
 0x151   : > { %1705 = vmatmul.bf16.gmra.mxu3 %v5500_v7 }
 0x153   : > { %v1577_v19 = vpop.f32.mrf.mxu2 }
 0x154   : > { %v1578_v24 = vadd.f32 %v1577_v19, %v1489_v14  ;;  %v1666_v22 = vpop.f32.mrf.mxu3  ;;  %v1496_v14 = vadd.f32 %v1495_v8, %v7108_v40  ;;  %v5527_v19 = vld [vmem:[%s6816_s24 + $0x148] sm:$0xf] }
 0x156   : > { %v1667_v54 = vadd.f32 %v1666_v22, %v1578_v24  ;;  %v6018_v24 = vld [vmem:[%s6816_s24 + $0x154] sm:$0xf0] }
 0x158   : > { %v1746_v57 = vadd.f32 %v1667_v54, %v714_v10  ;;  %v6016_v54 = vld [vmem:[%s6816_s24 + $0x14c] sm:$0xf] }
 0x15a   : > { %1779 = vst.msk [vmem:[#allocation2] sm:$0xff] %vm680_vm1, %v1746_v57  ;;  %v5529_v57 = vld [vmem:[%s6816_s24 + $0x158] sm:$0xf0] }
 0x15b   : > { %v1579_v33 = vpop.f32.mrf.mxu2  ;;  %v5532_v40 = vor.u32 %v6016_v54, %v5529_v57 }
 0x15c   : > { %v1580_v36 = vadd.f32 %v1579_v33, %v1491_v29  ;;  %v1668_v37 = vpop.f32.mrf.mxu3  ;;  %v5528_v33 = vor.u32 %v6018_v24, %v5527_v19  ;;  %v6020_v19 = vld [vmem:[%s6816_s24 + $0x16c] sm:$0xf]  ;;  %v5545_v24 = vld [vmem:[%s6816_s24 + $0x178] sm:$0xf0] }
 0x15e   : > { %v1669_v56 = vadd.f32 %v1668_v37, %v1580_v36  ;;  %v6082_v36 = vld [vmem:[%s7030_s28 + $0x50] sm:$0xff]  ;;  %v717_v37 = vld [vmem:[#allocation2 + $0x18] sm:$0xff] }
 0x160   : > { %v1747_v16 = vadd.f32 %v1669_v56, %v715_v45  ;;  %1621 = vmatmul.bf16.gmra.mxu2 %v5512_v20  ;;  %5818 = vmatmul.msk.bf16.gmra.mxu0 %vm680_vm1, %v6081_v31  ;;  %v2158_v20 = vpop.permute.xlu1 %2157  ;;  %v7333_v31 = vpop.f32.mrf.mxu0  ;;  %v1499_v45 = vadd.f32 %v1498_v25, %v7126_v58 }
 0x161   : > { %1710 = vmatmul.bf16.gmra.mxu3 %v5516_v46  ;;  %v2113_v7 = vld [vmem:[#allocation2] sm:$0xff]  ;;  %v6103_v46 = vld [vmem:[#allocation3 + $0x38] sm:$0xff] }
 0x162   : > { %1780 = vst.msk [vmem:[#allocation2 + $0x8] sm:$0xff] %vm680_vm1, %v1747_v16  ;;  %v2305_v22 = vmul.f32 %v2148_v12, %v2113_v7  ;;  %3227 = vmatpush.bf16.msra.mxu3 %v6103_v46  ;;  %v720_v46 = vld [vmem:[#allocation2 + $0x30] sm:$0xff] }
 0x163   : > { %v1582_v62 = vpop.f32.mrf.mxu2 }
 0x164   : > { %v1583_v44 = vadd.f32 %v1582_v62, %v1494_v27  ;;  %v1671_v17 = vpop.f32.mrf.mxu3  ;;  %v718_v27 = vld [vmem:[#allocation2 + $0x20] sm:$0xff] }
 0x166   : > { %v1672_v4 = vadd.f32 %v1671_v17, %v1583_v44  ;;  %v1505_v44 = vpop.f32.mrf.mxu1 }
 0x168   : > { %v1748_v11 = vadd.f32 %v1672_v4, %v716_v32  ;;  %v1501_v4 = vadd.f32 %v1500_v59, %v7141_v13  ;;  %v2163_v25 = vpop.permute.xlu1 %2162  ;;  %v6090_v13 = vld [vmem:[%s8810_s5 + $0x10] sm:$0xff]  ;;  %v719_v59 = vld [vmem:[#allocation2 + $0x28] sm:$0xff] }
 0x169   : > { %v2114_v39 = vld [vmem:[#allocation2 + $0x8] sm:$0xff]  ;;  %2895 = vmatpush.bf16.msra.mxu2 %v6090_v13 }
 0x16a   : > { %1781 = vst.msk [vmem:[#allocation2 + $0x10] sm:$0xff] %vm680_vm1, %v1748_v11  ;;  %v2306_v10 = vmul.f32 %v2153_v28, %v2114_v39  ;;  %v5543_v11 = vld [vmem:[%s6816_s24 + $0x168] sm:$0xf]  ;;  %v7341_v28 = vpop.f32.mrf.mxu0 }
 0x16b   : > { %v1584_v41 = vpop.f32.mrf.mxu2 }
 0x16c   : > { %v1585_v29 = vadd.f32 %v1584_v41, %v1496_v14  ;;  %v1673_v51 = vpop.f32.mrf.mxu3  ;;  %v2337_v30 = vpack.c.bf16 %v2306_v10, %v2305_v22  ;;  %v6022_v14 = vld [vmem:[%s6816_s24 + $0x174] sm:$0xf0] }
 0x16d   : > { %v5544_v41 = vor.u32 %v6022_v14, %v5543_v11 }
 0x16e   : > { %v1674_v8 = vadd.f32 %v1673_v51, %v1585_v29  ;;  %5825 = vmatmul.msk.bf16.vlgmr.msrb.gmra.mxu1 %vm680_vm1, %v2337_v30  ;;  %v6083_v29 = vld [vmem:[%s7030_s28 + $0x58] sm:$0xff]  ;;  %v5548_v51 = vor.u32 %v6020_v19, %v5545_v24 }
 0x170   : > { %v1749_v55 = vadd.f32 %v1674_v8, %v717_v37  ;;  %1626 = vmatmul.bf16.gmra.mxu2 %v5528_v33  ;;  %5819 = vmatmul.msk.bf16.gmra.mxu0 %vm680_vm1, %v6082_v36  ;;  %v2168_v33 = vpop.permute.xlu2 %2167  ;;  %v1508_v36 = vpop.f32.mrf.mxu1 }
 0x171   : > { %1715 = vmatmul.bf16.gmra.mxu3 %v5532_v40  ;;  %v2115_v62 = vld [vmem:[#allocation2 + $0x10] sm:$0xff]  ;;  %v1504_v40 = vadd.f32 %v1503_v60, %v7155_v47 }
 0x172   : > { %1782 = vst.msk [vmem:[#allocation2 + $0x18] sm:$0xff] %vm680_vm1, %v1749_v55  ;;  %v2307_v58 = vmul.f32 %v2158_v20, %v2115_v62  ;;  %v7354_v20 = vpop.f32.mrf.mxu0 }
 0x173   : > { %v1587_v56 = vpop.f32.mrf.mxu2 }
 0x174   : > { %v1588_v12 = vadd.f32 %v1587_v56, %v1499_v45  ;;  %v1676_v16 = vpop.f32.mrf.mxu3 }
 0x176   : > { %v1677_v17 = vadd.f32 %v1676_v16, %v1588_v12 }
 0x178   : > { %v1750_v32 = vadd.f32 %v1677_v17, %v718_v27  ;;  %v1506_v27 = vadd.f32 %v1505_v44, %v7170_v48  ;;  %v2173_v47 = vpop.permute.xlu2 %2172  ;;  %v5559_v17 = vld [vmem:[%s6816_s24 + $0x188] sm:$0xf] }
 0x179   : > { %v2116_v7 = vld [vmem:[#allocation2 + $0x18] sm:$0xff] }
 0x17a   : > { %1783 = vst.msk [vmem:[#allocation2 + $0x20] sm:$0xff] %vm680_vm1, %v1750_v32  ;;  %v2308_v39 = vmul.f32 %v2163_v25, %v2116_v7  ;;  %v6026_v32 = vld [vmem:[%s6816_s24 + $0x194] sm:$0xf0]  ;;  %v6024_v25 = vld [vmem:[%s6816_s24 + $0x18c] sm:$0xf]  ;;  %v7363_v44 = vpop.f32.mrf.mxu0 }
 0x17b   : > { %v1589_v22 = vpop.f32.mrf.mxu2  ;;  %v5561_v7 = vld [vmem:[%s6816_s24 + $0x198] sm:$0xf0]  ;;  %v5560_v24 = vor.u32 %v6026_v32, %v5559_v17 }
 0x17c   : > { %v1590_v10 = vadd.f32 %v1589_v22, %v1501_v4  ;;  %v1678_v54 = vpop.f32.mrf.mxu3  ;;  %v2338_v57 = vpack.c.bf16 %v2308_v39, %v2307_v58  ;;  %v1510_v4 = vpop.f32.mrf.mxu1  ;;  %v6084_v22 = vld [vmem:[%s7030_s28 + $0x60] sm:$0xff]  ;;  %v5564_v48 = vor.u32 %v6024_v25, %v5561_v7  ;;  %v6085_v7 = vld [vmem:[%s7030_s28 + $0x68] sm:$0xff] }
 0x17e   : > { %v1679_v30 = vadd.f32 %v1678_v54, %v1590_v10  ;;  %5826 = vmatmul.msk.bf16.gmra.mxu1 %vm680_vm1, %v2338_v57  ;;  %v721_v10 = vld [vmem:[#allocation2 + $0x38] sm:$0xff] }
 0x180   : > { %v1751_v37 = vadd.f32 %v1679_v30, %v719_v59  ;;  %1631 = vmatmul.bf16.gmra.mxu2 %v5544_v41  ;;  %5820 = vmatmul.msk.bf16.gmra.mxu0 %vm680_vm1, %v6083_v29  ;;  %v1509_v41 = vadd.f32 %v1508_v36, %v7185_v0  ;;  %v6102_v29 = vld [vmem:[#allocation3 + $0x30] sm:$0xff]  ;;  %v1511_v0 = vadd.f32 %v1510_v4, %v7203_v5  ;;  %v2178_v36 = vpop.permute.xlu0 %2177  ;;  %v6089_v5 = vld [vmem:[%s8810_s5 + $0x8] sm:$0xff] }
 0x181   : > { %1720 = vmatmul.bf16.gmra.mxu3 %v5548_v51  ;;  %v2117_v56 = vld [vmem:[#allocation2 + $0x20] sm:$0xff]  ;;  %v723_v4 = vld [vmem:[#allocation2 + $0x48] sm:$0xff]  ;;  %2896 = vmatpush.bf16.msra.mxu2 %v6089_v5 }
 0x182   : > { %1784 = vst.msk [vmem:[#allocation2 + $0x28] sm:$0xff] %vm680_vm1, %v1751_v37  ;;  %v2309_v62 = vmul.f32 %v2168_v33, %v2117_v56  ;;  %3228 = vmatpush.bf16.msra.mxu3 %v6102_v29  ;;  %v722_v33 = vld [vmem:[#allocation2 + $0x40] sm:$0xff]  ;;  %v5575_v56 = vld [vmem:[%s6816_s24 + $0x1a8] sm:$0xf] }
 0x183   : > { %v1592_v8 = vpop.f32.mrf.mxu2 }
 0x184   : > { %v1593_v55 = vadd.f32 %v1592_v8, %v1504_v40  ;;  %v1681_v45 = vpop.f32.mrf.mxu3  ;;  %v1513_v59 = vpop.f32.mrf.mxu1 }
 0x185   : > { %v7369_v8 = vpop.f32.mrf.mxu0 }
 0x186   : > { %v1682_v12 = vadd.f32 %v1681_v45, %v1593_v55  ;;  %v2183_v45 = vpop.permute.xlu1 %2182 }
 0x188   : > { %v1752_v16 = vadd.f32 %v1682_v12, %v720_v46  ;;  %v6030_v12 = vld [vmem:[%s6816_s24 + $0x1b4] sm:$0xf0] }
 0x189   : > { %v2118_v60 = vld [vmem:[#allocation2 + $0x28] sm:$0xff]  ;;  %v5576_v25 = vor.u32 %v6030_v12, %v5575_v56 }
 0x18a   : > { %1785 = vst.msk [vmem:[#allocation2 + $0x30] sm:$0xff] %vm680_vm1, %v1752_v16  ;;  %v2310_v58 = vmul.f32 %v2173_v47, %v2118_v60  ;;  %v5577_v47 = vld [vmem:[%s6816_s24 + $0x1b8] sm:$0xf0] }
 0x18b   : > { %v1594_v11 = vpop.f32.mrf.mxu2 }
 0x18c   : > { %v1595_v14 = vadd.f32 %v1594_v11, %v1506_v27  ;;  %v1683_v39 = vpop.f32.mrf.mxu3  ;;  %v2339_v19 = vpack.c.bf16 %v2310_v58, %v2309_v62  ;;  %v6028_v62 = vld [vmem:[%s6816_s24 + $0x1ac] sm:$0xf] }
 0x18d   : > { %v5580_v11 = vor.u32 %v6028_v62, %v5577_v47  ;;  %v6086_v47 = vld [vmem:[%s7030_s28 + $0x70] sm:$0xff] }
 0x18e   : > { %v1684_v54 = vadd.f32 %v1683_v39, %v1595_v14  ;;  %5827 = vmatmul.msk.bf16.gmra.mxu1 %vm680_vm1, %v2339_v19  ;;  %v1515_v14 = vpop.f32.mrf.mxu1 }
 0x190   : > { %v1753_v57 = vadd.f32 %v1684_v54, %v721_v10  ;;  %1636 = vmatmul.bf16.gmra.mxu2 %v5560_v24  ;;  %5821 = vmatmul.msk.bf16.gmra.mxu0 %vm680_vm1, %v6084_v22  ;;  %v1514_v24 = vadd.f32 %v1513_v59, %v7238_v43  ;;  %v7384_v22 = vpop.f32.mrf.mxu0  ;;  %v1516_v43 = vadd.f32 %v1515_v14, %v7272_v53  ;;  %v725_v53 = vld [vmem:[#allocation2 + $0x58] sm:$0xff]  ;;  %v726_v14 = vld [vmem:[#allocation2 + $0x60] sm:$0xff] }
 0x191   : > { %1725 = vmatmul.bf16.gmra.mxu3 %v5564_v48  ;;  %v2119_v40 = vld [vmem:[#allocation2 + $0x30] sm:$0xff] }
 0x192   : > { %1786 = vst.msk [vmem:[#allocation2 + $0x38] sm:$0xff] %vm680_vm1, %v1753_v57  ;;  %v2311_v16 = vmul.f32 %v2178_v36, %v2119_v40  ;;  %v724_v57 = vld [vmem:[#allocation2 + $0x50] sm:$0xff]  ;;  %v5591_v40 = vld [vmem:[%s6816_s24 + $0x1c8] sm:$0xf]  ;;  %v6032_v36 = vld [vmem:[%s6816_s24 + $0x1cc] sm:$0xf] }
 0x193   : > { %v1597_v13 = vpop.f32.mrf.mxu2 }
 0x194   : > { %v1598_v51 = vadd.f32 %v1597_v13, %v1509_v41  ;;  %v1686_v30 = vpop.f32.mrf.mxu3  ;;  %v2188_v13 = vpop.permute.xlu2 %2187 }
 0x196   : > { %v1687_v37 = vadd.f32 %v1686_v30, %v1598_v51  ;;  %v1518_v51 = vpop.f32.mrf.mxu1 }
 0x198   : > { %v1754_v55 = vadd.f32 %v1687_v37, %v722_v33  ;;  %v2193_v33 = vpop.permute.xlu0 %2192  ;;  %v7393_v56 = vpop.f32.mrf.mxu0 }
 0x199   : > { %v2120_v46 = vld [vmem:[#allocation2 + $0x38] sm:$0xff] }
 0x19a   : > { %1787 = vst.msk [vmem:[#allocation2 + $0x40] sm:$0xff] %vm680_vm1, %v1754_v55  ;;  %v2312_v27 = vmul.f32 %v2183_v45, %v2120_v46  ;;  %v6034_v55 = vld [vmem:[%s6816_s24 + $0x1d4] sm:$0xf0]  ;;  %v5593_v45 = vld [vmem:[%s6816_s24 + $0x1d8] sm:$0xf0] }
 0x19b   : > { %v1599_v60 = vpop.f32.mrf.mxu2  ;;  %v5592_v62 = vor.u32 %v6034_v55, %v5591_v40 }
 0x19c   : > { %v1600_v17 = vadd.f32 %v1599_v60, %v1511_v0  ;;  %v1688_v32 = vpop.f32.mrf.mxu3  ;;  %v2340_v58 = vpack.c.bf16 %v2312_v27, %v2311_v16  ;;  %v5596_v60 = vor.u32 %v6032_v36, %v5593_v45  ;;  %v6087_v36 = vld [vmem:[%s7030_s28 + $0x78] sm:$0xff]  ;;  %v727_v45 = vld [vmem:[#allocation2 + $0x68] sm:$0xff] }
 0x19e   : > { %v1689_v39 = vadd.f32 %v1688_v32, %v1600_v17  ;;  %5828 = vmatmul.msk.bf16.gmra.mxu1 %vm680_vm1, %v2340_v58  ;;  %v1519_v58 = vadd.f32 %v1518_v51, %v7304_v34 }
 0x1a0   : > { %v1755_v19 = vadd.f32 %v1689_v39, %v723_v4  ;;  %1641 = vmatmul.bf16.gmra.mxu2 %v5576_v25  ;;  %5822 = vmatmul.msk.bf16.gmra.mxu0 %vm680_vm1, %v6085_v7  ;;  %v1520_v25 = vpop.f32.mrf.mxu1  ;;  %v6101_v7 = vld [vmem:[#allocation3 + $0x28] sm:$0xff] }
 0x1a1   : > { %1730 = vmatmul.bf16.gmra.mxu3 %v5580_v11  ;;  %v2121_v41 = vld [vmem:[#allocation2 + $0x40] sm:$0xff] }
 0x1a2   : > { %1788 = vst.msk [vmem:[#allocation2 + $0x48] sm:$0xff] %vm680_vm1, %v1755_v19  ;;  %v2313_v59 = vmul.f32 %v2188_v13, %v2121_v41  ;;  %3229 = vmatpush.bf16.msra.mxu3 %v6101_v7  ;;  %v7400_v19 = vpop.f32.mrf.mxu0  ;;  %v6038_v13 = vld [vmem:[%s6816_s24 + $0x1f4] sm:$0xf0] }
 0x1a3   : > { %v1602_v10 = vpop.f32.mrf.mxu2 }
 0x1a4   : > { %v1603_v48 = vadd.f32 %v1602_v10, %v1514_v24  ;;  %v1691_v54 = vpop.f32.mrf.mxu3  ;;  %v2198_v10 = vpop.permute.xlu1 %2197 }
 0x1a6   : > { %v1692_v29 = vadd.f32 %v1691_v54, %v1603_v48  ;;  %v1521_v48 = vadd.f32 %v1520_v25, %v7313_v35  ;;  %v6088_v35 = vld [vmem:[%s8810_s5] sm:$0xff] }
 0x1a7   : > { %2897 = vmatpush.bf16.msra.mxu2 %v6088_v35 }
 0x1a8   : > { %v1756_v30 = vadd.f32 %v1692_v29, %v724_v57  ;;  %v2203_v57 = vpop.permute.xlu2 %2202  ;;  %v5607_v29 = vld [vmem:[%s6816_s24 + $0x1e8] sm:$0xf] }
 0x1a9   : > { %v2122_v37 = vld [vmem:[#allocation2 + $0x48] sm:$0xff] }
 0x1aa   : > { %1789 = vst.msk [vmem:[#allocation2 + $0x50] sm:$0xff] %vm680_vm1, %v1756_v30  ;;  %v2314_v0 = vmul.f32 %v2193_v33, %v2122_v37  ;;  %v6036_v30 = vld [vmem:[%s6816_s24 + $0x1ec] sm:$0xf]  ;;  %v1523_v33 = vpop.f32.mrf.mxu1 }
 0x1ab   : > { %v1604_v46 = vpop.f32.mrf.mxu2 }
 0x1ac   : > { %v1605_v12 = vadd.f32 %v1604_v46, %v1516_v43  ;;  %v1693_v16 = vpop.f32.mrf.mxu3  ;;  %v2341_v27 = vpack.c.bf16 %v2314_v0, %v2313_v59  ;;  %v5609_v43 = vld [vmem:[%s6816_s24 + $0x1f8] sm:$0xf0]  ;;  %v5608_v0 = vor.u32 %v6038_v13, %v5607_v29  ;;  %v6100_v29 = vld [vmem:[#allocation3 + $0x20] sm:$0xff]  ;;  %s6484_s24 = scalar_lea.hbm %s6483_s27, 256 }
 0x1ad   : > { %v5612_v46 = vor.u32 %v6036_v30, %v5609_v43  ;;  %3230 = vmatpush.bf16.msra.mxu3 %v6100_v29  ;;  %v730_v30 = vld [vmem:[#allocation2 + $0x80] sm:$0xff]  ;;  %p6485_p1 = scmp.ne.s32.totalorder %s6483_s27, %s6484_s24  ;;  %p6490_p6 = scmp.lt.s32.totalorder %s6488_s25, %s6484_s24 }
 0x1ae   : > { %v1694_v17 = vadd.f32 %v1693_v16, %v1605_v12  ;;  %5829 = vmatmul.msk.bf16.gmra.mxu1 %vm680_vm1, %v2341_v27  ;;  %v7413_v16 = vpop.f32.mrf.mxu0 }
 0x1af   : > { %p6486_p2 = pnand %p6485_p1, %p6696_p4  ;;  %p6491_p7 = por %p6490_p6, %p6489_p5 }
 0x1b0   : > { %v1757_v32 = vadd.f32 %v1694_v17, %v725_v53  ;;  %1646 = vmatmul.bf16.gmra.mxu2 %v5592_v62  ;;  %5823 = vmatmul.msk.bf16.gmra.mxu0 %vm680_vm1, %v6086_v47  ;;  %v1524_v62 = vadd.f32 %v1523_v33, %v7323_v1  ;;  %v728_v17 = vld [vmem:[#allocation2 + $0x70] sm:$0xff] }
 0x1b1   : > { %1735 = vmatmul.bf16.gmra.mxu3 %v5596_v60  ;;  %v2123_v39 = vld [vmem:[#allocation2 + $0x50] sm:$0xff]  ;;  %p6487_p3 = pneg %p6486_p2 }
 0x1b2   : > { %1790 = vst.msk [vmem:[#allocation2 + $0x58] sm:$0xff] %vm680_vm1, %v1757_v32  ;;  %v2315_v54 = vmul.f32 %v2198_v10, %v2123_v39  ;;  %v1525_v32 = vpop.f32.mrf.mxu1 }
 0x1b3   : > { %v1607_v5 = vpop.f32.mrf.mxu2  ;;  %p6492_p9 = pnand %p6491_p7, %p6487_p3 }
 0x1b4   : > { %v1608_v4 = vadd.f32 %v1607_v5, %v1519_v58  ;;  %v1696_v11 = vpop.f32.mrf.mxu3  ;;  %v1526_v5 = vadd.f32 %v1525_v32, %v7333_v31 }
 0x1b6   : > { %v1697_v24 = vadd.f32 %v1696_v11, %v1608_v4  ;;  %v2208_v4 = vpop.permute.xlu0 %2207  ;;  %v2213_v11 = vpop.permute.xlu1 %2212 }
 0x1b8   : > { %v1758_v34 = vadd.f32 %v1697_v24, %v726_v14 }
 0x1b9   : > { %v2124_v41 = vld [vmem:[#allocation2 + $0x58] sm:$0xff] }
 0x1ba   : > { %1791 = vst.msk [vmem:[#allocation2 + $0x60] sm:$0xff] %vm680_vm1, %v1758_v34  ;;  %v2316_v51 = vmul.f32 %v2203_v57, %v2124_v41 }
 0x1bb   : > { %v1609_v59 = vpop.f32.mrf.mxu2 }
 0x1bc   : > { %v1610_v37 = vadd.f32 %v1609_v59, %v1521_v48  ;;  %v1698_v40 = vpop.f32.mrf.mxu3  ;;  %v2342_v55 = vpack.c.bf16 %v2316_v51, %v2315_v54  ;;  %v729_v54 = vld [vmem:[#allocation2 + $0x78] sm:$0xff] }
 0x1be   : > { %v1699_v12 = vadd.f32 %v1698_v40, %v1610_v37  ;;  %5830 = vmatmul.msk.bf16.gmra.mxu1 %vm680_vm1, %v2342_v55  ;;  %v2223_v37 = vpop.permute.xlu0 %2222  ;;  %v2218_v40 = vpop.permute.xlu2 %2217 }
 0x1c0   : > { %v1759_v27 = vadd.f32 %v1699_v12, %v727_v45  ;;  %1651 = vmatmul.bf16.gmra.mxu2 %v5608_v0  ;;  %5824 = vmatmul.msk.bf16.gmra.mxu0 %vm680_vm1, %v6087_v36 }
 0x1c1   : > { %1740 = vmatmul.bf16.gmra.mxu3 %v5612_v46  ;;  %v2125_v25 = vld [vmem:[#allocation2 + $0x60] sm:$0xff] }
 0x1c2   : > { %1792 = vst.msk [vmem:[#allocation2 + $0x68] sm:$0xff] %vm680_vm1, %v1759_v27  ;;  %v2317_v39 = vmul.f32 %v2208_v4, %v2125_v25  ;;  %v731_v27 = vld [vmem:[#allocation2 + $0x88] sm:$0xff] }
 0x1c3   : > { %v1612_v47 = vpop.f32.mrf.mxu2 }
 0x1c4   : > { %v1613_v53 = vadd.f32 %v1612_v47, %v1524_v62  ;;  %v1701_v60 = vpop.f32.mrf.mxu3 }
 0x1c6   : > { %v1702_v58 = vadd.f32 %v1701_v60, %v1613_v53 }
 0x1c8   : > { %v1760_v7 = vadd.f32 %v1702_v58, %v728_v17  ;;  %v732_v17 = vld [vmem:[#allocation2 + $0x90] sm:$0xff]  ;;  %v2228_v58 = vpop.permute.xlu1 %2227 }
 0x1c9   : > { %v2126_v14 = vld [vmem:[#allocation2 + $0x68] sm:$0xff] }
 0x1ca   : > { %1793 = vst.msk [vmem:[#allocation2 + $0x70] sm:$0xff] %vm680_vm1, %v1760_v7  ;;  %v2318_v1 = vmul.f32 %v2213_v11, %v2126_v14 }
 0x1cb   : > { %v1614_v24 = vpop.f32.mrf.mxu2 }
 0x1cc   : > { %v1615_v10 = vadd.f32 %v1614_v24, %v1526_v5  ;;  %v1703_v34 = vpop.f32.mrf.mxu3  ;;  %v2343_v48 = vpack.c.bf16 %v2318_v1, %v2317_v39  ;;  %v2233_v5 = vpop.permute.xlu2 %2232 }
 0x1ce   : > { %v1704_v57 = vadd.f32 %v1703_v34, %v1615_v10  ;;  %5831 = vmatmul.msk.bf16.gmra.mxu1 %vm680_vm1, %v2343_v48  ;;  %v2388_v34 = vpop.permute.xlu0 %2387 }
 0x1cf   : > { %v2545_v48 = vmul.f32 %v2388_v34, %v7341_v28  ;;  %v2749_v34 = vmul.f32 0.1, %v7369_v8 }
 0x1d0   : > { %v1761_v41 = vadd.f32 %v1704_v57, %v729_v54  ;;  %v2393_v29 = vpop.permute.xlu1 %2392 }
 0x1d1   : > { %v2127_v59 = vld [vmem:[#allocation2 + $0x70] sm:$0xff] }
 0x1d2   : > { %1794 = vst.msk [vmem:[#allocation2 + $0x78] sm:$0xff] %vm680_vm1, %v1761_v41  ;;  %v2319_v0 = vmul.f32 %v2218_v40, %v2127_v59  ;;  %v2746_v40 = vmul.f32 0.1, %v7341_v28 }
 0x1d3   : > { %v1617_v31 = vpop.f32.mrf.mxu2 }
 0x1d4   : > { %v1618_v13 = vadd.f32 %v1617_v31, %v7049_v49  ;;  %v1706_v51 = vpop.f32.mrf.mxu3  ;;  %v2546_v31 = vmul.f32 %v2393_v29, %v7354_v20 }
 0x1d6   : > { %v1707_v43 = vadd.f32 %v1706_v51, %v1618_v13  ;;  %v6099_v13 = vld [vmem:[#allocation3 + $0x18] sm:$0xff] }
 0x1d7   : > { %3231 = vmatpush.bf16.msra.mxu3 %v6099_v13 }
 0x1d8   : > { %v1762_v33 = vadd.f32 %v1707_v43, %v730_v30 }
 0x1d9   : > { %v2128_v55 = vld [vmem:[#allocation2 + $0x78] sm:$0xff] }
 0x1da   : > { %1795 = vst.msk [vmem:[#allocation2 + $0x80] sm:$0xff] %vm680_vm1, %v1762_v33  ;;  %v2320_v36 = vmul.f32 %v2223_v37, %v2128_v55  ;;  %v734_v37 = vld [vmem:[#allocation2 + $0xa0] sm:$0xff]  ;;  %v2747_v55 = vmul.f32 0.1, %v7354_v20 }
 0x1db   : > { %v1619_v35 = vpop.f32.mrf.mxu2 }
 0x1dc   : > { %v1620_v45 = vadd.f32 %v1619_v35, %v7066_v3  ;;  %v1708_v46 = vpop.f32.mrf.mxu3  ;;  %v2344_v12 = vpack.c.bf16 %v2320_v36, %v2319_v0  ;;  %v2238_v35 = vpop.permute.xlu2 %2237 }
 0x1de   : > { %v1709_v49 = vadd.f32 %v1708_v46, %v1620_v45  ;;  %5832 = vmatmul.msk.bf16.gmra.mxu1 %vm680_vm1, %v2344_v12  ;;  %v7437_v46 = vpop.f32.mrf.mxu0 }
 0x1e0   : > { %v1763_v62 = vadd.f32 %v1709_v49, %v731_v27 }
 0x1e1   : > { %v2129_v25 = vld [vmem:[#allocation2 + $0x80] sm:$0xff] }
 0x1e2   : > { %1796 = vst.msk [vmem:[#allocation2 + $0x88] sm:$0xff] %vm680_vm1, %v1763_v62  ;;  %v2321_v4 = vmul.f32 %v2228_v58, %v2129_v25  ;;  %v2398_v25 = vpop.permute.xlu1 %2397 }
 0x1e3   : > { %v1622_v47 = vpop.f32.mrf.mxu2 }
 0x1e4   : > { %v1623_v53 = vadd.f32 %v1622_v47, %v7080_v15  ;;  %v1711_v60 = vpop.f32.mrf.mxu3  ;;  %v733_v15 = vld [vmem:[#allocation2 + $0x98] sm:$0xff] }
 0x1e6   : > { %v1712_v32 = vadd.f32 %v1711_v60, %v1623_v53 }
 0x1e8   : > { %v1764_v7 = vadd.f32 %v1712_v32, %v732_v17 }
 0x1e9   : > { %v2130_v3 = vld [vmem:[#allocation2 + $0x88] sm:$0xff] }
 0x1ea   : > { %1797 = vst.msk [vmem:[#allocation2 + $0x90] sm:$0xff] %vm680_vm1, %v1764_v7  ;;  %v2322_v11 = vmul.f32 %v2233_v5, %v2130_v3  ;;  %v735_v7 = vld [vmem:[#allocation2 + $0xa8] sm:$0xff]  ;;  %v2547_v5 = vmul.f32 %v2398_v25, %v7363_v44 }
 0x1eb   : > { %v1624_v14 = vpop.f32.mrf.mxu2  ;;  %v2634_v39 = vpop.f32.mrf.mxu1 }
 0x1ec   : > { %v1625_v1 = vadd.f32 %v1624_v14, %v7093_v26  ;;  %v1713_v24 = vpop.f32.mrf.mxu3  ;;  %v2345_v10 = vpack.c.bf16 %v2322_v11, %v2321_v4  ;;  %v2635_v57 = vadd.f32 %v2634_v39, %v2545_v48  ;;  %v2403_v14 = vpop.permute.xlu2 %2402 }
 0x1ed   : > { %v2548_v39 = vmul.f32 %v2403_v14, %v7369_v8 }
 0x1ee   : > { %v1714_v54 = vadd.f32 %v1713_v24, %v1625_v1  ;;  %5833 = vmatmul.msk.bf16.gmra.mxu1 %vm680_vm1, %v2345_v10  ;;  %v2714_v26 = vmul.f32 0.9, %v2635_v57  ;;  %v7450_v1 = vpop.f32.mrf.mxu0 }
 0x1f0   : > { %v1765_v41 = vadd.f32 %v1714_v54, %v733_v15  ;;  %v7439_v12 = vadd.f32 %v2746_v40, %v2714_v26 }
 0x1f1   : > { %v2131_v45 = vld [vmem:[#allocation2 + $0x90] sm:$0xff] }
 0x1f2   : > { %1798 = vst.msk [vmem:[#allocation2 + $0x98] sm:$0xff] %vm680_vm1, %v1765_v41  ;;  %v2323_v28 = vmul.f32 %v2238_v35, %v2131_v45  ;;  %v736_v41 = vld [vmem:[#allocation2 + $0xb0] sm:$0xff] }
 0x1f3   : > { %v1627_v51 = vpop.f32.mrf.mxu2  ;;  %v2636_v30 = vpop.f32.mrf.mxu1 }
 0x1f4   : > { %v1628_v43 = vadd.f32 %v1627_v51, %v7103_v9  ;;  %v2637_v59 = vadd.f32 %v2636_v30, %v2546_v31  ;;  %v1716_v33 = vpop.f32.mrf.mxu3  ;;  %v2243_v9 = vpop.permute.xlu0 %2242 }
 0x1f5   : > { %v2408_v45 = vpop.permute.xlu2 %2407 }
 0x1f6   : > { %v2715_v0 = vmul.f32 0.9, %v2637_v59  ;;  %v1717_v36 = vadd.f32 %v1716_v33, %v1628_v43 }
 0x1f8   : > { %v7441_v27 = vadd.f32 %v2747_v55, %v2715_v0  ;;  %v1766_v49 = vadd.f32 %v1717_v36, %v734_v37  ;;  %v7463_v55 = vpop.f32.mrf.mxu0 }
 0x1f9   : > { %v2132_v62 = vld [vmem:[#allocation2 + $0x98] sm:$0xff] }
 0x1fa   : > { %v2810_v47 = vpack.c.bf16 %v7441_v27, %v7439_v12  ;;  %1799 = vst.msk [vmem:[#allocation2 + $0xa0] sm:$0xff] %vm680_vm1, %v1766_v49  ;;  %v2324_v20 = vmul.f32 %v2243_v9, %v2132_v62  ;;  %v737_v49 = vld [vmem:[#allocation2 + $0xb8] sm:$0xff]  ;;  %v2549_v9 = vmul.f32 %v2408_v45, %v7384_v22 }
 0x1fb   : > { %v1629_v53 = vpop.f32.mrf.mxu2  ;;  %v2639_v60 = vpop.f32.mrf.mxu1 }
 0x1fc   : > { %v1630_v17 = vadd.f32 %v1629_v53, %v7115_v50  ;;  %2898 = vmatmul.bf16.vlgmr.msra.gmra.mxu2 %v2810_v47  ;;  %v1718_v32 = vpop.f32.mrf.mxu3  ;;  %v2346_v58 = vpack.c.bf16 %v2324_v20, %v2323_v28  ;;  %v2640_v4 = vadd.f32 %v2639_v60, %v2547_v5  ;;  %v2748_v50 = vmul.f32 0.1, %v7363_v44  ;;  %v2248_v13 = vpop.permute.xlu0 %2247  ;;  %v6098_v60 = vld [vmem:[#allocation3 + $0x10] sm:$0xff] }
 0x1fd   : > { %v2253_v44 = vpop.permute.xlu1 %2252  ;;  %3232 = vmatpush.bf16.msra.mxu3 %v6098_v60 }
 0x1fe   : > { %v1719_v3 = vadd.f32 %v1718_v32, %v1630_v17  ;;  %5834 = vmatmul.msk.bf16.gmra.mxu1 %vm680_vm1, %v2346_v58  ;;  %v2716_v15 = vmul.f32 0.9, %v2640_v4  ;;  %v2751_v58 = vmul.f32 0.1, %v7393_v56  ;;  %v738_v4 = vld [vmem:[#allocation2 + $0xc0] sm:$0xff] }
 0x200   : > { %v1767_v11 = vadd.f32 %v1719_v3, %v735_v7  ;;  %v7456_v30 = vadd.f32 %v2748_v50, %v2716_v15  ;;  %v2263_v15 = vpop.permute.xlu2 %2262 }
 0x201   : > { %v2133_v51 = vld [vmem:[#allocation2 + $0xa0] sm:$0xff] }
 0x202   : > { %1800 = vst.msk [vmem:[#allocation2 + $0xa8] sm:$0xff] %vm680_vm1, %v1767_v11  ;;  %v7473_v11 = vpop.f32.mrf.mxu0 }
 0x203   : > { %v1632_v24 = vpop.f32.mrf.mxu2  ;;  %v2641_v10 = vpop.f32.mrf.mxu1 }
 0x204   : > { %v1633_v48 = vadd.f32 %v1632_v24, %v7131_v2  ;;  %v2642_v54 = vadd.f32 %v2641_v10, %v2548_v39  ;;  %v1721_v57 = vpop.f32.mrf.mxu3  ;;  %v2325_v2 = vmul.f32 %v2248_v13, %v2133_v51  ;;  %v2413_v20 = vpop.permute.xlu0 %2412 }
 0x205   : > { %v2550_v53 = vmul.f32 %v2413_v20, %v7393_v56  ;;  %v2258_v50 = vpop.permute.xlu1 %2257 }
 0x206   : > { %v2717_v29 = vmul.f32 0.9, %v2642_v54  ;;  %v1722_v31 = vadd.f32 %v1721_v57, %v1633_v48 }
 0x208   : > { %v7458_v26 = vadd.f32 %v2749_v34, %v2717_v29  ;;  %v1768_v43 = vadd.f32 %v1722_v31, %v736_v41 }
 0x209   : > { %v2134_v59 = vld [vmem:[#allocation2 + $0xa8] sm:$0xff] }
 0x20a   : > { %1801 = vst.msk [vmem:[#allocation2 + $0xb0] sm:$0xff] %vm680_vm1, %v1768_v43  ;;  %v2811_v8 = vpack.c.bf16 %v7458_v26, %v7456_v30  ;;  %v2326_v33 = vmul.f32 %v2253_v44, %v2134_v59  ;;  %v739_v43 = vld [vmem:[#allocation2 + $0xc8] sm:$0xff] }
 0x20b   : > { %v1634_v37 = vpop.f32.mrf.mxu2  ;;  %v2644_v40 = vpop.f32.mrf.mxu1 }
 0x20c   : > { %v1635_v0 = vadd.f32 %v1634_v37, %v7144_v21  ;;  %2903 = vmatmul.bf16.gmra.mxu2 %v2811_v8  ;;  %v1723_v36 = vpop.f32.mrf.mxu3  ;;  %v2347_v35 = vpack.c.bf16 %v2326_v33, %v2325_v2  ;;  %v2645_v47 = vadd.f32 %v2644_v40, %v2549_v9  ;;  %v2750_v21 = vmul.f32 0.1, %v7384_v22  ;;  %v2418_v51 = vpop.permute.xlu0 %2417 }
 0x20d   : > { %v2551_v44 = vmul.f32 %v2418_v51, %v7400_v19  ;;  %v7485_v8 = vpop.f32.mrf.mxu0  ;;  %v2423_v37 = vpop.permute.xlu1 %2422 }
 0x20e   : > { %v1724_v62 = vadd.f32 %v1723_v36, %v1635_v0  ;;  %5835 = vmatmul.msk.bf16.gmra.mxu1 %vm680_vm1, %v2347_v35  ;;  %v2718_v25 = vmul.f32 0.9, %v2645_v47  ;;  %v2552_v40 = vmul.f32 %v2423_v37, %v7413_v16  ;;  %v2753_v35 = vmul.f32 0.1, %v7413_v16  ;;  %v740_v47 = vld [vmem:[#allocation2 + $0xd0] sm:$0xff] }
 0x210   : > { %v1769_v28 = vadd.f32 %v1724_v62, %v737_v49  ;;  %v7475_v10 = vadd.f32 %v2750_v21, %v2718_v25 }
 0x211   : > { %v2135_v24 = vld [vmem:[#allocation2 + $0xb0] sm:$0xff] }
 0x212   : > { %1802 = vst.msk [vmem:[#allocation2 + $0xb8] sm:$0xff] %vm680_vm1, %v1769_v28  ;;  %v2327_v48 = vmul.f32 %v2258_v50, %v2135_v24  ;;  %v741_v24 = vld [vmem:[#allocation2 + $0xd8] sm:$0xff] }
 0x213   : > { %v1637_v17 = vpop.f32.mrf.mxu2  ;;  %v2646_v32 = vpop.f32.mrf.mxu1 }
 0x214   : > { %v1638_v7 = vadd.f32 %v1637_v17, %v7153_v63  ;;  %v2647_v5 = vadd.f32 %v2646_v32, %v2550_v53  ;;  %v1726_v3 = vpop.f32.mrf.mxu3  ;;  %v2268_v53 = vpop.permute.xlu2 %2267 }
 0x215   : > { %v7496_v25 = vpop.f32.mrf.mxu0  ;;  %v2428_v50 = vpop.permute.xlu1 %2427 }
 0x216   : > { %v2719_v14 = vmul.f32 0.9, %v2647_v5  ;;  %v1727_v39 = vadd.f32 %v1726_v3, %v1638_v7 }
 0x218   : > { %v7477_v22 = vadd.f32 %v2751_v58, %v2719_v14  ;;  %v1770_v34 = vadd.f32 %v1727_v39, %v738_v4 }
 0x219   : > { %v2136_v56 = vld [vmem:[#allocation2 + $0xb8] sm:$0xff] }
 0x21a   : > { %1803 = vst.msk [vmem:[#allocation2 + $0xc0] sm:$0xff] %vm680_vm1, %v1770_v34  ;;  %v2812_v63 = vpack.c.bf16 %v7477_v22, %v7475_v10  ;;  %v2328_v54 = vmul.f32 %v2263_v15, %v2136_v56  ;;  %v2553_v34 = vmul.f32 %v2428_v50, %v7437_v46 }
 0x21b   : > { %v1639_v57 = vpop.f32.mrf.mxu2  ;;  %v2649_v41 = vpop.f32.mrf.mxu1 }
 0x21c   : > { %v1640_v29 = vadd.f32 %v1639_v57, %v7163_v42  ;;  %2908 = vmatmul.bf16.gmra.mxu2 %v2812_v63  ;;  %v1728_v31 = vpop.f32.mrf.mxu3  ;;  %v2348_v13 = vpack.c.bf16 %v2328_v54, %v2327_v48  ;;  %v2650_v2 = vadd.f32 %v2649_v41, %v2551_v44  ;;  %v2752_v42 = vmul.f32 0.1, %v7400_v19  ;;  %v2273_v19 = vpop.permute.xlu0 %2272  ;;  %v6097_v57 = vld [vmem:[#allocation3 + $0x8] sm:$0xff] }
 0x21d   : > { %v2433_v48 = vpop.permute.xlu2 %2432  ;;  %3233 = vmatpush.bf16.msra.mxu3 %v6097_v57 }
 0x21e   : > { %v1729_v59 = vadd.f32 %v1728_v31, %v1640_v29  ;;  %5836 = vmatmul.msk.bf16.gmra.mxu1 %vm680_vm1, %v2348_v13  ;;  %v2720_v45 = vmul.f32 0.9, %v2650_v2  ;;  %v2554_v54 = vmul.f32 %v2433_v48, %v7450_v1  ;;  %v2755_v31 = vmul.f32 0.1, %v7450_v1  ;;  %v742_v2 = vld [vmem:[#allocation2 + $0xe0] sm:$0xff] }
 0x220   : > { %v1771_v33 = vadd.f32 %v1729_v59, %v739_v43  ;;  %v7492_v21 = vadd.f32 %v2752_v42, %v2720_v45  ;;  %v7509_v59 = vpop.f32.mrf.mxu0 }
 0x221   : > { %v2137_v60 = vld [vmem:[#allocation2 + $0xc0] sm:$0xff] }
 0x222   : > { %1804 = vst.msk [vmem:[#allocation2 + $0xc8] sm:$0xff] %vm680_vm1, %v1771_v33  ;;  %v2329_v16 = vmul.f32 %v2268_v53, %v2137_v60  ;;  %v743_v60 = vld [vmem:[#allocation2 + $0xe8] sm:$0xff] }
 0x223   : > { %v1642_v0 = vpop.f32.mrf.mxu2  ;;  %v2651_v36 = vpop.f32.mrf.mxu1 }
 0x224   : > { %v1643_v49 = vadd.f32 %v1642_v0, %v7179_v61  ;;  %v2652_v9 = vadd.f32 %v2651_v36, %v2552_v40  ;;  %v1731_v62 = vpop.f32.mrf.mxu3  ;;  %v2278_v40 = vpop.permute.xlu0 %2277 }
 0x225   : > { %v2438_v53 = vpop.permute.xlu2 %2437 }
 0x226   : > { %v2721_v28 = vmul.f32 0.9, %v2652_v9  ;;  %v1732_v20 = vadd.f32 %v1731_v62, %v1643_v49 }
 0x228   : > { %v7494_v17 = vadd.f32 %v2753_v35, %v2721_v28  ;;  %v1772_v32 = vadd.f32 %v1732_v20, %v740_v47  ;;  %v2283_v35 = vpop.permute.xlu1 %2282 }
 0x229   : > { %v2138_v58 = vld [vmem:[#allocation2 + $0xc8] sm:$0xff] }
 0x22a   : > { %1805 = vst.msk [vmem:[#allocation2 + $0xd0] sm:$0xff] %vm680_vm1, %v1772_v32  ;;  %v2813_v61 = vpack.c.bf16 %v7494_v17, %v7492_v21  ;;  %v2330_v7 = vmul.f32 %v2273_v19, %v2138_v58  ;;  %v2555_v32 = vmul.f32 %v2438_v53, %v7463_v55  ;;  %v7521_v58 = vpop.f32.mrf.mxu0 }
 0x22b   : > { %v1644_v5 = vpop.f32.mrf.mxu2  ;;  %v2654_v3 = vpop.f32.mrf.mxu1 }
 0x22c   : > { %v1645_v4 = vadd.f32 %v1644_v5, %v7190_v18  ;;  %2913 = vmatmul.bf16.gmra.mxu2 %v2813_v61  ;;  %v1733_v14 = vpop.f32.mrf.mxu3  ;;  %v2349_v39 = vpack.c.bf16 %v2330_v7, %v2329_v16  ;;  %v2655_v56 = vadd.f32 %v2654_v3, %v2553_v34  ;;  %v2754_v18 = vmul.f32 0.1, %v7437_v46  ;;  %v2443_v7 = vpop.permute.xlu0 %2442 }
 0x22d   : > { %v2556_v5 = vmul.f32 %v2443_v7, %v7473_v11 }
 0x22e   : > { %v1734_v15 = vadd.f32 %v1733_v14, %v1645_v4  ;;  %5837 = vmatmul.msk.bf16.gmra.mxu1 %vm680_vm1, %v2349_v39  ;;  %v2722_v13 = vmul.f32 0.9, %v2655_v56  ;;  %v2757_v14 = vmul.f32 0.1, %v7473_v11 }
 0x230   : > { %v1773_v63 = vadd.f32 %v1734_v15, %v741_v24  ;;  %v7511_v0 = vadd.f32 %v2754_v18, %v2722_v13  ;;  %v744_v15 = vld [vmem:[#allocation2 + $0xf0] sm:$0xff]  ;;  %v2288_v48 = vpop.permute.xlu1 %2287 }
 0x231   : > { %v2139_v42 = vld [vmem:[#allocation2 + $0xd0] sm:$0xff] }
 0x232   : > { %1806 = vst.msk [vmem:[#allocation2 + $0xd8] sm:$0xff] %vm680_vm1, %v1773_v63  ;;  %v2331_v45 = vmul.f32 %v2278_v40, %v2139_v42  ;;  %v745_v40 = vld [vmem:[#allocation2 + $0xf8] sm:$0xff] }
 0x233   : > { %v1647_v41 = vpop.f32.mrf.mxu2  ;;  %v2656_v29 = vpop.f32.mrf.mxu1 }
 0x234   : > { %v1648_v51 = vadd.f32 %v1647_v41, %v7207_v23  ;;  %v2657_v43 = vadd.f32 %v2656_v29, %v2554_v54  ;;  %v1736_v44 = vpop.f32.mrf.mxu3  ;;  %v7532_v29 = vpop.f32.mrf.mxu0 }
 0x236   : > { %v2723_v33 = vmul.f32 0.9, %v2657_v43  ;;  %v1737_v37 = vadd.f32 %v1736_v44, %v1648_v51 }
 0x238   : > { %v7513_v46 = vadd.f32 %v2755_v31, %v2723_v33  ;;  %v1774_v36 = vadd.f32 %v1737_v37, %v742_v2  ;;  %v2448_v37 = vpop.permute.xlu0 %2447 }
 0x239   : > { %v2140_v1 = vld [vmem:[#allocation2 + $0xd8] sm:$0xff]  ;;  %v2557_v42 = vmul.f32 %v2448_v37, %v7485_v8  ;;  %v2762_v37 = vmul.f32 0.1, %v7532_v29 }
 0x23a   : > { %1807 = vst.msk [vmem:[#allocation2 + $0xe0] sm:$0xff] %vm680_vm1, %v1774_v36  ;;  %v2814_v23 = vpack.c.bf16 %v7513_v46, %v7511_v0  ;;  %v2332_v49 = vmul.f32 %v2283_v35, %v2140_v1 }
 0x23b   : > { %v1649_v9 = vpop.f32.mrf.mxu2  ;;  %v2659_v62 = vpop.f32.mrf.mxu1 }
 0x23c   : > { %v1650_v47 = vadd.f32 %v1649_v9, %v7234_v38  ;;  %2918 = vmatmul.bf16.gmra.mxu2 %v2814_v23  ;;  %v1738_v28 = vpop.f32.mrf.mxu3  ;;  %v2350_v20 = vpack.c.bf16 %v2332_v49, %v2331_v45  ;;  %v2660_v61 = vadd.f32 %v2659_v62, %v2555_v32  ;;  %v2756_v38 = vmul.f32 0.1, %v7463_v55  ;;  %v2293_v55 = vpop.permute.xlu2 %2292  ;;  %v6096_v23 = vld [vmem:[#allocation3] sm:$0xff] }
 0x23d   : > { %v2453_v45 = vpop.permute.xlu1 %2452  ;;  %3234 = vmatpush.bf16.msra.mxu3 %v6096_v23  ;;  %v2758_v62 = vmul.f32 0.1, %v7485_v8 }
 0x23e   : > { %v1739_v19 = vadd.f32 %v1738_v28, %v1650_v47  ;;  %5838 = vmatmul.msk.bf16.gmra.mxu1 %vm680_vm1, %v2350_v20  ;;  %v2724_v39 = vmul.f32 0.9, %v2660_v61  ;;  %v2558_v49 = vmul.f32 %v2453_v45, %v7496_v25  ;;  %v2759_v47 = vmul.f32 0.1, %v7496_v25 }
 0x240   : > { %v1775_v16 = vadd.f32 %v1739_v19, %v743_v60  ;;  %v7528_v57 = vadd.f32 %v2756_v38, %v2724_v39 }
 0x241   : > { %v2141_v54 = vld [vmem:[#allocation2 + $0xe0] sm:$0xff] }
 0x242   : > { %1808 = vst.msk [vmem:[#allocation2 + $0xe8] sm:$0xff] %vm680_vm1, %v1775_v16  ;;  %v2333_v11 = vmul.f32 %v2288_v48, %v2141_v54  ;;  %v2303_v16 = vpop.permute.xlu0 %2302 }
 0x243   : > { %v1652_v3 = vpop.f32.mrf.mxu2  ;;  %v2661_v4 = vpop.f32.mrf.mxu1 }
 0x244   : > { %v1653_v50 = vadd.f32 %v1652_v3, %v7262_v52  ;;  %v2662_v24 = vadd.f32 %v2661_v4, %v2556_v5  ;;  %v1741_v34 = vpop.f32.mrf.mxu3  ;;  %v2298_v60 = vpop.permute.xlu2 %2297 }
 0x245   : > { %v2458_v25 = vpop.permute.xlu1 %2457 }
 0x246   : > { %v2725_v56 = vmul.f32 0.9, %v2662_v24  ;;  %v1742_v63 = vadd.f32 %v1741_v34, %v1653_v50  ;;  %v2559_v39 = vmul.f32 %v2458_v25, %v7509_v59 }
 0x248   : > { %v7530_v18 = vadd.f32 %v2757_v14, %v2725_v56  ;;  %v1776_v41 = vadd.f32 %v1742_v63, %v744_v15  ;;  %v2760_v56 = vmul.f32 0.1, %v7509_v59  ;;  %v2761_v63 = vmul.f32 0.1, %v7521_v58 }
 0x249   : > { %v2142_v31 = vld [vmem:[#allocation2 + $0xe8] sm:$0xff] }
 0x24a   : > { %1809 = vst.msk [vmem:[#allocation2 + $0xf0] sm:$0xff] %vm680_vm1, %v1776_v41  ;;  %v2815_v52 = vpack.c.bf16 %v7530_v18, %v7528_v57  ;;  %v2334_v13 = vmul.f32 %v2293_v55, %v2142_v31 }
 0x24b   : > { %v1654_v51 = vpop.f32.mrf.mxu2  ;;  %v2664_v43 = vpop.f32.mrf.mxu1 }
 0x24c   : > { %v1655_v44 = vadd.f32 %v1654_v51, %v7289_v6  ;;  %2923 = vmatmul.bf16.gmra.mxu2 %v2815_v52  ;;  %v1743_v2 = vpop.f32.mrf.mxu3  ;;  %v2351_v33 = vpack.c.bf16 %v2334_v13, %v2333_v11  ;;  %v2665_v35 = vadd.f32 %v2664_v43, %v2557_v42  ;;  %v2075_v6 = vpop.f32.mrf.mxu0 }
 0x24d   : > { %v2463_v24 = vpop.permute.xlu2 %2462  ;;  %v2468_v51 = vpop.permute.xlu0 %2467 }
 0x24e   : > { %v1744_v36 = vadd.f32 %v1743_v2, %v1655_v44  ;;  %5839 = vmatmul.msk.bf16.gmra.mxu1 %vm680_vm1, %v2351_v33  ;;  %v2726_v28 = vmul.f32 0.9, %v2665_v35  ;;  %v2560_v34 = vmul.f32 %v2463_v24, %v7521_v58  ;;  %v2561_v43 = vmul.f32 %v2468_v51, %v7532_v29  ;;  %v2473_v59 = vpop.permute.xlu1 %2472 }
 0x24f   : > { %v2562_v58 = vmul.f32 %v2473_v59, %v2075_v6 }
 0x250   : > { %v1777_v1 = vadd.f32 %v1744_v36, %v745_v40  ;;  %v7544_v19 = vadd.f32 %v2758_v62, %v2726_v28  ;;  %v2763_v40 = vmul.f32 0.1, %v2075_v6 }
 0x251   : > { %v2143_v32 = vld [vmem:[#allocation2 + $0xf0] sm:$0xff] }
 0x252   : > { %1810 = vst.msk [vmem:[#allocation2 + $0xf8] sm:$0xff] %vm680_vm1, %v1777_v1  ;;  %v2335_v38 = vmul.f32 %v2298_v60, %v2143_v32 }
 0x253   : > { %v2666_v9 = vpop.f32.mrf.mxu1 }
 0x254   : > { %v2667_v20 = vadd.f32 %v2666_v9, %v2558_v49  ;;  %v2078_v14 = vpop.f32.mrf.mxu0 }
 0x255   : > { %v2478_v62 = vpop.permute.xlu2 %2477  ;;  %v2764_v60 = vmul.f32 0.1, %v2078_v14 }
 0x256   : > { %v2727_v53 = vmul.f32 0.9, %v2667_v20 }
 0x258   : > { %v7546_v61 = vadd.f32 %v2759_v47, %v2727_v53  ;;  %v2563_v47 = vmul.f32 %v2478_v62, %v2078_v14  ;;  %v2483_v53 = vpop.permute.xlu0 %2482 }
 0x259   : > { %v2144_v7 = vld [vmem:[#allocation2 + $0xf8] sm:$0xff] }
 0x25a   : > { %v2816_v5 = vpack.c.bf16 %v7546_v61, %v7544_v19  ;;  %v2336_v3 = vmul.f32 %v2303_v16, %v2144_v7 }
 0x25b   : > { %v2669_v4 = vpop.f32.mrf.mxu1 }
 0x25c   : > { %2928 = vmatmul.bf16.gmra.mxu2 %v2816_v5  ;;  %v2352_v8 = vpack.c.bf16 %v2336_v3, %v2335_v38  ;;  %v2670_v50 = vadd.f32 %v2669_v4, %v2559_v39  ;;  %v2080_v55 = vpop.f32.mrf.mxu0  ;;  %v3011_v5 = vmul.f32 0.30685282, %v7439_v12 }
 0x25d   : > { %v2564_v29 = vmul.f32 %v2483_v53, %v2080_v55  ;;  %v2765_v16 = vmul.f32 0.1, %v2080_v55  ;;  %v2493_v59 = vpop.permute.xlu2 %2492  ;;  %v3014_v53 = vmul.f32 0.30685282, %v7458_v26 }
 0x25e   : > { %5840 = vmatmul.msk.bf16.gmra.mxu1 %vm680_vm1, %v2352_v8  ;;  %v2728_v48 = vmul.f32 0.9, %v2670_v50  ;;  %v7573_v8 = vld [vmem:[%s8811_s6] ss:$0 sm:$0xff] }
 0x260   : > { %v7555_v31 = vadd.f32 %v2760_v56, %v2728_v48 }
 0x263   : > { %v2671_v15 = vpop.f32.mrf.mxu1 }
 0x264   : > { %v2672_v54 = vadd.f32 %v2671_v15, %v2560_v34  ;;  %v2083_v2 = vpop.f32.mrf.mxu0  ;;  %v3012_v34 = vmul.f32 0.30685282, %v7441_v27 }
 0x266   : > { %v2729_v41 = vmul.f32 0.9, %v2672_v54  ;;  %v2488_v54 = vpop.permute.xlu1 %2487 }
 0x268   : > { %v7557_v52 = vadd.f32 %v2761_v63, %v2729_v41  ;;  %v2565_v41 = vmul.f32 %v2488_v54, %v2083_v2 }
 0x26a   : > { %v2817_v11 = vpack.c.bf16 %v7557_v52, %v7555_v31 }
 0x26b   : > { %v2674_v13 = vpop.f32.mrf.mxu1 }
 0x26c   : > { %2933 = vmatmul.bf16.gmra.mxu2 %v2817_v11  ;;  %v2675_v44 = vadd.f32 %v2674_v13, %v2561_v43  ;;  %v2085_v49 = vpop.f32.mrf.mxu0 }
 0x26d   : > { %v2566_v27 = vmul.f32 %v2493_v59, %v2085_v49  ;;  %v3016_v59 = vmul.f32 0.30685282, %v7477_v22 }
 0x26e   : > { %v2730_v42 = vmul.f32 0.9, %v2675_v44 }
 0x270   : > { %v7563_v1 = vadd.f32 %v2762_v37, %v2730_v42 }
 0x273   : > { %v2676_v33 = vpop.f32.mrf.mxu1 }
 0x274   : > { %v2677_v36 = vadd.f32 %v2676_v33, %v2562_v58  ;;  %v2088_v3 = vpop.f32.mrf.mxu0  ;;  %v2766_v33 = vmul.f32 0.1, %v2083_v2 }
 0x276   : > { %v2731_v35 = vmul.f32 0.9, %v2677_v36  ;;  %v3013_v36 = vmul.f32 0.30685282, %v7456_v30 }
 0x278   : > { %v7565_v23 = vadd.f32 %v2763_v40, %v2731_v35  ;;  %v2767_v40 = vmul.f32 0.1, %v2085_v49 }
 0x27a   : > { %v2818_v45 = vpack.c.bf16 %v7565_v23, %v7563_v1 }
 0x27b   : > { %v2679_v9 = vpop.f32.mrf.mxu1 }
 0x27c   : > { %2938 = vmatmul.bf16.gmra.mxu2 %v2818_v45  ;;  %v2680_v20 = vadd.f32 %v2679_v9, %v2563_v47  ;;  %v2090_v13 = vpop.f32.mrf.mxu0 }
 0x27e   : > { %v2732_v7 = vmul.f32 0.9, %v2680_v20 }
 0x27f   : > { %v2899_v28 = vpop.f32.mrf.mxu2 }
 0x280   : > { %v2979_v6 = vmul.f32 0.6931472, %v2899_v28  ;;  %v7575_v50 = vadd.f32 %v2764_v60, %v2732_v7 }
 0x282   : > { %v3043_v4 = vadd.f32 %v3011_v5, %v2979_v6 }
 0x283   : > { %v2681_v32 = vpop.f32.mrf.mxu1 }
 0x284   : > { %v2682_v38 = vadd.f32 %v2681_v32, %v2564_v29  ;;  %v3079_v15 = vadd.f32 %v7573_v8, %v3043_v4  ;;  %v2093_v29 = vpop.f32.mrf.mxu0  ;;  %v2498_v32 = vpop.permute.xlu0 %2497 }
 0x286   : > { %v2733_v25 = vmul.f32 0.9, %v2682_v38  ;;  %v3111_v55 = vmax.f32 %v3079_v15, 0.0 }
 0x287   : > { %v2901_v39 = vpop.f32.mrf.mxu2 }
 0x288   : > { %v7577_v24 = vadd.f32 %v2765_v16, %v2733_v25  ;;  %v2980_v14 = vmul.f32 0.6931472, %v2901_v39  ;;  %v2567_v16 = vmul.f32 %v2498_v32, %v2088_v3  ;;  %v2503_v39 = vpop.permute.xlu1 %2502 }
 0x289   : > { %v2568_v26 = vmul.f32 %v2503_v39, %v2090_v13  ;;  %v3018_v39 = vmul.f32 0.30685282, %v7494_v17 }
 0x28a   : > { %v3044_v12 = vadd.f32 %v3012_v34, %v2980_v14  ;;  %v2819_v56 = vpack.c.bf16 %v7577_v24, %v7575_v50  ;;  %v2768_v34 = vmul.f32 0.1, %v2088_v3 }
 0x28b   : > { %v2684_v63 = vpop.f32.mrf.mxu1 }
 0x28c   : > { %v3080_v48 = vadd.f32 %v7573_v8, %v3044_v12  ;;  %2943 = vmatmul.bf16.gmra.mxu2 %v2819_v56  ;;  %v2685_v44 = vadd.f32 %v2684_v63, %v2565_v41  ;;  %v2095_v15 = vpop.f32.mrf.mxu0  ;;  %v2769_v56 = vmul.f32 0.1, %v2090_v13 }
 0x28e   : > { %v3112_v11 = vmax.f32 %v3080_v48, 0.0  ;;  %v2734_v42 = vmul.f32 0.9, %v2685_v44  ;;  %v3015_v48 = vmul.f32 0.30685282, %v7475_v10 }
 0x28f   : > { %v2904_v51 = vpop.f32.mrf.mxu2 }
 0x290   : > { %v3143_v43 = vpack.c.bf16 %v3112_v11, %v3111_v55  ;;  %v2981_v58 = vmul.f32 0.6931472, %v2904_v51  ;;  %v7585_v47 = vadd.f32 %v2766_v33, %v2734_v42  ;;  %v2508_v33 = vpop.permute.xlu2 %2507 }
 0x292   : > { %3235 = vmatmul.bf16.vlgmr.msra.gmra.mxu3 %v3143_v43  ;;  %v3045_v45 = vadd.f32 %v3013_v36, %v2981_v58 }
 0x293   : > { %v2686_v37 = vpop.f32.mrf.mxu1 }
 0x294   : > { %v2687_v35 = vadd.f32 %v2686_v37, %v2566_v27  ;;  %v3081_v6 = vadd.f32 %v7573_v8, %v3045_v45  ;;  %v2098_v37 = vpop.f32.mrf.mxu0 }
 0x296   : > { %v2735_v9 = vmul.f32 0.9, %v2687_v35  ;;  %v3113_v7 = vmax.f32 %v3081_v6, 0.0 }
 0x297   : > { %v2906_v62 = vpop.f32.mrf.mxu2 }
 0x298   : > { %v7587_v28 = vadd.f32 %v2767_v40, %v2735_v9  ;;  %v2982_v20 = vmul.f32 0.6931472, %v2906_v62  ;;  %v2569_v40 = vmul.f32 %v2508_v33, %v2093_v29  ;;  %v2513_v62 = vpop.permute.xlu0 %2512 }
 0x299   : > { %v2570_v22 = vmul.f32 %v2513_v62, %v2095_v15 }
 0x29a   : > { %v3046_v2 = vadd.f32 %v3014_v53, %v2982_v20  ;;  %v2820_v49 = vpack.c.bf16 %v7587_v28, %v7585_v47  ;;  %v2770_v53 = vmul.f32 0.1, %v2093_v29 }
 0x29b   : > { %v2689_v60 = vpop.f32.mrf.mxu1 }
 0x29c   : > { %v3082_v30 = vadd.f32 %v7573_v8, %v3046_v2  ;;  %2948 = vmatmul.bf16.gmra.mxu2 %v2820_v49  ;;  %v2690_v4 = vadd.f32 %v2689_v60, %v2567_v16  ;;  %v2771_v2 = vmul.f32 0.1, %v2095_v15  ;;  %v3017_v60 = vmul.f32 0.30685282, %v7492_v21  ;;  %v2518_v15 = vpop.permute.xlu1 %2517 }
 0x29e   : > { %v3114_v5 = vmax.f32 %v3082_v30, 0.0  ;;  %v2736_v63 = vmul.f32 0.9, %v2690_v4 }
 0x29f   : > { %v2909_v38 = vpop.f32.mrf.mxu2 }
 0x2a0   : > { %v3144_v25 = vpack.c.bf16 %v3114_v5, %v3113_v7  ;;  %v2983_v14 = vmul.f32 0.6931472, %v2909_v38  ;;  %v7595_v51 = vadd.f32 %v2768_v34, %v2736_v63  ;;  %v2100_v7 = vpop.f32.mrf.mxu0 }
 0x2a2   : > { %3240 = vmatmul.bf16.gmra.mxu3 %v3144_v25  ;;  %v3047_v41 = vadd.f32 %v3015_v48, %v2983_v14 }
 0x2a3   : > { %v2691_v12 = vpop.f32.mrf.mxu1 }
 0x2a4   : > { %v2692_v54 = vadd.f32 %v2691_v12, %v2568_v26  ;;  %v3083_v27 = vadd.f32 %v7573_v8, %v3047_v41  ;;  %v2571_v12 = vmul.f32 %v2518_v15, %v2098_v37 }
 0x2a6   : > { %v2737_v55 = vmul.f32 0.9, %v2692_v54  ;;  %v3115_v42 = vmax.f32 %v3083_v27, 0.0 }
 0x2a7   : > { %v2911_v11 = vpop.f32.mrf.mxu2 }
 0x2a8   : > { %v7597_v43 = vadd.f32 %v2769_v56, %v2737_v55  ;;  %v2984_v44 = vmul.f32 0.6931472, %v2911_v11  ;;  %v2523_v55 = vpop.permute.xlu2 %2522  ;;  %v2103_v11 = vpop.f32.mrf.mxu0 }
 0x2a9   : > { %v2572_v17 = vmul.f32 %v2523_v55, %v2100_v7 }
 0x2aa   : > { %v3048_v3 = vadd.f32 %v3016_v59, %v2984_v44  ;;  %v2821_v13 = vpack.c.bf16 %v7597_v43, %v7595_v51  ;;  %v2772_v59 = vmul.f32 0.1, %v2098_v37 }
 0x2ab   : > { %v2694_v58 = vpop.f32.mrf.mxu1 }
 0x2ac   : > { %v3084_v10 = vadd.f32 %v7573_v8, %v3048_v3  ;;  %2953 = vmatmul.bf16.gmra.mxu2 %v2821_v13  ;;  %v2695_v45 = vadd.f32 %v2694_v58, %v2569_v40  ;;  %v2773_v3 = vmul.f32 0.1, %v2100_v7  ;;  %v3019_v58 = vmul.f32 0.30685282, %v7511_v0  ;;  %v2533_v7 = vpop.permute.xlu1 %2532 }
 0x2ae   : > { %v3116_v36 = vmax.f32 %v3084_v10, 0.0  ;;  %v2738_v49 = vmul.f32 0.9, %v2695_v45 }
 0x2af   : > { %v2914_v35 = vpop.f32.mrf.mxu2 }
 0x2b0   : > { %v3145_v9 = vpack.c.bf16 %v3116_v36, %v3115_v42  ;;  %v2985_v20 = vmul.f32 0.6931472, %v2914_v35  ;;  %v7605_v38 = vadd.f32 %v2770_v53, %v2738_v49 }
 0x2b2   : > { %3245 = vmatmul.bf16.gmra.mxu3 %v3145_v9  ;;  %v3049_v32 = vadd.f32 %v3017_v60, %v2985_v20  ;;  %v3020_v9 = vmul.f32 0.30685282, %v7513_v46  ;;  %v2105_v20 = vpop.f32.mrf.mxu0 }
 0x2b3   : > { %v2696_v6 = vpop.f32.mrf.mxu1  ;;  %v2574_v46 = vmul.f32 %v2533_v7, %v2105_v20 }
 0x2b4   : > { %v2697_v30 = vadd.f32 %v2696_v6, %v2570_v22  ;;  %v3085_v26 = vadd.f32 %v7573_v8, %v3049_v32  ;;  %v2528_v6 = vpop.permute.xlu0 %2527 }
 0x2b6   : > { %v2739_v16 = vmul.f32 0.9, %v2697_v30  ;;  %v3117_v56 = vmax.f32 %v3085_v26, 0.0  ;;  %v2775_v26 = vmul.f32 0.1, %v2105_v20 }
 0x2b7   : > { %v2916_v5 = vpop.f32.mrf.mxu2  ;;  %v3023_v20 = vmul.f32 0.30685282, %v7544_v19 }
 0x2b8   : > { %v7607_v4 = vadd.f32 %v2771_v2, %v2739_v16  ;;  %v2986_v25 = vmul.f32 0.6931472, %v2916_v5  ;;  %v2573_v2 = vmul.f32 %v2528_v6, %v2103_v11 }
 0x2ba   : > { %v3050_v29 = vadd.f32 %v3018_v39, %v2986_v25  ;;  %v2822_v14 = vpack.c.bf16 %v7607_v4, %v7605_v38  ;;  %v2774_v25 = vmul.f32 0.1, %v2103_v11 }
 0x2bb   : > { %v2699_v34 = vpop.f32.mrf.mxu1 }
 0x2bc   : > { %v3086_v21 = vadd.f32 %v7573_v8, %v3050_v29  ;;  %2958 = vmatmul.bf16.gmra.mxu2 %v2822_v14  ;;  %v2700_v54 = vadd.f32 %v2699_v34, %v2571_v12  ;;  %v3021_v14 = vmul.f32 0.30685282, %v7528_v57 }
 0x2be   : > { %v3118_v63 = vmax.f32 %v3086_v21, 0.0  ;;  %v2740_v13 = vmul.f32 0.9, %v2700_v54  ;;  %v2108_v21 = vpop.f32.mrf.mxu0 }
 0x2bf   : > { %v2919_v48 = vpop.f32.mrf.mxu2 }
 0x2c0   : > { %v3146_v41 = vpack.c.bf16 %v3118_v63, %v3117_v56  ;;  %v2987_v44 = vmul.f32 0.6931472, %v2919_v48  ;;  %v7615_v36 = vadd.f32 %v2772_v59, %v2740_v13  ;;  %v2538_v59 = vpop.permute.xlu2 %2537 }
 0x2c2   : > { %3250 = vmatmul.bf16.gmra.mxu3 %v3146_v41  ;;  %v3051_v33 = vadd.f32 %v3019_v58, %v2987_v44  ;;  %v3022_v41 = vmul.f32 0.30685282, %v7530_v18 }
 0x2c3   : > { %v2701_v27 = vpop.f32.mrf.mxu1 }
 0x2c4   : > { %v2702_v10 = vadd.f32 %v2701_v27, %v2572_v17  ;;  %v3087_v62 = vadd.f32 %v7573_v8, %v3051_v33  ;;  %v2575_v27 = vmul.f32 %v2538_v59, %v2108_v21 }
 0x2c6   : > { %v2741_v40 = vmul.f32 0.9, %v2702_v10  ;;  %v3119_v49 = vmax.f32 %v3087_v62, 0.0  ;;  %v2110_v58 = vpop.f32.mrf.mxu0 }
 0x2c7   : > { %v2921_v42 = vpop.f32.mrf.mxu2 }
 0x2c8   : > { %v7617_v35 = vadd.f32 %v2773_v3, %v2741_v40  ;;  %v2988_v45 = vmul.f32 0.6931472, %v2921_v42  ;;  %v2543_v42 = vpop.permute.xlu0 %2542 }
 0x2c9   : > { %v2576_v18 = vmul.f32 %v2543_v42, %v2110_v58 }
 0x2ca   : > { %v3052_v22 = vadd.f32 %v3020_v9, %v2988_v45  ;;  %v2823_v37 = vpack.c.bf16 %v7617_v35, %v7615_v36  ;;  %v2776_v9 = vmul.f32 0.1, %v2108_v21 }
 0x2cb   : > { %v2704_v53 = vpop.f32.mrf.mxu1 }
 0x2cc   : > { %v3088_v0 = vadd.f32 %v7573_v8, %v3052_v22  ;;  %2963 = vmatmul.bf16.gmra.mxu2 %v2823_v37  ;;  %v2705_v32 = vadd.f32 %v2704_v53, %v2573_v2  ;;  %v2777_v22 = vmul.f32 0.1, %v2110_v58 }
 0x2ce   : > { %v3120_v60 = vmax.f32 %v3088_v0, 0.0  ;;  %v2742_v29 = vmul.f32 0.9, %v2705_v32  ;;  %v3024_v32 = vmul.f32 0.30685282, %v7546_v61 }
 0x2cf   : > { %v2924_v30 = vpop.f32.mrf.mxu2 }
 0x2d0   : > { %v3147_v16 = vpack.c.bf16 %v3120_v60, %v3119_v49  ;;  %v2989_v5 = vmul.f32 0.6931472, %v2924_v30  ;;  %v7625_v63 = vadd.f32 %v2774_v25, %v2742_v29 }
 0x2d2   : > { %3255 = vmatmul.bf16.gmra.mxu3 %v3147_v16  ;;  %v3053_v15 = vadd.f32 %v3021_v14, %v2989_v5  ;;  %v3025_v14 = vmul.f32 0.30685282, %v7555_v31 }
 0x2d3   : > { %v2706_v39 = vpop.f32.mrf.mxu1 }
 0x2d4   : > { %v2707_v34 = vadd.f32 %v2706_v39, %v2574_v46  ;;  %v3089_v55 = vadd.f32 %v7573_v8, %v3053_v15  ;;  %v3026_v15 = vmul.f32 0.30685282, %v7557_v52 }
 0x2d6   : > { %v2743_v12 = vmul.f32 0.9, %v2707_v34  ;;  %v3121_v3 = vmax.f32 %v3089_v55, 0.0 }
 0x2d7   : > { %v2926_v56 = vpop.f32.mrf.mxu2 }
 0x2d8   : > { %v7627_v48 = vadd.f32 %v2775_v26, %v2743_v12  ;;  %v2990_v54 = vmul.f32 0.6931472, %v2926_v56 }
 0x2da   : > { %v3054_v11 = vadd.f32 %v3022_v41, %v2990_v54  ;;  %v2824_v17 = vpack.c.bf16 %v7627_v48, %v7625_v63 }
 0x2db   : > { %v2709_v44 = vpop.f32.mrf.mxu1 }
 0x2dc   : > { %v3090_v57 = vadd.f32 %v7573_v8, %v3054_v11  ;;  %2968 = vmatmul.bf16.gmra.mxu2 %v2824_v17  ;;  %v2710_v33 = vadd.f32 %v2709_v44, %v2575_v27 }
 0x2de   : > { %v3122_v13 = vmax.f32 %v3090_v57, 0.0  ;;  %v2744_v37 = vmul.f32 0.9, %v2710_v33  ;;  %v3027_v57 = vmul.f32 0.30685282, %v7563_v1 }
 0x2df   : > { %v2929_v10 = vpop.f32.mrf.mxu2  ;;  %v7655_v1 = vld [vmem:[%s8813_s8] ss:$0 sm:$0xff] }
 0x2e0   : > { %v3148_v40 = vpack.c.bf16 %v3122_v13, %v3121_v3  ;;  %v2991_v45 = vmul.f32 0.6931472, %v2929_v10  ;;  %v7635_v49 = vadd.f32 %v2776_v9, %v2744_v37  ;;  %v3028_v3 = vmul.f32 0.30685282, %v7565_v23 }
 0x2e2   : > { %3260 = vmatmul.bf16.gmra.mxu3 %v3148_v40  ;;  %v3055_v0 = vadd.f32 %v3023_v20, %v2991_v45  ;;  %v3029_v45 = vmul.f32 0.30685282, %v7575_v50  ;;  %v3030_v20 = vmul.f32 0.30685282, %v7577_v24  ;;  %v3031_v24 = vmul.f32 0.30685282, %v7585_v47 }
 0x2e3   : > { %v2711_v62 = vpop.f32.mrf.mxu1 }
 0x2e4   : > { %v2712_v53 = vadd.f32 %v2711_v62, %v2576_v18  ;;  %v3091_v16 = vadd.f32 %v7573_v8, %v3055_v0 }
 0x2e6   : > { %v2745_v6 = vmul.f32 0.9, %v2712_v53  ;;  %v3123_v19 = vmax.f32 %v3091_v16, 0.0 }
 0x2e7   : > { %v2931_v2 = vpop.f32.mrf.mxu2 }
 0x2e8   : > { %v7637_v60 = vadd.f32 %v2777_v22, %v2745_v6  ;;  %v2992_v30 = vmul.f32 0.6931472, %v2931_v2 }
 0x2ea   : > { %v3056_v7 = vadd.f32 %v3024_v32, %v2992_v30  ;;  %v2825_v46 = vpack.c.bf16 %v7637_v60, %v7635_v49 }
 0x2ec   : > { %v3092_v5 = vadd.f32 %v7573_v8, %v3056_v7  ;;  %2973 = vmatmul.bf16.gmra.mxu2 %v2825_v46 }
 0x2ee   : > { %v3124_v25 = vmax.f32 %v3092_v5, 0.0 }
 0x2ef   : > { %v2934_v39 = vpop.f32.mrf.mxu2 }
 0x2f0   : > { %v3149_v26 = vpack.c.bf16 %v3124_v25, %v3123_v19  ;;  %v2993_v29 = vmul.f32 0.6931472, %v2934_v39 }
 0x2f2   : > { %3265 = vmatmul.bf16.gmra.mxu3 %v3149_v26  ;;  %v3057_v34 = vadd.f32 %v3025_v14, %v2993_v29  ;;  %v3032_v29 = vmul.f32 0.30685282, %v7587_v28  ;;  %v3033_v28 = vmul.f32 0.30685282, %v7595_v51 }
 0x2f4   : > { %v3093_v12 = vadd.f32 %v7573_v8, %v3057_v34 }
 0x2f6   : > { %v3125_v41 = vmax.f32 %v3093_v12, 0.0 }
 0x2f7   : > { %v2936_v21 = vpop.f32.mrf.mxu2 }
 0x2f8   : > { %v2994_v61 = vmul.f32 0.6931472, %v2936_v21 }
 0x2fa   : > { %v3058_v56 = vadd.f32 %v3026_v15, %v2994_v61 }
 0x2fc   : > { %v3094_v54 = vadd.f32 %v7573_v8, %v3058_v56 }
 0x2fe   : > { %v3126_v55 = vmax.f32 %v3094_v54, 0.0 }
 0x2ff   : > { %v2939_v11 = vpop.f32.mrf.mxu2 }
 0x300   : > { %v3150_v17 = vpack.c.bf16 %v3126_v55, %v3125_v41  ;;  %v2995_v44 = vmul.f32 0.6931472, %v2939_v11 }
 0x302   : > { %3270 = vmatmul.bf16.gmra.mxu3 %v3150_v17  ;;  %v3059_v59 = vadd.f32 %v3027_v57, %v2995_v44 }
 0x304   : > { %v3095_v52 = vadd.f32 %v7573_v8, %v3059_v59  ;;  %v3034_v59 = vmul.f32 0.30685282, %v7597_v43  ;;  %v3035_v43 = vmul.f32 0.30685282, %v7605_v38 }
 0x306   : > { %v3127_v10 = vmax.f32 %v3095_v52, 0.0 }
 0x307   : > { %v2941_v31 = vpop.f32.mrf.mxu2 }
 0x308   : > { %v2996_v27 = vmul.f32 0.6931472, %v2941_v31 }
 0x30a   : > { %v3060_v13 = vadd.f32 %v3028_v3, %v2996_v27 }
 0x30c   : > { %v3096_v58 = vadd.f32 %v7573_v8, %v3060_v13 }
 0x30e   : > { %v3128_v33 = vmax.f32 %v3096_v58, 0.0 }
 0x30f   : > { %v2944_v40 = vpop.f32.mrf.mxu2 }
 0x310   : > { %v3151_v42 = vpack.c.bf16 %v3128_v33, %v3127_v10  ;;  %v2997_v18 = vmul.f32 0.6931472, %v2944_v40 }
 0x312   : > { %3275 = vmatmul.bf16.gmra.mxu3 %v3151_v42  ;;  %v3061_v23 = vadd.f32 %v3029_v45, %v2997_v18 }
 0x314   : > { %v3097_v53 = vadd.f32 %v7573_v8, %v3061_v23 }
 0x315   : > { %v3236_v9 = vpop.f32.mrf.mxu3 }
 0x316   : > { %v7659_v62 = vadd.f32 %v7655_v1, %v3236_v9  ;;  %v3129_v30 = vmax.f32 %v3097_v53, 0.0 }
 0x317   : > { %v2946_v22 = vpop.f32.mrf.mxu2 }
 0x318   : > { %v2998_v37 = vmul.f32 0.6931472, %v2946_v22  ;;  %3318 = vadd.xlane.f32.xlu1 %v7659_v62  ;;  %v3036_v22 = vmul.f32 0.30685282, %v7607_v4  ;;  %v3038_v4 = vmul.f32 0.30685282, %v7617_v35 }
 0x31a   : > { %v3062_v0 = vadd.f32 %v3030_v20, %v2998_v37 }
 0x31c   : > { %v3098_v6 = vadd.f32 %v7573_v8, %v3062_v0 }
 0x31d   : > { %v3238_v2 = vpop.f32.mrf.mxu3 }
 0x31e   : > { %v3130_v32 = vmax.f32 %v3098_v6, 0.0  ;;  %v7666_v50 = vadd.f32 %v7655_v1, %v3238_v2 }
 0x31f   : > { %v2949_v16 = vpop.f32.mrf.mxu2 }
 0x320   : > { %3320 = vadd.xlane.f32.xlu2 %v7666_v50  ;;  %v3152_v7 = vpack.c.bf16 %v3130_v32, %v3129_v30  ;;  %v2999_v46 = vmul.f32 0.6931472, %v2949_v16  ;;  %v3037_v32 = vmul.f32 0.30685282, %v7615_v36 }
 0x322   : > { %3280 = vmatmul.bf16.gmra.mxu3 %v3152_v7  ;;  %v3063_v19 = vadd.f32 %v3031_v24, %v2999_v46 }
 0x324   : > { %v3099_v14 = vadd.f32 %v7573_v8, %v3063_v19 }
 0x325   : > { %v3241_v5 = vpop.f32.mrf.mxu3 }
 0x326   : > { %v7671_v25 = vadd.f32 %v7655_v1, %v3241_v5  ;;  %v3131_v15 = vmax.f32 %v3099_v14, 0.0 }
 0x327   : > { %v2951_v39 = vpop.f32.mrf.mxu2 }
 0x328   : > { %v3000_v26 = vmul.f32 0.6931472, %v2951_v39  ;;  %3322 = vadd.xlane.f32.xlu0 %v7671_v25 }
 0x32a   : > { %v3064_v34 = vadd.f32 %v3032_v29, %v3000_v26 }
 0x32c   : > { %v3100_v21 = vadd.f32 %v7573_v8, %v3064_v34 }
 0x32d   : > { %v3243_v61 = vpop.f32.mrf.mxu3 }
 0x32e   : > { %v3132_v12 = vmax.f32 %v3100_v21, 0.0  ;;  %v7678_v47 = vadd.f32 %v7655_v1, %v3243_v61  ;;  %v3039_v21 = vmul.f32 0.30685282, %v7625_v63  ;;  %v3041_v63 = vmul.f32 0.30685282, %v7635_v49 }
 0x32f   : > { %v2954_v56 = vpop.f32.mrf.mxu2 }
 0x330   : > { %3324 = vadd.xlane.f32.xlu2 %v7678_v47  ;;  %v3153_v54 = vpack.c.bf16 %v3132_v12, %v3131_v15  ;;  %v3001_v41 = vmul.f32 0.6931472, %v2954_v56  ;;  %v3040_v12 = vmul.f32 0.30685282, %v7627_v48  ;;  %v3042_v48 = vmul.f32 0.30685282, %v7637_v60 }
 0x332   : > { %3285 = vmatmul.bf16.gmra.mxu3 %v3153_v54  ;;  %v3065_v11 = vadd.f32 %v3033_v28, %v3001_v41 }
 0x334   : > { %v3101_v31 = vadd.f32 %v7573_v8, %v3065_v11 }
 0x335   : > { %v3246_v55 = vpop.f32.mrf.mxu3 }
 0x336   : > { %v7683_v17 = vadd.f32 %v7655_v1, %v3246_v55  ;;  %v3133_v13 = vmax.f32 %v3101_v31, 0.0 }
 0x337   : > { %v2956_v44 = vpop.f32.mrf.mxu2 }
 0x338   : > { %v3002_v57 = vmul.f32 0.6931472, %v2956_v44  ;;  %3326 = vadd.xlane.f32.xlu1 %v7683_v17  ;;  %v6563_v44 = vmov 128.0  }
 0x339   : > { %6241 = vrcp.f32 %v6563_v44 }
 0x33a   : > { %v3066_v27 = vadd.f32 %v3034_v59, %v3002_v57 }
 0x33c   : > { %v3102_v3 = vadd.f32 %v7573_v8, %v3066_v27 }
 0x33d   : > { %v3248_v52 = vpop.f32.mrf.mxu3 }
 0x33e   : > { %v3134_v58 = vmax.f32 %v3102_v3, 0.0  ;;  %v7690_v51 = vadd.f32 %v7655_v1, %v3248_v52 }
 0x33f   : > { %v2959_v10 = vpop.f32.mrf.mxu2  ;;  %v6242_v59 = vpop.eup %6241 }
 0x340   : > { %3328 = vadd.xlane.f32.xlu2 %v7690_v51  ;;  %v3154_v33 = vpack.c.bf16 %v3134_v58, %v3133_v13  ;;  %v3003_v40 = vmul.f32 0.6931472, %v2959_v10  ;;  %v3383_v52 = vmul.f32 128.0, %v6242_v59  ;;  %vm3387_vm2 = vweird.f32 %v6242_v59 }
 0x342   : > { %3290 = vmatmul.bf16.gmra.mxu3 %v3154_v33  ;;  %v3067_v18 = vadd.f32 %v3035_v43, %v3003_v40  ;;  %v3384_v33 = vsub.f32 1.0, %v3383_v52  ;;  %v6105_v52 = vld [vmem:[#allocation6 + $0x8] sm:$0xff] }
 0x344   : > { %v3103_v37 = vadd.f32 %v7573_v8, %v3067_v18  ;;  %v3385_v18 = vmul.f32 %v6242_v59, %v3384_v33 }
 0x345   : > { %v3251_v42 = vpop.f32.mrf.mxu3 }
 0x346   : > { %v7695_v45 = vadd.f32 %v7655_v1, %v3251_v42  ;;  %v3135_v0 = vmax.f32 %v3103_v37, 0.0  ;;  %v3386_v49 = vadd.f32 %v6242_v59, %v3385_v18 }
 0x347   : > { %v2961_v9 = vpop.f32.mrf.mxu2 }
 0x348   : > { %v3004_v23 = vmul.f32 0.6931472, %v2961_v9  ;;  %3330 = vadd.xlane.f32.xlu2 %v7695_v45 }
 0x34a   : > { %v3068_v20 = vadd.f32 %v3036_v22, %v3004_v23  ;;  %v7713_v23 = vsel %vm3387_vm2, %v6242_v59, %v3386_v49  ;;  %v6108_v59 = vld [vmem:[#allocation6 + $0x20] sm:$0xff] }
 0x34c   : > { %v3104_v53 = vadd.f32 %v7573_v8, %v3068_v20 }
 0x34d   : > { %v3253_v9 = vpop.f32.mrf.mxu3 }
 0x34e   : > { %v3136_v6 = vmax.f32 %v3104_v53, 0.0 }
 0x34f   : > { %v2964_v2 = vpop.f32.mrf.mxu2 }
 0x350   : > { %v3155_v38 = vpack.c.bf16 %v3136_v6, %v3135_v0  ;;  %v3005_v30 = vmul.f32 0.6931472, %v2964_v2 }
 0x352   : > { %3295 = vmatmul.bf16.gmra.mxu3 %v3155_v38  ;;  %v3069_v16 = vadd.f32 %v3037_v32, %v3005_v30  ;;  %v7728_v38 = vadd.f32 %v7655_v1, %v3253_v9 }
 0x354   : > { %v3105_v24 = vadd.f32 %v7573_v8, %v3069_v16 }
 0x355   : > { %v3256_v20 = vpop.f32.mrf.mxu3 }
 0x356   : > { %v3137_v39 = vmax.f32 %v3105_v24, 0.0 }
 0x357   : > { %v2966_v7 = vpop.f32.mrf.mxu2 }
 0x358   : > { %v3006_v46 = vmul.f32 0.6931472, %v2966_v7  ;;  %v6111_v7 = vld [vmem:[#allocation6 + $0x38] sm:$0xff] }
 0x359   : > { %4151 = vmatpush.bf16.msra.mxu0 %v6111_v7 }
 0x35a   : > { %v3070_v5 = vadd.f32 %v3038_v4, %v3006_v46 }
 0x35c   : > { %v3106_v19 = vadd.f32 %v7573_v8, %v3070_v5 }
 0x35e   : > { %v3138_v26 = vmax.f32 %v3106_v19, 0.0 }
 0x35f   : > { %v2969_v29 = vpop.f32.mrf.mxu2 }
 0x360   : > { %v3156_v14 = vpack.c.bf16 %v3138_v26, %v3137_v39  ;;  %v3007_v34 = vmul.f32 0.6931472, %v2969_v29 }
 0x362   : > { %3300 = vmatmul.bf16.gmra.mxu3 %v3156_v14  ;;  %v3071_v61 = vadd.f32 %v3039_v21, %v3007_v34 }
 0x364   : > { %v3107_v35 = vadd.f32 %v7573_v8, %v3071_v61 }
 0x366   : > { %v3139_v41 = vmax.f32 %v3107_v35, 0.0 }
 0x367   : > { %v2971_v36 = vpop.f32.mrf.mxu2 }
 0x368   : > { %v3008_v15 = vmul.f32 0.6931472, %v2971_v36 }
 0x36a   : > { %v3072_v56 = vadd.f32 %v3040_v12, %v3008_v15 }
 0x36c   : > { %v3108_v54 = vadd.f32 %v7573_v8, %v3072_v56 }
 0x36e   : > { %v3140_v28 = vmax.f32 %v3108_v54, 0.0 }
 0x36f   : > { %v2974_v55 = vpop.f32.mrf.mxu2 }
 0x370   : > { %v3157_v11 = vpack.c.bf16 %v3140_v28, %v3139_v41  ;;  %v3009_v57 = vmul.f32 0.6931472, %v2974_v55  ;;  %v6110_v28 = vld [vmem:[#allocation6 + $0x30] sm:$0xff] }
 0x371   : > { %4152 = vmatpush.bf16.msra.mxu0 %v6110_v28 }
 0x372   : > { %3305 = vmatmul.bf16.gmra.mxu3 %v3157_v11  ;;  %v3073_v31 = vadd.f32 %v3041_v63, %v3009_v57  ;;  %v6109_v63 = vld [vmem:[#allocation6 + $0x28] sm:$0xff] }
 0x374   : > { %v3109_v13 = vadd.f32 %v7573_v8, %v3073_v31  ;;  %v6107_v31 = vld [vmem:[#allocation6 + $0x18] sm:$0xff] }
 0x375   : > { %4153 = vmatpush.bf16.msra.mxu0 %v6109_v63 }
 0x376   : > { %v3141_v40 = vmax.f32 %v3109_v13, 0.0 }
 0x377   : > { %v2976_v27 = vpop.f32.mrf.mxu2 }
 0x378   : > { %v3010_v3 = vmul.f32 0.6931472, %v2976_v27  ;;  %v6106_v27 = vld [vmem:[#allocation6 + $0x10] sm:$0xff] }
 0x379   : > { %4154 = vmatpush.bf16.msra.mxu0 %v6108_v59 }
 0x37a   : > { %v3074_v58 = vadd.f32 %v3042_v48, %v3010_v3 }
 0x37c   : > { %v3110_v10 = vadd.f32 %v7573_v8, %v3074_v58  ;;  %v6104_v58 = vld [vmem:[#allocation6] sm:$0xff] }
 0x37d   : > { %4155 = vmatpush.bf16.msra.mxu0 %v6107_v31 }
 0x37e   : > { %v3142_v43 = vmax.f32 %v3110_v10, 0.0 }
 0x380   : > { %v3158_v42 = vpack.c.bf16 %v3142_v43, %v3141_v40 }
 0x381   : > { %4156 = vmatpush.bf16.msra.mxu0 %v6106_v27 }
 0x382   : > { %3310 = vmatmul.bf16.gmra.mxu3 %v3158_v42 }
 0x385   : > { %4157 = vmatpush.bf16.msra.mxu0 %v6105_v52 }
 0x389   : > { %4158 = vmatpush.bf16.msra.mxu0 %v6104_v58 }
 0x38b   : > { %v3319_v22 = vpop.xlane.xlu1 %3318 }
 0x38c   : > { %v3389_v60 = vmul.f32 %v7713_v23, %v3319_v22 }
 0x38e   : > { %v7717_v37 = vsub.f32 %v7659_v62, %v3389_v60  ;;  %v3258_v62 = vpop.f32.mrf.mxu3 }
 0x390   : > { %v3453_v8 = vmul.f32 %v7717_v37, %v7717_v37 }
 0x392   : > { %3485 = vadd.xlane.f32.xlu0 %v3453_v8 }
 0x393   : > { %v3321_v53 = vpop.xlane.xlu2 %3320 }
 0x394   : > { %v3390_v0 = vmul.f32 %v7713_v23, %v3321_v53 }
 0x396   : > { %v7723_v6 = vsub.f32 %v7666_v50, %v3390_v0  ;;  %v7736_v50 = vadd.f32 %v7655_v1, %v3256_v20  ;;  %v3261_v5 = vpop.f32.mrf.mxu3 }
 0x397   : > { %v7756_v21 = vadd.f32 %v7655_v1, %v3261_v5 }
 0x398   : > { %v3454_v2 = vmul.f32 %v7723_v6, %v7723_v6 }
 0x39a   : > { %3487 = vadd.xlane.f32.xlu1 %v3454_v2  ;;  %3332 = vadd.xlane.f32.xlu0 %v7728_v38 }
 0x39b   : > { %v3323_v30 = vpop.xlane.xlu0 %3322 }
 0x39c   : > { %v3391_v32 = vmul.f32 %v7713_v23, %v3323_v30 }
 0x39e   : > { %v7733_v16 = vsub.f32 %v7671_v25, %v3391_v32  ;;  %v7746_v25 = vadd.f32 %v7655_v1, %v3258_v62  ;;  %v3263_v34 = vpop.f32.mrf.mxu3 }
 0x39f   : > { %v7766_v12 = vadd.f32 %v7655_v1, %v3263_v34 }
 0x3a0   : > { %v3455_v46 = vmul.f32 %v7733_v16, %v7733_v16 }
 0x3a2   : > { %3489 = vadd.xlane.f32.xlu1 %v3455_v46  ;;  %3334 = vadd.xlane.f32.xlu0 %v7736_v50 }
 0x3a3   : > { %v3325_v4 = vpop.xlane.xlu2 %3324 }
 0x3a4   : > { %v3392_v24 = vmul.f32 %v7713_v23, %v3325_v4 }
 0x3a6   : > { %v7743_v19 = vsub.f32 %v7678_v47, %v3392_v24  ;;  %v3266_v35 = vpop.f32.mrf.mxu3 }
 0x3a8   : > { %v3456_v39 = vmul.f32 %v7743_v19, %v7743_v19 }
 0x3aa   : > { %3491 = vadd.xlane.f32.xlu2 %v3456_v39  ;;  %3336 = vadd.xlane.f32.xlu1 %v7746_v25 }
 0x3ab   : > { %v3327_v26 = vpop.xlane.xlu1 %3326 }
 0x3ac   : > { %v3393_v29 = vmul.f32 %v7713_v23, %v3327_v26 }
 0x3ae   : > { %v7753_v14 = vsub.f32 %v7683_v17, %v3393_v29  ;;  %v3268_v11 = vpop.f32.mrf.mxu3 }
 0x3af   : > { %v7782_v44 = vadd.f32 %v7655_v1, %v3268_v11 }
 0x3b0   : > { %v3457_v47 = vmul.f32 %v7753_v14, %v7753_v14 }
 0x3b2   : > { %3493 = vadd.xlane.f32.xlu2 %v3457_v47  ;;  %3338 = vadd.xlane.f32.xlu1 %v7756_v21 }
 0x3b3   : > { %v3329_v61 = vpop.xlane.xlu2 %3328 }
 0x3b4   : > { %v3394_v36 = vmul.f32 %v7713_v23, %v3329_v61 }
 0x3b6   : > { %v7763_v15 = vsub.f32 %v7690_v51, %v3394_v36  ;;  %v7776_v51 = vadd.f32 %v7655_v1, %v3266_v35  ;;  %v3271_v57 = vpop.f32.mrf.mxu3 }
 0x3b8   : > { %v3458_v17 = vmul.f32 %v7763_v15, %v7763_v15 }
 0x3ba   : > { %3495 = vadd.xlane.f32.xlu0 %v3458_v17  ;;  %3340 = vadd.xlane.f32.xlu2 %v7766_v12 }
 0x3bb   : > { %v3331_v56 = vpop.xlane.xlu2 %3330 }
 0x3bc   : > { %v3395_v54 = vmul.f32 %v7713_v23, %v3331_v56 }
 0x3be   : > { %v7773_v41 = vsub.f32 %v7695_v45, %v3395_v54  ;;  %v7786_v45 = vadd.f32 %v7655_v1, %v3271_v57  ;;  %v3273_v18 = vpop.f32.mrf.mxu3 }
 0x3bf   : > { %v7816_v57 = vadd.f32 %v7655_v1, %v3273_v18 }
 0x3c0   : > { %v3459_v55 = vmul.f32 %v7773_v41, %v7773_v41 }
 0x3c2   : > { %3497 = vadd.xlane.f32.xlu0 %v3459_v55  ;;  %3342 = vadd.xlane.f32.xlu2 %v7776_v51 }
 0x3c6   : > { %v3276_v24 = vpop.f32.mrf.mxu3 }
 0x3ca   : > { %3344 = vadd.xlane.f32.xlu0 %v7782_v44 }
 0x3ce   : > { %v3278_v27 = vpop.f32.mrf.mxu3 }
 0x3d2   : > { %3346 = vadd.xlane.f32.xlu0 %v7786_v45 }
 0x405   : > { %v3486_v3 = vpop.xlane.xlu0 %3485 }
 0x406   : > { %v3549_v48 = vmul.f32 %v3486_v3, %v7713_v23 }
 0x408   : > { %v3581_v13 = vadd.f32 1e-05, %v3549_v48 }
 0x40a   : > { %6243 = vrsqrt.f32 %v3581_v13  ;;  %vm3619_vm4 = vweird.f32 %v3581_v13 }
 0x40d   : > { %v3488_v10 = vpop.xlane.xlu1 %3487  ;;  %v3333_v33 = vpop.xlane.xlu0 %3332 }
 0x40e   : > { %v3550_v40 = vmul.f32 %v3488_v10, %v7713_v23  ;;  %v3396_v43 = vmul.f32 %v7713_v23, %v3333_v33 }
 0x410   : > { %v6244_v42 = vpop.eup %6243  ;;  %v3582_v9 = vadd.f32 1e-05, %v3550_v40  ;;  %v7793_v49 = vsub.f32 %v7728_v38, %v3396_v43 }
 0x411   : > { %v3614_v22 = vmul.f32 %v6244_v42, %v3581_v13  ;;  %vm3620_vm3 = vweird.f32 %v6244_v42 }
 0x412   : > { %6245 = vrsqrt.f32 %v3582_v9  ;;  %v3460_v60 = vmul.f32 %v7793_v49, %v7793_v49  ;;  %vm3621_vm5 = vmor %vm3619_vm4, %vm3620_vm3  ;;  %vm3629_vm7 = vweird.f32 %v3582_v9 }
 0x413   : > { %v3615_v8 = vmul.f32 %v6244_v42, %v3614_v22  ;;  %v7837_v22 = vadd.f32 %v7655_v1, %v3276_v24 }
 0x414   : > { %3499 = vadd.xlane.f32.xlu1 %v3460_v60 }
 0x415   : > { %v3616_v20 = vmul.f32 0.5, %v3615_v8  ;;  %v3490_v53 = vpop.xlane.xlu1 %3489  ;;  %v3335_v0 = vpop.xlane.xlu0 %3334 }
 0x416   : > { %v3551_v2 = vmul.f32 %v3490_v53, %v7713_v23  ;;  %v3397_v62 = vmul.f32 %v7713_v23, %v3335_v0 }
 0x417   : > { %v3617_v30 = vsub.f32 1.5, %v3616_v20 }
 0x418   : > { %v6246_v32 = vpop.eup %6245  ;;  %v3583_v7 = vadd.f32 1e-05, %v3551_v2  ;;  %v7800_v38 = vsub.f32 %v7736_v50, %v3397_v62  ;;  %v7807_v50 = vld [vmem:[%s8814_s9] ss:$0 sm:$0xff] }
 0x419   : > { %v3618_v46 = vmul.f32 %v6244_v42, %v3617_v30  ;;  %v3624_v4 = vmul.f32 %v6246_v32, %v3582_v9  ;;  %vm3630_vm6 = vweird.f32 %v6246_v32 }
 0x41a   : > { %6247 = vrsqrt.f32 %v3583_v7  ;;  %v3461_v5 = vmul.f32 %v7800_v38, %v7800_v38  ;;  %vm3631_vm8 = vmor %vm3629_vm7, %vm3630_vm6  ;;  %vm3639_vm10 = vweird.f32 %v3583_v7 }
 0x41b   : > { %v3622_v39 = vsel %vm3621_vm5, %v6244_v42, %v3618_v46  ;;  %v3625_v26 = vmul.f32 %v6246_v32, %v3624_v4 }
 0x41c   : > { %3501 = vadd.xlane.f32.xlu1 %v3461_v5  ;;  %v3933_v61 = vmul.f32 %v3622_v39, %v7717_v37  ;;  %v7821_v37 = vld [vmem:[%s8815_s10] ss:$0 sm:$0xff]  ;;  %v3281_v5 = vpop.f32.mrf.mxu3 }
 0x41d   : > { %v3626_v29 = vmul.f32 0.5, %v3625_v26  ;;  %v3492_v34 = vpop.xlane.xlu2 %3491  ;;  %v3337_v47 = vpop.xlane.xlu1 %3336 }
 0x41e   : > { %v3552_v36 = vmul.f32 %v3492_v34, %v7713_v23  ;;  %v3398_v17 = vmul.f32 %v7713_v23, %v3337_v47  ;;  %v3968_v63 = vmul.f32 %v7807_v50, %v3933_v61 }
 0x41f   : > { %v3627_v35 = vsub.f32 1.5, %v3626_v29 }
 0x420   : > { %v6248_v56 = vpop.eup %6247  ;;  %v3584_v54 = vadd.f32 1e-05, %v3552_v36  ;;  %v7813_v28 = vsub.f32 %v7746_v25, %v3398_v17  ;;  %v4003_v58 = vadd.f32 %v7821_v37, %v3968_v63  ;;  %v7849_v36 = vadd.f32 %v7655_v1, %v3278_v27 }
 0x421   : > { %v3628_v55 = vmul.f32 %v6246_v32, %v3627_v35  ;;  %v3634_v11 = vmul.f32 %v6248_v56, %v3583_v7  ;;  %vm3640_vm9 = vweird.f32 %v6248_v56 }
 0x422   : > { %6249 = vrsqrt.f32 %v3584_v54  ;;  %v3462_v59 = vmul.f32 %v7813_v28, %v7813_v28  ;;  %vm3641_vm11 = vmor %vm3639_vm10, %vm3640_vm9  ;;  %v4035_v53 = vmax.f32 %v4003_v58, 0.0  ;;  %vm3649_vm13 = vweird.f32 %v3584_v54 }
 0x423   : > { %v3632_v25 = vsel %vm3631_vm8, %v6246_v32, %v3628_v55  ;;  %v3635_v31 = vmul.f32 %v6248_v56, %v3634_v11  ;;  %v7866_v58 = vadd.f32 %v7655_v1, %v3281_v5 }
 0x424   : > { %v3934_v3 = vmul.f32 %v3632_v25, %v7723_v6  ;;  %3503 = vadd.xlane.f32.xlu2 %v3462_v59  ;;  %3348 = vadd.xlane.f32.xlu1 %v7816_v57 }
 0x425   : > { %v3636_v48 = vmul.f32 0.5, %v3635_v31  ;;  %v3494_v52 = vpop.xlane.xlu2 %3493  ;;  %v3339_v13 = vpop.xlane.xlu1 %3338 }
 0x426   : > { %v3969_v10 = vmul.f32 %v7807_v50, %v3934_v3  ;;  %v3553_v33 = vmul.f32 %v3494_v52, %v7713_v23  ;;  %v3399_v40 = vmul.f32 %v7713_v23, %v3339_v13 }
 0x427   : > { %v3637_v43 = vsub.f32 1.5, %v3636_v48  ;;  %v3283_v48 = vpop.f32.mrf.mxu3 }
 0x428   : > { %v6250_v42 = vpop.eup %6249  ;;  %v4004_v18 = vadd.f32 %v7821_v37, %v3969_v10  ;;  %v3585_v6 = vadd.f32 1e-05, %v3553_v33  ;;  %v7834_v9 = vsub.f32 %v7756_v21, %v3399_v40 }
 0x429   : > { %v3638_v60 = vmul.f32 %v6248_v56, %v3637_v43  ;;  %v3644_v8 = vmul.f32 %v6250_v42, %v3584_v54  ;;  %vm3650_vm12 = vweird.f32 %v6250_v42 }
 0x42a   : > { %6251 = vrsqrt.f32 %v3585_v6  ;;  %v3463_v20 = vmul.f32 %v7834_v9, %v7834_v9  ;;  %v4036_v0 = vmax.f32 %v4004_v18, 0.0  ;;  %vm3651_vm14 = vmor %vm3649_vm13, %vm3650_vm12  ;;  %vm3659_vm0 = vweird.f32 %v3585_v6 }
 0x42b   : > { %v3642_v2 = vsel %vm3641_vm11, %v6248_v56, %v3638_v60  ;;  %v3645_v62 = vmul.f32 %v6250_v42, %v3644_v8 }
 0x42c   : > { %3505 = vadd.xlane.f32.xlu2 %v3463_v20  ;;  %3350 = vadd.xlane.f32.xlu1 %v7837_v22  ;;  %v4067_v21 = vpack.c.bf16 %v4036_v0, %v4035_v53  ;;  %v3935_v4 = vmul.f32 %v3642_v2, %v7733_v16  ;;  %v7877_v2 = vadd.f32 %v7655_v1, %v3283_v48 }
 0x42d   : > { %v3646_v30 = vmul.f32 0.5, %v3645_v62  ;;  %v3496_v32 = vpop.xlane.xlu0 %3495  ;;  %v3341_v46 = vpop.xlane.xlu2 %3340 }
 0x42e   : > { %v3554_v7 = vmul.f32 %v3496_v32, %v7713_v23  ;;  %v3400_v24 = vmul.f32 %v7713_v23, %v3341_v46  ;;  %4159 = vmatmul.bf16.vlgmr.msra.gmra.mxu0 %v4067_v21  ;;  %v3970_v17 = vmul.f32 %v7807_v50, %v3935_v4 }
 0x42f   : > { %v3647_v39 = vsub.f32 1.5, %v3646_v30 }
 0x430   : > { %v6252_v26 = vpop.eup %6251  ;;  %v3586_v29 = vadd.f32 1e-05, %v3554_v7  ;;  %v7846_v34 = vsub.f32 %v7766_v12, %v3400_v24  ;;  %v4005_v25 = vadd.f32 %v7821_v37, %v3970_v17 }
 0x431   : > { %v3648_v47 = vmul.f32 %v6250_v42, %v3647_v39  ;;  %v3654_v61 = vmul.f32 %v6252_v26, %v3585_v6  ;;  %vm3660_vm15 = vweird.f32 %v6252_v26 }
 0x432   : > { %6253 = vrsqrt.f32 %v3586_v29  ;;  %v3464_v16 = vmul.f32 %v7846_v34, %v7846_v34  ;;  %vm3661_vm1 = vmor %vm3659_vm0, %vm3660_vm15  ;;  %v4037_v33 = vmax.f32 %v4005_v25, 0.0  ;;  %vm3669_vm3 = vweird.f32 %v3586_v29 }
 0x433   : > { %v3652_v35 = vsel %vm3651_vm14, %v6250_v42, %v3648_v47  ;;  %v3655_v56 = vmul.f32 %v6252_v26, %v3654_v61 }
 0x434   : > { %v3936_v55 = vmul.f32 %v3652_v35, %v7743_v19  ;;  %3507 = vadd.xlane.f32.xlu0 %v3464_v16  ;;  %3352 = vadd.xlane.f32.xlu2 %v7849_v36 }
 0x435   : > { %v3656_v12 = vmul.f32 0.5, %v3655_v56  ;;  %v7856_v54 = vpop.xlane.xlu0 %3497  ;;  %v3343_v11 = vpop.xlane.xlu2 %3342 }
 0x436   : > { %v3401_v63 = vmul.f32 %v7713_v23, %v3343_v11  ;;  %v3971_v59 = vmul.f32 %v7807_v50, %v3936_v55  ;;  %v3555_v35 = vmul.f32 %v7856_v54, %v7713_v23 }
 0x437   : > { %v3657_v31 = vsub.f32 1.5, %v3656_v12 }
 0x438   : > { %v6254_v27 = vpop.eup %6253  ;;  %v7862_v3 = vsub.f32 %v7776_v51, %v3401_v63  ;;  %v4006_v19 = vadd.f32 %v7821_v37, %v3971_v59  ;;  %v3587_v56 = vadd.f32 1e-05, %v3555_v35 }
 0x439   : > { %v3658_v52 = vmul.f32 %v6252_v26, %v3657_v31  ;;  %v3664_v13 = vmul.f32 %v6254_v27, %v3586_v29  ;;  %vm3670_vm2 = vweird.f32 %v6254_v27 }
 0x43a   : > { %v3465_v10 = vmul.f32 %v7862_v3, %v7862_v3  ;;  %v4038_v40 = vmax.f32 %v4006_v19, 0.0  ;;  %vm3671_vm4 = vmor %vm3669_vm3, %vm3670_vm2  ;;  %6255 = vrsqrt.f32 %v3587_v56  ;;  %vm3679_vm6 = vweird.f32 %v3587_v56 }
 0x43b   : > { %v3662_v43 = vsel %vm3661_vm1, %v6252_v26, %v3658_v52  ;;  %v3665_v42 = vmul.f32 %v6254_v27, %v3664_v13 }
 0x43c   : > { %3509 = vadd.xlane.f32.xlu0 %v3465_v10  ;;  %3354 = vadd.xlane.f32.xlu2 %v7866_v58  ;;  %v4068_v51 = vpack.c.bf16 %v4038_v40, %v4037_v33  ;;  %v3937_v6 = vmul.f32 %v3662_v43, %v7753_v14  ;;  %v3286_v14 = vpop.f32.mrf.mxu3 }
 0x43d   : > { %v3666_v18 = vmul.f32 0.5, %v3665_v42  ;;  %v3345_v60 = vpop.xlane.xlu0 %3344  ;;  %v7892_v39 = vadd.f32 %v7655_v1, %v3286_v14 }
 0x43e   : > { %v3402_v8 = vmul.f32 %v7713_v23, %v3345_v60  ;;  %4164 = vmatmul.bf16.gmra.mxu0 %v4068_v51  ;;  %v3972_v21 = vmul.f32 %v7807_v50, %v3937_v6 }
 0x43f   : > { %v3667_v20 = vsub.f32 1.5, %v3666_v18 }
 0x440   : > { %v7874_v53 = vsub.f32 %v7782_v44, %v3402_v8  ;;  %v4007_v7 = vadd.f32 %v7821_v37, %v3972_v21  ;;  %v6256_v55 = vpop.eup %6255 }
 0x441   : > { %v3668_v0 = vmul.f32 %v6254_v27, %v3667_v20  ;;  %v3674_v12 = vmul.f32 %v6256_v55, %v3587_v56  ;;  %vm3680_vm5 = vweird.f32 %v6256_v55 }
 0x442   : > { %v3466_v62 = vmul.f32 %v7874_v53, %v7874_v53  ;;  %v4039_v26 = vmax.f32 %v4007_v7, 0.0  ;;  %vm3681_vm7 = vmor %vm3679_vm6, %vm3680_vm5 }
 0x443   : > { %v3672_v30 = vsel %vm3671_vm4, %v6254_v27, %v3668_v0  ;;  %v3675_v11 = vmul.f32 %v6256_v55, %v3674_v12 }
 0x444   : > { %v3938_v32 = vmul.f32 %v3672_v30, %v7763_v15  ;;  %3511 = vadd.xlane.f32.xlu1 %v3466_v62  ;;  %3356 = vadd.xlane.f32.xlu0 %v7877_v2  ;;  %v3288_v61 = vpop.f32.mrf.mxu3 }
 0x445   : > { %v3347_v44 = vpop.xlane.xlu0 %3346  ;;  %v7898_v16 = vadd.f32 %v7655_v1, %v3288_v61  ;;  %v3676_v25 = vmul.f32 0.5, %v3675_v11 }
 0x446   : > { %v3403_v46 = vmul.f32 %v7713_v23, %v3347_v44  ;;  %v3973_v4 = vmul.f32 %v7807_v50, %v3938_v32 }
 0x447   : > { %v3677_v27 = vsub.f32 1.5, %v3676_v25 }
 0x448   : > { %v7888_v24 = vsub.f32 %v7786_v45, %v3403_v46  ;;  %v4008_v5 = vadd.f32 %v7821_v37, %v3973_v4 }
 0x449   : > { %v3678_v52 = vmul.f32 %v6256_v55, %v3677_v27 }
 0x44a   : > { %v3467_v15 = vmul.f32 %v7888_v24, %v7888_v24  ;;  %v4040_v29 = vmax.f32 %v4008_v5, 0.0 }
 0x44b   : > { %v3682_v33 = vsel %vm3681_vm7, %v6256_v55, %v3678_v52 }
 0x44c   : > { %3513 = vadd.xlane.f32.xlu1 %v3467_v15  ;;  %3358 = vadd.xlane.f32.xlu0 %v7892_v39  ;;  %v4069_v47 = vpack.c.bf16 %v4040_v29, %v4039_v26  ;;  %v3291_v45 = vpop.f32.mrf.mxu3  ;;  %v3939_v18 = vmul.f32 %v3682_v33, %v7773_v41 }
 0x44d   : > { %v7902_v17 = vadd.f32 %v7655_v1, %v3291_v45 }
 0x44e   : > { %4169 = vmatmul.bf16.gmra.mxu0 %v4069_v47  ;;  %v3974_v32 = vmul.f32 %v7807_v50, %v3939_v18 }
 0x450   : > { %v4009_v47 = vadd.f32 %v7821_v37, %v3974_v32 }
 0x454   : > { %3360 = vadd.xlane.f32.xlu1 %v7898_v16  ;;  %v3293_v0 = vpop.f32.mrf.mxu3 }
 0x45c   : > { %3362 = vadd.xlane.f32.xlu1 %v7902_v17  ;;  %v3296_v11 = vpop.f32.mrf.mxu3 }
 0x487   : > { %v3500_v63 = vpop.xlane.xlu1 %3499 }
 0x488   : > { %v3556_v59 = vmul.f32 %v3500_v63, %v7713_v23 }
 0x48a   : > { %v3588_v31 = vadd.f32 1e-05, %v3556_v59  ;;  %v4041_v59 = vmax.f32 %v4009_v47, 0.0 }
 0x48c   : > { %6257 = vrsqrt.f32 %v3588_v31  ;;  %vm3689_vm9 = vweird.f32 %v3588_v31 }
 0x48f   : > { %v3502_v19 = vpop.xlane.xlu1 %3501 }
 0x490   : > { %v3557_v48 = vmul.f32 %v3502_v19, %v7713_v23 }
 0x492   : > { %v6258_v13 = vpop.eup %6257  ;;  %v3589_v10 = vadd.f32 1e-05, %v3557_v48 }
 0x493   : > { %v3684_v54 = vmul.f32 %v6258_v13, %v3588_v31  ;;  %vm3690_vm8 = vweird.f32 %v6258_v13 }
 0x494   : > { %6259 = vrsqrt.f32 %v3589_v10  ;;  %vm3691_vm10 = vmor %vm3689_vm9, %vm3690_vm8  ;;  %vm3699_vm12 = vweird.f32 %v3589_v10 }
 0x495   : > { %v3685_v40 = vmul.f32 %v6258_v13, %v3684_v54 }
 0x497   : > { %v3686_v43 = vmul.f32 0.5, %v3685_v40  ;;  %v3504_v42 = vpop.xlane.xlu2 %3503  ;;  %v3349_v51 = vpop.xlane.xlu1 %3348 }
 0x498   : > { %v3558_v60 = vmul.f32 %v3504_v42, %v7713_v23  ;;  %v3404_v6 = vmul.f32 %v7713_v23, %v3349_v51 }
 0x499   : > { %v3687_v8 = vsub.f32 1.5, %v3686_v43 }
 0x49a   : > { %v6260_v20 = vpop.eup %6259  ;;  %v3590_v62 = vadd.f32 1e-05, %v3558_v60  ;;  %v7913_v21 = vsub.f32 %v7816_v57, %v3404_v6  ;;  %v7936_v60 = vadd.f32 %v7655_v1, %v3293_v0 }
 0x49b   : > { %v3688_v14 = vmul.f32 %v6258_v13, %v3687_v8  ;;  %v3694_v30 = vmul.f32 %v6260_v20, %v3589_v10  ;;  %vm3700_vm11 = vweird.f32 %v6260_v20 }
 0x49c   : > { %6261 = vrsqrt.f32 %v3590_v62  ;;  %v3468_v41 = vmul.f32 %v7913_v21, %v7913_v21  ;;  %vm3701_vm13 = vmor %vm3699_vm12, %vm3700_vm11  ;;  %vm3709_vm15 = vweird.f32 %v3590_v62 }
 0x49d   : > { %v3692_v44 = vsel %vm3691_vm10, %v6258_v13, %v3688_v14  ;;  %v3695_v46 = vmul.f32 %v6260_v20, %v3694_v30  ;;  %v3298_v14 = vpop.f32.mrf.mxu3 }
 0x49e   : > { %v3940_v4 = vmul.f32 %v3692_v44, %v7793_v49  ;;  %3515 = vadd.xlane.f32.xlu2 %v3468_v41 }
 0x49f   : > { %v3696_v7 = vmul.f32 0.5, %v3695_v46  ;;  %v3506_v5 = vpop.xlane.xlu2 %3505  ;;  %v3351_v15 = vpop.xlane.xlu1 %3350 }
 0x4a0   : > { %v3559_v57 = vmul.f32 %v3506_v5, %v7713_v23  ;;  %v3405_v26 = vmul.f32 %v7713_v23, %v3351_v15  ;;  %v3975_v29 = vmul.f32 %v7807_v50, %v3940_v4 }
 0x4a1   : > { %v3697_v61 = vsub.f32 1.5, %v3696_v7 }
 0x4a2   : > { %v6262_v45 = vpop.eup %6261  ;;  %v3591_v35 = vadd.f32 1e-05, %v3559_v57  ;;  %v7924_v56 = vsub.f32 %v7837_v22, %v3405_v26  ;;  %v4010_v49 = vadd.f32 %v7821_v37, %v3975_v29  ;;  %v7952_v57 = vadd.f32 %v7655_v1, %v3296_v11 }
 0x4a3   : > { %v3698_v55 = vmul.f32 %v6260_v20, %v3697_v61  ;;  %v3704_v12 = vmul.f32 %v6262_v45, %v3590_v62  ;;  %vm3710_vm14 = vweird.f32 %v6262_v45 }
 0x4a4   : > { %6263 = vrsqrt.f32 %v3591_v35  ;;  %v3469_v63 = vmul.f32 %v7924_v56, %v7924_v56  ;;  %v4042_v25 = vmax.f32 %v4010_v49, 0.0  ;;  %vm3711_vm0 = vmor %vm3709_vm15, %vm3710_vm14  ;;  %vm3719_vm2 = vweird.f32 %v3591_v35 }
 0x4a5   : > { %v3702_v31 = vsel %vm3701_vm13, %v6260_v20, %v3698_v55  ;;  %v3705_v27 = vmul.f32 %v6262_v45, %v3704_v12 }
 0x4a6   : > { %3517 = vadd.xlane.f32.xlu2 %v3469_v63  ;;  %v4070_v19 = vpack.c.bf16 %v4042_v25, %v4041_v59  ;;  %v3941_v13 = vmul.f32 %v3702_v31, %v7800_v38  ;;  %v3301_v25 = vpop.f32.mrf.mxu3 }
 0x4a7   : > { %v3706_v48 = vmul.f32 0.5, %v3705_v27  ;;  %v3508_v22 = vpop.xlane.xlu0 %3507  ;;  %v3353_v52 = vpop.xlane.xlu2 %3352 }
 0x4a8   : > { %v3560_v10 = vmul.f32 %v3508_v22, %v7713_v23  ;;  %v3406_v54 = vmul.f32 %v7713_v23, %v3353_v52  ;;  %4174 = vmatmul.bf16.gmra.mxu0 %v4070_v19  ;;  %v3976_v6 = vmul.f32 %v7807_v50, %v3941_v13 }
 0x4a9   : > { %v3707_v33 = vsub.f32 1.5, %v3706_v48 }
 0x4aa   : > { %v6264_v40 = vpop.eup %6263  ;;  %v3592_v43 = vadd.f32 1e-05, %v3560_v10  ;;  %v7933_v42 = vsub.f32 %v7849_v36, %v3406_v54  ;;  %v4011_v46 = vadd.f32 %v7821_v37, %v3976_v6 }
 0x4ab   : > { %v3708_v51 = vmul.f32 %v6262_v45, %v3707_v33  ;;  %v3714_v18 = vmul.f32 %v6264_v40, %v3591_v35  ;;  %vm3720_vm1 = vweird.f32 %v6264_v40 }
 0x4ac   : > { %6265 = vrsqrt.f32 %v3592_v43  ;;  %v3470_v38 = vmul.f32 %v7933_v42, %v7933_v42  ;;  %vm3721_vm3 = vmor %vm3719_vm2, %vm3720_vm1  ;;  %v4043_v61 = vmax.f32 %v4011_v46, 0.0  ;;  %vm3729_vm5 = vweird.f32 %v3592_v43 }
 0x4ad   : > { %v3712_v8 = vsel %vm3711_vm0, %v6262_v45, %v3708_v51  ;;  %v3715_v20 = vmul.f32 %v6264_v40, %v3714_v18 }
 0x4ae   : > { %v3942_v30 = vmul.f32 %v3712_v8, %v7813_v28  ;;  %3519 = vadd.xlane.f32.xlu0 %v3470_v38  ;;  %3364 = vadd.xlane.f32.xlu2 %v7936_v60 }
 0x4af   : > { %v3716_v36 = vmul.f32 0.5, %v3715_v20  ;;  %v3510_v62 = vpop.xlane.xlu0 %3509  ;;  %v3355_v41 = vpop.xlane.xlu2 %3354 }
 0x4b0   : > { %v3561_v0 = vmul.f32 %v3510_v62, %v7713_v23  ;;  %v3407_v32 = vmul.f32 %v7713_v23, %v3355_v41  ;;  %v3977_v44 = vmul.f32 %v7807_v50, %v3942_v30 }
 0x4b1   : > { %v3717_v4 = vsub.f32 1.5, %v3716_v36  ;;  %v3303_v36 = vpop.f32.mrf.mxu3 }
 0x4b2   : > { %v6266_v7 = vpop.eup %6265  ;;  %v3593_v5 = vadd.f32 1e-05, %v3561_v0  ;;  %v7948_v28 = vsub.f32 %v7866_v58, %v3407_v32  ;;  %v4012_v15 = vadd.f32 %v7821_v37, %v3977_v44 }
 0x4b3   : > { %v3718_v26 = vmul.f32 %v6264_v40, %v3717_v4  ;;  %v3724_v29 = vmul.f32 %v6266_v7, %v3592_v43  ;;  %vm3730_vm4 = vweird.f32 %v6266_v7 }
 0x4b4   : > { %6267 = vrsqrt.f32 %v3593_v5  ;;  %v3471_v47 = vmul.f32 %v7948_v28, %v7948_v28  ;;  %v4044_v45 = vmax.f32 %v4012_v15, 0.0  ;;  %vm3731_vm6 = vmor %vm3729_vm5, %vm3730_vm4  ;;  %vm3739_vm8 = vweird.f32 %v3593_v5 }
 0x4b5   : > { %v3722_v49 = vsel %vm3721_vm3, %v6264_v40, %v3718_v26  ;;  %v3725_v55 = vmul.f32 %v6266_v7, %v3724_v29 }
 0x4b6   : > { %3521 = vadd.xlane.f32.xlu0 %v3471_v47  ;;  %3366 = vadd.xlane.f32.xlu2 %v7952_v57  ;;  %v4071_v58 = vpack.c.bf16 %v4044_v45, %v4043_v61  ;;  %v3943_v11 = vmul.f32 %v3722_v49, %v7834_v9  ;;  %v7966_v9 = vld [vmem:[%s8813_s8] ss:$0 sm:$0xff] }
 0x4b7   : > { %v3726_v12 = vmul.f32 0.5, %v3725_v55  ;;  %v3512_v63 = vpop.xlane.xlu1 %3511  ;;  %v3357_v1 = vpop.xlane.xlu0 %3356  ;;  %v7969_v13 = vadd.f32 %v7966_v9, %v3298_v14  ;;  %v7986_v0 = vadd.f32 %v7966_v9, %v3301_v25  ;;  %v7997_v49 = vadd.f32 %v7966_v9, %v3303_v36 }
 0x4b8   : > { %v3562_v35 = vmul.f32 %v3512_v63, %v7713_v23  ;;  %v3408_v59 = vmul.f32 %v7713_v23, %v3357_v1  ;;  %4179 = vmatmul.bf16.gmra.mxu0 %v4071_v58  ;;  %v3978_v54 = vmul.f32 %v7807_v50, %v3943_v11 }
 0x4b9   : > { %v3727_v31 = vsub.f32 1.5, %v3726_v12 }
 0x4ba   : > { %v6268_v27 = vpop.eup %6267  ;;  %v3594_v19 = vadd.f32 1e-05, %v3562_v35  ;;  %v7961_v48 = vsub.f32 %v7877_v2, %v3408_v59  ;;  %v4013_v8 = vadd.f32 %v7821_v37, %v3978_v54 }
 0x4bb   : > { %v3728_v22 = vmul.f32 %v6266_v7, %v3727_v31  ;;  %v3734_v52 = vmul.f32 %v6268_v27, %v3593_v5  ;;  %vm3740_vm7 = vweird.f32 %v6268_v27 }
 0x4bc   : > { %6269 = vrsqrt.f32 %v3594_v19  ;;  %v3472_v10 = vmul.f32 %v7961_v48, %v7961_v48  ;;  %vm3741_vm9 = vmor %vm3739_vm8, %vm3740_vm7  ;;  %v4045_v44 = vmax.f32 %v4013_v8, 0.0  ;;  %vm3749_vm11 = vweird.f32 %v3594_v19 }
 0x4bd   : > { %v3732_v2 = vsel %vm3731_vm6, %v6266_v7, %v3728_v22  ;;  %v3735_v33 = vmul.f32 %v6268_v27, %v3734_v52 }
 0x4be   : > { %v3944_v40 = vmul.f32 %v3732_v2, %v7846_v34  ;;  %3523 = vadd.xlane.f32.xlu1 %v3472_v10  ;;  %3368 = vadd.xlane.f32.xlu0 %v7969_v13 }
 0x4bf   : > { %v3736_v43 = vmul.f32 0.5, %v3735_v33  ;;  %v7976_v51 = vpop.xlane.xlu1 %3513  ;;  %v3359_v18 = vpop.xlane.xlu0 %3358 }
 0x4c0   : > { %v3409_v38 = vmul.f32 %v7713_v23, %v3359_v18  ;;  %v3979_v6 = vmul.f32 %v7807_v50, %v3944_v40  ;;  %v3563_v2 = vmul.f32 %v7976_v51, %v7713_v23 }
 0x4c1   : > { %v3737_v20 = vsub.f32 1.5, %v3736_v43 }
 0x4c2   : > { %v6270_v14 = vpop.eup %6269  ;;  %v7982_v30 = vsub.f32 %v7892_v39, %v3409_v38  ;;  %v4014_v34 = vadd.f32 %v7821_v37, %v3979_v6  ;;  %v3595_v33 = vadd.f32 1e-05, %v3563_v2 }
 0x4c3   : > { %v3738_v62 = vmul.f32 %v6268_v27, %v3737_v20  ;;  %v3744_v41 = vmul.f32 %v6270_v14, %v3594_v19  ;;  %vm3750_vm10 = vweird.f32 %v6270_v14 }
 0x4c4   : > { %v3473_v32 = vmul.f32 %v7982_v30, %v7982_v30  ;;  %v4046_v46 = vmax.f32 %v4014_v34, 0.0  ;;  %vm3751_vm12 = vmor %vm3749_vm11, %vm3750_vm10  ;;  %6271 = vrsqrt.f32 %v3595_v33  ;;  %vm3759_vm14 = vweird.f32 %v3595_v33 }
 0x4c5   : > { %v3742_v4 = vsel %vm3741_vm9, %v6268_v27, %v3738_v62  ;;  %v3745_v7 = vmul.f32 %v6270_v14, %v3744_v41 }
 0x4c6   : > { %3525 = vadd.xlane.f32.xlu1 %v3473_v32  ;;  %3370 = vadd.xlane.f32.xlu0 %v7986_v0  ;;  %v4072_v39 = vpack.c.bf16 %v4046_v46, %v4045_v44  ;;  %v3945_v5 = vmul.f32 %v3742_v4, %v7862_v3  ;;  %v3306_v3 = vpop.f32.mrf.mxu3 }
 0x4c7   : > { %v3746_v15 = vmul.f32 0.5, %v3745_v7  ;;  %v3361_v26 = vpop.xlane.xlu1 %3360  ;;  %v8012_v31 = vadd.f32 %v7966_v9, %v3306_v3 }
 0x4c8   : > { %v3410_v29 = vmul.f32 %v7713_v23, %v3361_v26  ;;  %4184 = vmatmul.bf16.gmra.mxu0 %v4072_v39  ;;  %v3980_v58 = vmul.f32 %v7807_v50, %v3945_v5 }
 0x4c9   : > { %v3747_v47 = vsub.f32 1.5, %v3746_v15 }
 0x4ca   : > { %v7994_v61 = vsub.f32 %v7898_v16, %v3410_v29  ;;  %v4015_v35 = vadd.f32 %v7821_v37, %v3980_v58  ;;  %v6272_v40 = vpop.eup %6271 }
 0x4cb   : > { %v3748_v45 = vmul.f32 %v6270_v14, %v3747_v47  ;;  %v3754_v43 = vmul.f32 %v6272_v40, %v3595_v33  ;;  %vm3760_vm13 = vweird.f32 %v6272_v40 }
 0x4cc   : > { %v3474_v55 = vmul.f32 %v7994_v61, %v7994_v61  ;;  %v4047_v27 = vmax.f32 %v4015_v35, 0.0  ;;  %vm3761_vm15 = vmor %vm3759_vm14, %vm3760_vm13 }
 0x4cd   : > { %v3752_v12 = vsel %vm3751_vm12, %v6270_v14, %v3748_v45  ;;  %v3755_v18 = vmul.f32 %v6272_v40, %v3754_v43 }
 0x4ce   : > { %v3946_v63 = vmul.f32 %v3752_v12, %v7874_v53  ;;  %3527 = vadd.xlane.f32.xlu2 %v3474_v55  ;;  %3372 = vadd.xlane.f32.xlu1 %v7997_v49  ;;  %v3308_v52 = vpop.f32.mrf.mxu3 }
 0x4cf   : > { %v3363_v16 = vpop.xlane.xlu1 %3362  ;;  %v8018_v10 = vadd.f32 %v7966_v9, %v3308_v52  ;;  %v3756_v6 = vmul.f32 0.5, %v3755_v18 }
 0x4d0   : > { %v3411_v1 = vmul.f32 %v7713_v23, %v3363_v16  ;;  %v3981_v11 = vmul.f32 %v7807_v50, %v3946_v63 }
 0x4d1   : > { %v3757_v14 = vsub.f32 1.5, %v3756_v6 }
 0x4d2   : > { %v8008_v59 = vsub.f32 %v7902_v17, %v3411_v1  ;;  %v4016_v25 = vadd.f32 %v7821_v37, %v3981_v11 }
 0x4d3   : > { %v3758_v36 = vmul.f32 %v6272_v40, %v3757_v14 }
 0x4d4   : > { %v3475_v53 = vmul.f32 %v8008_v59, %v8008_v59  ;;  %v4048_v19 = vmax.f32 %v4016_v25, 0.0 }
 0x4d5   : > { %v3762_v44 = vsel %vm3761_vm15, %v6272_v40, %v3758_v36 }
 0x4d6   : > { %3529 = vadd.xlane.f32.xlu2 %v3475_v53  ;;  %3374 = vadd.xlane.f32.xlu1 %v8012_v31  ;;  %v4073_v22 = vpack.c.bf16 %v4048_v19, %v4047_v27  ;;  %v3311_v17 = vpop.f32.mrf.mxu3  ;;  %v3947_v4 = vmul.f32 %v3762_v44, %v7888_v24 }
 0x4d7   : > { %v8022_v54 = vadd.f32 %v7966_v9, %v3311_v17 }
 0x4d8   : > { %4189 = vmatmul.bf16.gmra.mxu0 %v4073_v22  ;;  %v3982_v12 = vmul.f32 %v7807_v50, %v3947_v4 }
 0x4de   : > { %3376 = vadd.xlane.f32.xlu2 %v8018_v10 }
 0x4e6   : > { %3378 = vadd.xlane.f32.xlu2 %v8022_v54 }
 0x511   : > { %v3516_v38 = vpop.xlane.xlu2 %3515 }
 0x512   : > { %v3564_v8 = vmul.f32 %v3516_v38, %v7713_v23 }
 0x514   : > { %v3596_v20 = vadd.f32 1e-05, %v3564_v8  ;;  %v4160_v8 = vpop.f32.mrf.mxu0 }
 0x516   : > { %6273 = vrsqrt.f32 %v3596_v20  ;;  %vm3769_vm1 = vweird.f32 %v3596_v20 }
 0x519   : > { %v3518_v34 = vpop.xlane.xlu2 %3517 }
 0x51a   : > { %v3565_v62 = vmul.f32 %v3518_v34, %v7713_v23 }
 0x51c   : > { %v6274_v41 = vpop.eup %6273  ;;  %v3597_v51 = vadd.f32 1e-05, %v3565_v62 }
 0x51d   : > { %v3764_v32 = vmul.f32 %v6274_v41, %v3596_v20  ;;  %vm3770_vm0 = vweird.f32 %v6274_v41 }
 0x51e   : > { %6275 = vrsqrt.f32 %v3597_v51  ;;  %vm3771_vm2 = vmor %vm3769_vm1, %vm3770_vm0  ;;  %vm3779_vm4 = vweird.f32 %v3597_v51 }
 0x51f   : > { %v3765_v46 = vmul.f32 %v6274_v41, %v3764_v32 }
 0x521   : > { %v3766_v7 = vmul.f32 0.5, %v3765_v46  ;;  %v3520_v39 = vpop.xlane.xlu0 %3519  ;;  %v3365_v15 = vpop.xlane.xlu2 %3364 }
 0x522   : > { %v3566_v26 = vmul.f32 %v3520_v39, %v7713_v23  ;;  %v3412_v5 = vmul.f32 %v7713_v23, %v3365_v15 }
 0x523   : > { %v3767_v29 = vsub.f32 1.5, %v3766_v7 }
 0x524   : > { %v6276_v47 = vpop.eup %6275  ;;  %v3598_v45 = vadd.f32 1e-05, %v3566_v26  ;;  %v8033_v55 = vsub.f32 %v7936_v60, %v3412_v5  ;;  %v4017_v60 = vadd.f32 %v7821_v37, %v3982_v12 }
 0x525   : > { %v3768_v58 = vmul.f32 %v6274_v41, %v3767_v29  ;;  %v3774_v3 = vmul.f32 %v6276_v47, %v3597_v51  ;;  %vm3780_vm3 = vweird.f32 %v6276_v47  ;;  %v3313_v51 = vpop.f32.mrf.mxu3 }
 0x526   : > { %6277 = vrsqrt.f32 %v3598_v45  ;;  %v3476_v24 = vmul.f32 %v8033_v55, %v8033_v55  ;;  %v4049_v43 = vmax.f32 %v4017_v60, 0.0  ;;  %vm3781_vm5 = vmor %vm3779_vm4, %vm3780_vm3  ;;  %vm3789_vm7 = vweird.f32 %v3598_v45 }
 0x527   : > { %v3772_v63 = vsel %vm3771_vm2, %v6274_v41, %v3768_v58  ;;  %v3775_v16 = vmul.f32 %v6276_v47, %v3774_v3  ;;  %v8060_v26 = vadd.f32 %v7966_v9, %v3313_v51  ;;  %v8070_v9 = vld [vmem:[%s8817_s12] ss:$0 sm:$0xff] }
 0x528   : > { %v3948_v1 = vmul.f32 %v3772_v63, %v7913_v21  ;;  %3531 = vadd.xlane.f32.xlu0 %v3476_v24 }
 0x529   : > { %v3776_v11 = vmul.f32 0.5, %v3775_v16  ;;  %v3522_v35 = vpop.xlane.xlu0 %3521  ;;  %v3367_v25 = vpop.xlane.xlu2 %3366 }
 0x52a   : > { %v3567_v53 = vmul.f32 %v3522_v35, %v7713_v23  ;;  %v3413_v27 = vmul.f32 %v7713_v23, %v3367_v25  ;;  %v3983_v19 = vmul.f32 %v7807_v50, %v3948_v1  ;;  %v4162_v16 = vpop.f32.mrf.mxu0 }
 0x52b   : > { %v3777_v22 = vsub.f32 1.5, %v3776_v11  ;;  %v8094_v51 = vadd.f32 %v8070_v9, %v4162_v16 }
 0x52c   : > { %v6278_v52 = vpop.eup %6277  ;;  %v8043_v17 = vadd.f32 1e-05, %v3567_v53  ;;  %v8046_v2 = vsub.f32 %v7952_v57, %v3413_v27  ;;  %v4018_v21 = vadd.f32 %v7821_v37, %v3983_v19  ;;  %v8081_v19 = vadd.f32 %v8070_v9, %v4160_v8 }
 0x52d   : > { %v3778_v33 = vmul.f32 %v6276_v47, %v3777_v22  ;;  %v3784_v40 = vmul.f32 %v6278_v52, %v3598_v45  ;;  %vm3790_vm6 = vweird.f32 %v6278_v52 }
 0x52e   : > { %6279 = vrsqrt.f32 %v8043_v17  ;;  %v3477_v18 = vmul.f32 %v8046_v2, %v8046_v2  ;;  %v4050_v38 = vmax.f32 %v4018_v21, 0.0  ;;  %vm3791_vm8 = vmor %vm3789_vm7, %vm3790_vm6  ;;  %vm3799_vm10 = vweird.f32 %v8043_v17 }
 0x52f   : > { %v3785_v6 = vmul.f32 %v6278_v52, %v3784_v40  ;;  %v3782_v20 = vsel %vm3781_vm5, %v6276_v47, %v3778_v33 }
 0x530   : > { %3533 = vadd.xlane.f32.xlu0 %v3477_v18  ;;  %v4074_v14 = vpack.c.bf16 %v4050_v38, %v4049_v43  ;;  %v3949_v32 = vmul.f32 %v3782_v20, %v7924_v56 }
 0x531   : > { %v3786_v57 = vmul.f32 0.5, %v3785_v6  ;;  %v3524_v34 = vpop.xlane.xlu1 %3523  ;;  %v3369_v36 = vpop.xlane.xlu0 %3368 }
 0x532   : > { %v3568_v62 = vmul.f32 %v3524_v34, %v7713_v23  ;;  %v3414_v41 = vmul.f32 %v7713_v23, %v3369_v36  ;;  %4194 = vmatmul.bf16.gmra.mxu0 %v4074_v14  ;;  %v3984_v47 = vmul.f32 %v7807_v50, %v3949_v32  ;;  %v4165_v36 = vpop.f32.mrf.mxu0 }
 0x533   : > { %v3787_v44 = vsub.f32 1.5, %v3786_v57 }
 0x534   : > { %v6280_v46 = vpop.eup %6279  ;;  %v3600_v4 = vadd.f32 1e-05, %v3568_v62  ;;  %v8056_v7 = vsub.f32 %v7969_v13, %v3414_v41 }
 0x535   : > { %v3788_v39 = vmul.f32 %v6278_v52, %v3787_v44  ;;  %v3794_v15 = vmul.f32 %v6280_v46, %v8043_v17  ;;  %vm3800_vm9 = vweird.f32 %v6280_v46 }
 0x536   : > { %6281 = vrsqrt.f32 %v3600_v4  ;;  %v3478_v5 = vmul.f32 %v8056_v7, %v8056_v7  ;;  %vm3801_vm11 = vmor %vm3799_vm10, %vm3800_vm9  ;;  %vm3809_vm13 = vweird.f32 %v3600_v4 }
 0x537   : > { %v3792_v56 = vsel %vm3791_vm8, %v6278_v52, %v3788_v39  ;;  %v3795_v29 = vmul.f32 %v6280_v46, %v3794_v15 }
 0x538   : > { %v3950_v58 = vmul.f32 %v3792_v56, %v7933_v42  ;;  %3535 = vadd.xlane.f32.xlu1 %v3478_v5  ;;  %3380 = vadd.xlane.f32.xlu0 %v8060_v26  ;;  %v4019_v42 = vadd.f32 %v7821_v37, %v3984_v47  ;;  %v8107_v56 = vld [vmem:[%s8814_s9] ss:$0 sm:$0xff] }
 0x539   : > { %v3796_v13 = vmul.f32 0.5, %v3795_v29  ;;  %v3526_v45 = vpop.xlane.xlu1 %3525  ;;  %v3371_v3 = vpop.xlane.xlu0 %3370 }
 0x53a   : > { %v3569_v12 = vmul.f32 %v3526_v45, %v7713_v23  ;;  %v3415_v24 = vmul.f32 %v7713_v23, %v3371_v3  ;;  %v3985_v63 = vmul.f32 %v7807_v50, %v3950_v58  ;;  %v4051_v21 = vmax.f32 %v4019_v42, 0.0 }
 0x53b   : > { %v3797_v1 = vsub.f32 1.5, %v3796_v13 }
 0x53c   : > { %v6282_v11 = vpop.eup %6281  ;;  %v3601_v35 = vadd.f32 1e-05, %v3569_v12  ;;  %v8077_v25 = vsub.f32 %v7986_v0, %v3415_v24  ;;  %v4020_v60 = vadd.f32 %v7821_v37, %v3985_v63  ;;  %v8116_v12 = vadd.f32 %v8070_v9, %v4165_v36  ;;  %v4167_v63 = vpop.f32.mrf.mxu0 }
 0x53d   : > { %v3798_v53 = vmul.f32 %v6280_v46, %v3797_v1  ;;  %v3804_v27 = vmul.f32 %v6282_v11, %v3600_v4  ;;  %vm3810_vm12 = vweird.f32 %v6282_v11 }
 0x53e   : > { %6283 = vrsqrt.f32 %v3601_v35  ;;  %v3479_v22 = vmul.f32 %v8077_v25, %v8077_v25  ;;  %v4052_v33 = vmax.f32 %v4020_v60, 0.0  ;;  %vm3811_vm14 = vmor %vm3809_vm13, %vm3810_vm12  ;;  %vm3819_vm0 = vweird.f32 %v3601_v35 }
 0x53f   : > { %v3805_v52 = vmul.f32 %v6282_v11, %v3804_v27  ;;  %v3802_v40 = vsel %vm3801_vm11, %v6280_v46, %v3798_v53 }
 0x540   : > { %3537 = vadd.xlane.f32.xlu1 %v3479_v22  ;;  %4242 = vadd.xlane.f32.xlu0 %v8081_v19  ;;  %v4075_v38 = vpack.c.bf16 %v4052_v33, %v4051_v21  ;;  %v3951_v8 = vmul.f32 %v3802_v40, %v7948_v28  ;;  %v8129_v33 = vadd.f32 %v8070_v9, %v4167_v63 }
 0x541   : > { %v3806_v0 = vmul.f32 0.5, %v3805_v52  ;;  %v3528_v43 = vpop.xlane.xlu2 %3527  ;;  %v3373_v18 = vpop.xlane.xlu1 %3372 }
 0x542   : > { %v3570_v6 = vmul.f32 %v3528_v43, %v7713_v23  ;;  %v3416_v17 = vmul.f32 %v7713_v23, %v3373_v18  ;;  %4199 = vmatmul.bf16.gmra.mxu0 %v4075_v38  ;;  %v3986_v46 = vmul.f32 %v7807_v50, %v3951_v8 }
 0x543   : > { %v3807_v20 = vsub.f32 1.5, %v3806_v0 }
 0x544   : > { %v6284_v14 = vpop.eup %6283  ;;  %v3602_v57 = vadd.f32 1e-05, %v3570_v6  ;;  %v8091_v34 = vsub.f32 %v7997_v49, %v3416_v17  ;;  %v4021_v50 = vadd.f32 %v7821_v37, %v3986_v46  ;;  %v4170_v43 = vpop.f32.mrf.mxu0  ;;  %v8139_v6 = vld [vmem:[%s8815_s10] ss:$0 sm:$0xff] }
 0x545   : > { %v3808_v62 = vmul.f32 %v6282_v11, %v3807_v20  ;;  %v3814_v41 = vmul.f32 %v6284_v14, %v3601_v35  ;;  %vm3820_vm15 = vweird.f32 %v6284_v14  ;;  %v8147_v20 = vadd.f32 %v8070_v9, %v4170_v43 }
 0x546   : > { %6285 = vrsqrt.f32 %v3602_v57  ;;  %v3480_v28 = vmul.f32 %v8091_v34, %v8091_v34  ;;  %vm3821_vm1 = vmor %vm3819_vm0, %vm3820_vm15  ;;  %v4053_v42 = vmax.f32 %v4021_v50, 0.0  ;;  %vm3829_vm3 = vweird.f32 %v3602_v57 }
 0x547   : > { %v3812_v32 = vsel %vm3811_vm14, %v6282_v11, %v3808_v62  ;;  %v3815_v44 = vmul.f32 %v6284_v14, %v3814_v41 }
 0x548   : > { %v3952_v39 = vmul.f32 %v3812_v32, %v7961_v48  ;;  %4244 = vadd.xlane.f32.xlu1 %v8094_v51  ;;  %3539 = vadd.xlane.f32.xlu2 %v3480_v28 }
 0x549   : > { %v3816_v49 = vmul.f32 0.5, %v3815_v44  ;;  %v8101_v4 = vpop.xlane.xlu2 %3529  ;;  %v3375_v15 = vpop.xlane.xlu1 %3374 }
 0x54a   : > { %v3417_v5 = vmul.f32 %v7713_v23, %v3375_v15  ;;  %v3987_v29 = vmul.f32 %v8107_v56, %v3952_v39  ;;  %v3571_v44 = vmul.f32 %v8101_v4, %v7713_v23 }
 0x54b   : > { %v3817_v47 = vsub.f32 1.5, %v3816_v49 }
 0x54c   : > { %v6286_v48 = vpop.eup %6285  ;;  %v8112_v58 = vsub.f32 %v8012_v31, %v3417_v5  ;;  %v4022_v13 = vadd.f32 %v7821_v37, %v3987_v29  ;;  %v4172_v41 = vpop.f32.mrf.mxu0  ;;  %v3603_v46 = vadd.f32 1e-05, %v3571_v44 }
 0x54d   : > { %v3818_v45 = vmul.f32 %v6284_v14, %v3817_v47  ;;  %v3824_v3 = vmul.f32 %v6286_v48, %v3602_v57  ;;  %vm3830_vm2 = vweird.f32 %v6286_v48  ;;  %v8153_v28 = vadd.f32 %v8070_v9, %v4172_v41 }
 0x54e   : > { %v3481_v24 = vmul.f32 %v8112_v58, %v8112_v58  ;;  %v4054_v11 = vmax.f32 %v4022_v13, 0.0  ;;  %vm3831_vm4 = vmor %vm3829_vm3, %vm3830_vm2  ;;  %6287 = vrsqrt.f32 %v3603_v46  ;;  %vm3839_vm6 = vweird.f32 %v3603_v46 }
 0x54f   : > { %v3822_v16 = vsel %vm3821_vm1, %v6284_v14, %v3818_v45  ;;  %v3825_v1 = vmul.f32 %v6286_v48, %v3824_v3 }
 0x550   : > { %4246 = vadd.xlane.f32.xlu1 %v8116_v12  ;;  %3541 = vadd.xlane.f32.xlu2 %v3481_v24  ;;  %v4076_v60 = vpack.c.bf16 %v4054_v11, %v4053_v42  ;;  %v3953_v35 = vmul.f32 %v3822_v16, %v7982_v30 }
 0x551   : > { %v3826_v31 = vmul.f32 0.5, %v3825_v1  ;;  %v3377_v37 = vpop.xlane.xlu2 %3376 }
 0x552   : > { %v3418_v53 = vmul.f32 %v7713_v23, %v3377_v37  ;;  %4204 = vmatmul.bf16.gmra.mxu0 %v4076_v60  ;;  %v3988_v40 = vmul.f32 %v8107_v56, %v3953_v35 }
 0x553   : > { %v3827_v27 = vsub.f32 1.5, %v3826_v31 }
 0x554   : > { %v8124_v22 = vsub.f32 %v8018_v10, %v3418_v53  ;;  %v4023_v17 = vadd.f32 %v8139_v6, %v3988_v40  ;;  %v6288_v39 = vpop.eup %6287 }
 0x555   : > { %v3828_v52 = vmul.f32 %v6286_v48, %v3827_v27  ;;  %v3834_v49 = vmul.f32 %v6288_v39, %v3603_v46  ;;  %vm3840_vm5 = vweird.f32 %v6288_v39 }
 0x556   : > { %v3482_v21 = vmul.f32 %v8124_v22, %v8124_v22  ;;  %v4055_v57 = vmax.f32 %v4023_v17, 0.0  ;;  %vm3841_vm7 = vmor %vm3839_vm6, %vm3840_vm5 }
 0x557   : > { %v3832_v30 = vsel %vm3831_vm4, %v6286_v48, %v3828_v52  ;;  %v3835_v15 = vmul.f32 %v6288_v39, %v3834_v49 }
 0x558   : > { %v3954_v0 = vmul.f32 %v3832_v30, %v7994_v61  ;;  %3543 = vadd.xlane.f32.xlu0 %v3482_v21  ;;  %4248 = vadd.xlane.f32.xlu2 %v8129_v33 }
 0x559   : > { %v3379_v10 = vpop.xlane.xlu2 %3378  ;;  %v3836_v47 = vmul.f32 0.5, %v3835_v15 }
 0x55a   : > { %v3419_v18 = vmul.f32 %v7713_v23, %v3379_v10  ;;  %v3989_v38 = vmul.f32 %v8107_v56, %v3954_v0 }
 0x55b   : > { %v3837_v48 = vsub.f32 1.5, %v3836_v47 }
 0x55c   : > { %v8143_v8 = vsub.f32 %v8022_v54, %v3419_v18  ;;  %v4024_v61 = vadd.f32 %v8139_v6, %v3989_v38  ;;  %v4175_v54 = vpop.f32.mrf.mxu0 }
 0x55d   : > { %v8157_v32 = vadd.f32 %v8070_v9, %v4175_v54  ;;  %v3838_v24 = vmul.f32 %v6288_v39, %v3837_v48 }
 0x55e   : > { %v3483_v14 = vmul.f32 %v8143_v8, %v8143_v8  ;;  %v4056_v36 = vmax.f32 %v4024_v61, 0.0 }
 0x55f   : > { %v3842_v1 = vsel %vm3841_vm7, %v6288_v39, %v3838_v24 }
 0x560   : > { %4250 = vadd.xlane.f32.xlu2 %v8147_v20  ;;  %3545 = vadd.xlane.f32.xlu0 %v3483_v14  ;;  %v4077_v62 = vpack.c.bf16 %v4056_v36, %v4055_v57  ;;  %v3955_v35 = vmul.f32 %v3842_v1, %v8008_v59 }
 0x562   : > { %4209 = vmatmul.bf16.gmra.mxu0 %v4077_v62  ;;  %v3990_v59 = vmul.f32 %v8107_v56, %v3955_v35 }
 0x564   : > { %v4177_v0 = vpop.f32.mrf.mxu0  ;;  %v4025_v41 = vadd.f32 %v8139_v6, %v3990_v59 }
 0x566   : > { %v4057_v47 = vmax.f32 %v4025_v41, 0.0 }
 0x568   : > { %4252 = vadd.xlane.f32.xlu0 %v8153_v28 }
 0x56c   : > { %v4180_v48 = vpop.f32.mrf.mxu0 }
 0x570   : > { %4254 = vadd.xlane.f32.xlu0 %v8157_v32 }
 0x574   : > { %v4182_v59 = vpop.f32.mrf.mxu0 }
 0x59b   : > { %v3532_v5 = vpop.xlane.xlu0 %3531 }
 0x59c   : > { %v3572_v29 = vmul.f32 %v3532_v5, %v7713_v23 }
 0x59e   : > { %v3604_v50 = vadd.f32 1e-05, %v3572_v29 }
 0x5a0   : > { %6289 = vrsqrt.f32 %v3604_v50  ;;  %vm3849_vm9 = vweird.f32 %v3604_v50 }
 0x5a3   : > { %v3534_v13 = vpop.xlane.xlu0 %3533 }
 0x5a4   : > { %v3573_v45 = vmul.f32 %v3534_v13, %v7713_v23 }
 0x5a6   : > { %v6290_v3 = vpop.eup %6289  ;;  %v3605_v63 = vadd.f32 1e-05, %v3573_v45 }
 0x5a7   : > { %v3844_v4 = vmul.f32 %v6290_v3, %v3604_v50  ;;  %vm3850_vm8 = vweird.f32 %v6290_v3 }
 0x5a8   : > { %6291 = vrsqrt.f32 %v3605_v63  ;;  %vm3851_vm10 = vmor %vm3849_vm9, %vm3850_vm8  ;;  %vm3859_vm12 = vweird.f32 %v3605_v63 }
 0x5a9   : > { %v3845_v16 = vmul.f32 %v6290_v3, %v3844_v4 }
 0x5ab   : > { %v3846_v42 = vmul.f32 0.5, %v3845_v16  ;;  %v3536_v11 = vpop.xlane.xlu1 %3535  ;;  %v3381_v31 = vpop.xlane.xlu0 %3380 }
 0x5ac   : > { %v3574_v37 = vmul.f32 %v3536_v11, %v7713_v23  ;;  %v3420_v60 = vmul.f32 %v7713_v23, %v3381_v31 }
 0x5ad   : > { %v3847_v53 = vsub.f32 1.5, %v3846_v42 }
 0x5ae   : > { %v6292_v27 = vpop.eup %6291  ;;  %v3606_v52 = vadd.f32 1e-05, %v3574_v37  ;;  %v8168_v21 = vsub.f32 %v8060_v26, %v3420_v60  ;;  %v8191_v60 = vadd.f32 %v8070_v9, %v4177_v0 }
 0x5af   : > { %v3848_v40 = vmul.f32 %v6290_v3, %v3847_v53  ;;  %v3854_v30 = vmul.f32 %v6292_v27, %v3605_v63  ;;  %vm3860_vm11 = vweird.f32 %v6292_v27 }
 0x5b0   : > { %6293 = vrsqrt.f32 %v3606_v52  ;;  %v3484_v43 = vmul.f32 %v8168_v21, %v8168_v21  ;;  %vm3861_vm13 = vmor %vm3859_vm12, %vm3860_vm11  ;;  %vm3869_vm15 = vweird.f32 %v3606_v52 }
 0x5b1   : > { %v3852_v10 = vsel %vm3851_vm10, %v6290_v3, %v3848_v40  ;;  %v3855_v18 = vmul.f32 %v6292_v27, %v3854_v30 }
 0x5b2   : > { %v3956_v38 = vmul.f32 %v3852_v10, %v8033_v55  ;;  %3547 = vadd.xlane.f32.xlu1 %v3484_v43 }
 0x5b3   : > { %v3856_v17 = vmul.f32 0.5, %v3855_v18  ;;  %v3538_v61 = vpop.xlane.xlu1 %3537  ;;  %v4243_v26 = vpop.xlane.xlu0 %4242 }
 0x5b4   : > { %v3575_v14 = vmul.f32 %v3538_v61, %v7713_v23  ;;  %v4306_v57 = vmul.f32 %v4243_v26, %v7713_v23  ;;  %v3991_v36 = vmul.f32 %v8107_v56, %v3956_v38 }
 0x5b5   : > { %v3857_v62 = vsub.f32 1.5, %v3856_v17 }
 0x5b6   : > { %v6294_v54 = vpop.eup %6293  ;;  %v3607_v44 = vadd.f32 1e-05, %v3575_v14  ;;  %v8179_v46 = vsub.f32 %v8081_v19, %v4306_v57  ;;  %v4026_v55 = vadd.f32 %v8139_v6, %v3991_v36  ;;  %v8207_v14 = vadd.f32 %v8070_v9, %v4180_v48 }
 0x5b7   : > { %v3858_v39 = vmul.f32 %v6292_v27, %v3857_v62  ;;  %v3864_v49 = vmul.f32 %v6294_v54, %v3606_v52  ;;  %vm3870_vm14 = vweird.f32 %v6294_v54 }
 0x5b8   : > { %6295 = vrsqrt.f32 %v3607_v44  ;;  %v4370_v15 = vmul.f32 %v8179_v46, %v8179_v46  ;;  %v4058_v50 = vmax.f32 %v4026_v55, 0.0  ;;  %vm3871_vm0 = vmor %vm3869_vm15, %vm3870_vm14  ;;  %vm3879_vm2 = vweird.f32 %v3607_v44 }
 0x5b9   : > { %v3862_v5 = vsel %vm3861_vm13, %v6292_v27, %v3858_v39  ;;  %v3865_v29 = vmul.f32 %v6294_v54, %v3864_v49 }
 0x5ba   : > { %4402 = vadd.xlane.f32.xlu1 %v4370_v15  ;;  %v4078_v3 = vpack.c.bf16 %v4058_v50, %v4057_v47  ;;  %v3957_v24 = vmul.f32 %v3862_v5, %v8046_v2 }
 0x5bb   : > { %v3866_v13 = vmul.f32 0.5, %v3865_v29  ;;  %v4245_v45 = vpop.xlane.xlu1 %4244  ;;  %v3540_v19 = vpop.xlane.xlu2 %3539 }
 0x5bc   : > { %v4307_v63 = vmul.f32 %v4245_v45, %v7713_v23  ;;  %v3576_v4 = vmul.f32 %v3540_v19, %v7713_v23  ;;  %4214 = vmatmul.bf16.gmra.mxu0 %v4078_v3  ;;  %v3992_v35 = vmul.f32 %v8107_v56, %v3957_v24  ;;  %v4185_v19 = vpop.f32.mrf.mxu0 }
 0x5bd   : > { %v3867_v16 = vsub.f32 1.5, %v3866_v13 }
 0x5be   : > { %v6296_v1 = vpop.eup %6295  ;;  %v8188_v42 = vsub.f32 %v8094_v51, %v4307_v63  ;;  %v3608_v11 = vadd.f32 1e-05, %v3576_v4  ;;  %v4027_v18 = vadd.f32 %v8139_v6, %v3992_v35  ;;  %v8219_v63 = vadd.f32 %v8070_v9, %v4182_v59 }
 0x5bf   : > { %v3868_v31 = vmul.f32 %v6294_v54, %v3867_v16  ;;  %v3874_v37 = vmul.f32 %v6296_v1, %v3607_v44  ;;  %vm3880_vm1 = vweird.f32 %v6296_v1 }
 0x5c0   : > { %6297 = vrsqrt.f32 %v3608_v11  ;;  %v4371_v2 = vmul.f32 %v8188_v42, %v8188_v42  ;;  %vm3881_vm3 = vmor %vm3879_vm2, %vm3880_vm1  ;;  %v4059_v41 = vmax.f32 %v4027_v18, 0.0  ;;  %vm3889_vm5 = vweird.f32 %v3608_v11 }
 0x5c1   : > { %v3872_v53 = vsel %vm3871_vm0, %v6294_v54, %v3868_v31  ;;  %v3875_v27 = vmul.f32 %v6296_v1, %v3874_v37 }
 0x5c2   : > { %v3958_v40 = vmul.f32 %v3872_v53, %v8056_v7  ;;  %4256 = vadd.xlane.f32.xlu1 %v8191_v60  ;;  %4404 = vadd.xlane.f32.xlu2 %v4371_v2 }
 0x5c3   : > { %v3876_v51 = vmul.f32 0.5, %v3875_v27  ;;  %v4247_v52 = vpop.xlane.xlu1 %4246  ;;  %v3542_v30 = vpop.xlane.xlu2 %3541 }
 0x5c4   : > { %v4308_v43 = vmul.f32 %v4247_v52, %v7713_v23  ;;  %v3577_v0 = vmul.f32 %v3542_v30, %v7713_v23  ;;  %v3993_v10 = vmul.f32 %v8107_v56, %v3958_v40  ;;  %v4187_v59 = vpop.f32.mrf.mxu0 }
 0x5c5   : > { %v3877_v38 = vsub.f32 1.5, %v3876_v51 }
 0x5c6   : > { %v6298_v17 = vpop.eup %6297  ;;  %v8203_v7 = vsub.f32 %v8116_v12, %v4308_v43  ;;  %v3609_v61 = vadd.f32 1e-05, %v3577_v0  ;;  %v4028_v26 = vadd.f32 %v8139_v6, %v3993_v10  ;;  %v8236_v43 = vadd.f32 %v8070_v9, %v4185_v19 }
 0x5c7   : > { %v3878_v57 = vmul.f32 %v6296_v1, %v3877_v38  ;;  %v3884_v36 = vmul.f32 %v6298_v17, %v3608_v11  ;;  %vm3890_vm4 = vweird.f32 %v6298_v17 }
 0x5c8   : > { %6299 = vrsqrt.f32 %v3609_v61  ;;  %v4372_v62 = vmul.f32 %v8203_v7, %v8203_v7  ;;  %v4060_v54 = vmax.f32 %v4028_v26, 0.0  ;;  %vm3891_vm6 = vmor %vm3889_vm5, %vm3890_vm4  ;;  %vm3899_vm8 = vweird.f32 %v3609_v61 }
 0x5c9   : > { %v3882_v55 = vsel %vm3881_vm3, %v6296_v1, %v3878_v57  ;;  %v3885_v39 = vmul.f32 %v6298_v17, %v3884_v36 }
 0x5ca   : > { %4258 = vadd.xlane.f32.xlu1 %v8207_v14  ;;  %4406 = vadd.xlane.f32.xlu2 %v4372_v62  ;;  %v4079_v12 = vpack.c.bf16 %v4060_v54, %v4059_v41  ;;  %v3959_v29 = vmul.f32 %v3882_v55, %v8077_v25  ;;  %v8247_v55 = vadd.f32 %v8070_v9, %v4187_v59 }
 0x5cb   : > { %v3886_v49 = vmul.f32 0.5, %v3885_v39  ;;  %v3544_v15 = vpop.xlane.xlu0 %3543  ;;  %v4249_v5 = vpop.xlane.xlu2 %4248 }
 0x5cc   : > { %v3578_v44 = vmul.f32 %v3544_v15, %v7713_v23  ;;  %v4309_v47 = vmul.f32 %v4249_v5, %v7713_v23  ;;  %4219 = vmatmul.bf16.gmra.mxu0 %v4079_v12  ;;  %v3994_v4 = vmul.f32 %v8107_v56, %v3959_v29  ;;  %v4190_v15 = vpop.f32.mrf.mxu0 }
 0x5cd   : > { %v3887_v50 = vsub.f32 1.5, %v3886_v49 }
 0x5ce   : > { %v6300_v48 = vpop.eup %6299  ;;  %v3610_v13 = vadd.f32 1e-05, %v3578_v44  ;;  %v8216_v45 = vsub.f32 %v8129_v33, %v4309_v47  ;;  %v4029_v53 = vadd.f32 %v8139_v6, %v3994_v4 }
 0x5cf   : > { %v3888_v3 = vmul.f32 %v6298_v17, %v3887_v50  ;;  %v3894_v24 = vmul.f32 %v6300_v48, %v3609_v61  ;;  %vm3900_vm7 = vweird.f32 %v6300_v48 }
 0x5d0   : > { %6301 = vrsqrt.f32 %v3610_v13  ;;  %v4373_v25 = vmul.f32 %v8216_v45, %v8216_v45  ;;  %vm3901_vm9 = vmor %vm3899_vm8, %vm3900_vm7  ;;  %v4061_v10 = vmax.f32 %v4029_v53, 0.0  ;;  %vm3909_vm11 = vweird.f32 %v3610_v13  ;;  %v6116_v53 = vld [vmem:[#allocation8 + $0x20] sm:$0xff] }
 0x5d1   : > { %v3892_v16 = vsel %vm3891_vm6, %v6298_v17, %v3888_v3  ;;  %v3895_v1 = vmul.f32 %v6300_v48, %v3894_v24 }
 0x5d2   : > { %v3960_v31 = vmul.f32 %v3892_v16, %v8091_v34  ;;  %4260 = vadd.xlane.f32.xlu2 %v8219_v63  ;;  %4408 = vadd.xlane.f32.xlu0 %v4373_v25 }
 0x5d3   : > { %v3896_v33 = vmul.f32 0.5, %v3895_v1  ;;  %v8226_v11 = vpop.xlane.xlu0 %3545  ;;  %v4251_v37 = vpop.xlane.xlu2 %4250 }
 0x5d4   : > { %v4310_v2 = vmul.f32 %v4251_v37, %v7713_v23  ;;  %v3995_v35 = vmul.f32 %v8107_v56, %v3960_v31  ;;  %v4192_v24 = vpop.f32.mrf.mxu0  ;;  %v3579_v16 = vmul.f32 %v8226_v11, %v7713_v23  ;;  %v6119_v31 = vld [vmem:[#allocation8 + $0x38] sm:$0xff]  ;;  %v6114_v11 = vld [vmem:[#allocation8 + $0x10] sm:$0xff] }
 0x5d5   : > { %v3897_v27 = vsub.f32 1.5, %v3896_v33  ;;  %v8268_v25 = vadd.f32 %v8070_v9, %v4192_v24  ;;  %5068 = vmatpush.bf16.msra.mxu1 %v6119_v31  ;;  %v6118_v33 = vld [vmem:[#allocation8 + $0x30] sm:$0xff] }
 0x5d6   : > { %v6302_v40 = vpop.eup %6301  ;;  %v8232_v51 = vsub.f32 %v8147_v20, %v4310_v2  ;;  %v4030_v34 = vadd.f32 %v8139_v6, %v3995_v35  ;;  %v3611_v1 = vadd.f32 1e-05, %v3579_v16  ;;  %v6117_v2 = vld [vmem:[#allocation8 + $0x28] sm:$0xff] }
 0x5d7   : > { %v3898_v52 = vmul.f32 %v6300_v48, %v3897_v27  ;;  %v3904_v30 = vmul.f32 %v6302_v40, %v3610_v13  ;;  %vm3910_vm10 = vweird.f32 %v6302_v40 }
 0x5d8   : > { %v4374_v0 = vmul.f32 %v8232_v51, %v8232_v51  ;;  %v4062_v18 = vmax.f32 %v4030_v34, 0.0  ;;  %vm3911_vm12 = vmor %vm3909_vm11, %vm3910_vm10  ;;  %6303 = vrsqrt.f32 %v3611_v1  ;;  %vm3919_vm14 = vweird.f32 %v3611_v1 }
 0x5d9   : > { %v3902_v38 = vsel %vm3901_vm9, %v6300_v48, %v3898_v52  ;;  %v3905_v17 = vmul.f32 %v6302_v40, %v3904_v30  ;;  %v8262_v48 = vadd.f32 %v8070_v9, %v4190_v15  ;;  %5069 = vmatpush.bf16.msra.mxu1 %v6118_v33  ;;  %v6115_v52 = vld [vmem:[#allocation8 + $0x18] sm:$0xff] }
 0x5da   : > { %4262 = vadd.xlane.f32.xlu2 %v8236_v43  ;;  %4410 = vadd.xlane.f32.xlu0 %v4374_v0  ;;  %v4080_v20 = vpack.c.bf16 %v4062_v18, %v4061_v10  ;;  %v3961_v61 = vmul.f32 %v3902_v38, %v8112_v58  ;;  %v6113_v38 = vld [vmem:[#allocation8 + $0x8] sm:$0xff] }
 0x5db   : > { %v3906_v26 = vmul.f32 0.5, %v3905_v17  ;;  %v4253_v57 = vpop.xlane.xlu0 %4252 }
 0x5dc   : > { %v4311_v36 = vmul.f32 %v4253_v57, %v7713_v23  ;;  %4224 = vmatmul.bf16.gmra.mxu0 %v4080_v20  ;;  %v3996_v12 = vmul.f32 %v8107_v56, %v3961_v61  ;;  %v6112_v61 = vld [vmem:[#allocation8] sm:$0xff] }
 0x5dd   : > { %v3907_v62 = vsub.f32 1.5, %v3906_v26  ;;  %5070 = vmatpush.bf16.msra.mxu1 %v6117_v2 }
 0x5de   : > { %v8244_v41 = vsub.f32 %v8153_v28, %v4311_v36  ;;  %v4031_v44 = vadd.f32 %v8139_v6, %v3996_v12  ;;  %v6304_v37 = vpop.eup %6303 }
 0x5df   : > { %v3908_v54 = vmul.f32 %v6302_v40, %v3907_v62  ;;  %v3914_v35 = vmul.f32 %v6304_v37, %v3611_v1  ;;  %vm3920_vm13 = vweird.f32 %v6304_v37 }
 0x5e0   : > { %v4375_v39 = vmul.f32 %v8244_v41, %v8244_v41  ;;  %v4063_v13 = vmax.f32 %v4031_v44, 0.0  ;;  %vm3921_vm15 = vmor %vm3919_vm14, %vm3920_vm13 }
 0x5e1   : > { %v3912_v58 = vsel %vm3911_vm12, %v6302_v40, %v3908_v54  ;;  %v3915_v27 = vmul.f32 %v6304_v37, %v3914_v35  ;;  %5071 = vmatpush.bf16.msra.mxu1 %v6116_v53 }
 0x5e2   : > { %v3962_v49 = vmul.f32 %v3912_v58, %v8124_v22  ;;  %4412 = vadd.xlane.f32.xlu1 %v4375_v39  ;;  %4264 = vadd.xlane.f32.xlu0 %v8247_v55 }
 0x5e3   : > { %v4255_v28 = vpop.xlane.xlu0 %4254  ;;  %v3916_v30 = vmul.f32 0.5, %v3915_v27 }
 0x5e4   : > { %v4312_v5 = vmul.f32 %v4255_v28, %v7713_v23  ;;  %v3997_v29 = vmul.f32 %v8107_v56, %v3962_v49 }
 0x5e5   : > { %5072 = vmatpush.bf16.msra.mxu1 %v6115_v52  ;;  %v3917_v10 = vsub.f32 1.5, %v3916_v30 }
 0x5e6   : > { %v8258_v47 = vsub.f32 %v8157_v32, %v4312_v5  ;;  %v4032_v50 = vadd.f32 %v8139_v6, %v3997_v29  ;;  %v4195_v32 = vpop.f32.mrf.mxu0 }
 0x5e7   : > { %v8272_v4 = vadd.f32 %v8070_v9, %v4195_v32  ;;  %v3918_v17 = vmul.f32 %v6304_v37, %v3917_v10 }
 0x5e8   : > { %v4376_v22 = vmul.f32 %v8258_v47, %v8258_v47  ;;  %v4064_v19 = vmax.f32 %v4032_v50, 0.0 }
 0x5e9   : > { %5073 = vmatpush.bf16.msra.mxu1 %v6114_v11  ;;  %v3922_v36 = vsel %vm3921_vm15, %v6304_v37, %v3918_v17 }
 0x5ea   : > { %4414 = vadd.xlane.f32.xlu1 %v4376_v22  ;;  %4266 = vadd.xlane.f32.xlu0 %v8262_v48  ;;  %v4081_v3 = vpack.c.bf16 %v4064_v19, %v4063_v13  ;;  %v3963_v58 = vmul.f32 %v3922_v36, %v8143_v8 }
 0x5ec   : > { %4229 = vmatmul.bf16.gmra.mxu0 %v4081_v3  ;;  %v3998_v19 = vmul.f32 %v8107_v56, %v3963_v58 }
 0x5ed   : > { %5074 = vmatpush.bf16.msra.mxu1 %v6113_v38 }
 0x5ee   : > { %v4197_v13 = vpop.f32.mrf.mxu0  ;;  %v4033_v2 = vadd.f32 %v8139_v6, %v3998_v19 }
 0x5ef   : > { %v8311_v58 = vadd.f32 %v8070_v9, %v4197_v13 }
 0x5f1   : > { %5075 = vmatpush.bf16.msra.mxu1 %v6112_v61 }
 0x5f2   : > { %4268 = vadd.xlane.f32.xlu1 %v8268_v25 }
 0x5fa   : > { %4270 = vadd.xlane.f32.xlu1 %v8272_v4 }
 0x625   : > { %v3548_v40 = vpop.xlane.xlu1 %3547 }
 0x626   : > { %v3580_v34 = vmul.f32 %v3548_v40, %v7713_v23 }
 0x628   : > { %v3612_v0 = vadd.f32 1e-05, %v3580_v34 }
 0x62a   : > { %6305 = vrsqrt.f32 %v3612_v0  ;;  %vm3929_vm1 = vweird.f32 %v3612_v0 }
 0x62d   : > { %v4403_v18 = vpop.xlane.xlu1 %4402 }
 0x62e   : > { %v4466_v59 = vmul.f32 %v4403_v18, %v7713_v23  ;;  %v4200_v18 = vpop.f32.mrf.mxu0 }
 0x630   : > { %v6306_v20 = vpop.eup %6305  ;;  %v4498_v26 = vadd.f32 1e-05, %v4466_v59 }
 0x631   : > { %v3924_v57 = vmul.f32 %v6306_v20, %v3612_v0  ;;  %vm3930_vm0 = vweird.f32 %v6306_v20 }
 0x632   : > { %6307 = vrsqrt.f32 %v4498_v26  ;;  %vm3931_vm2 = vmor %vm3929_vm1, %vm3930_vm0  ;;  %vm4536_vm4 = vweird.f32 %v4498_v26 }
 0x633   : > { %v3925_v62 = vmul.f32 %v6306_v20, %v3924_v57 }
 0x635   : > { %v3926_v54 = vmul.f32 0.5, %v3925_v62  ;;  %v4257_v39 = vpop.xlane.xlu1 %4256  ;;  %v4405_v12 = vpop.xlane.xlu2 %4404 }
 0x636   : > { %v4313_v49 = vmul.f32 %v4257_v39, %v7713_v23  ;;  %v4467_v15 = vmul.f32 %v4405_v12, %v7713_v23 }
 0x637   : > { %v3927_v28 = vsub.f32 1.5, %v3926_v54 }
 0x638   : > { %v6308_v5 = vpop.eup %6307  ;;  %v8283_v29 = vsub.f32 %v8191_v60, %v4313_v49  ;;  %v4499_v44 = vadd.f32 1e-05, %v4467_v15 }
 0x639   : > { %v3928_v50 = vmul.f32 %v6306_v20, %v3927_v28  ;;  %v4531_v22 = vmul.f32 %v6308_v5, %v4498_v26  ;;  %vm4537_vm3 = vweird.f32 %v6308_v5 }
 0x63a   : > { %6309 = vrsqrt.f32 %v4499_v44  ;;  %v4377_v8 = vmul.f32 %v8283_v29, %v8283_v29  ;;  %vm4538_vm5 = vmor %vm4536_vm4, %vm4537_vm3  ;;  %vm4546_vm7 = vweird.f32 %v4499_v44 }
 0x63b   : > { %v3932_v3 = vsel %vm3931_vm2, %v6306_v20, %v3928_v50  ;;  %v4532_v24 = vmul.f32 %v6308_v5, %v4531_v22 }
 0x63c   : > { %v3964_v32 = vmul.f32 %v3932_v3, %v8168_v21  ;;  %4416 = vadd.xlane.f32.xlu2 %v4377_v8 }
 0x63d   : > { %v4533_v16 = vmul.f32 0.5, %v4532_v24  ;;  %v4259_v60 = vpop.xlane.xlu1 %4258  ;;  %v4407_v1 = vpop.xlane.xlu2 %4406 }
 0x63e   : > { %v4314_v31 = vmul.f32 %v4259_v60, %v7713_v23  ;;  %v4468_v33 = vmul.f32 %v4407_v1, %v7713_v23  ;;  %v3999_v37 = vmul.f32 %v8107_v56, %v3964_v32  ;;  %v4065_v56 = vmax.f32 %v4033_v2, 0.0  ;;  %v4202_v24 = vpop.f32.mrf.mxu0 }
 0x63f   : > { %v4534_v35 = vsub.f32 1.5, %v4533_v16 }
 0x640   : > { %v6310_v53 = vpop.eup %6309  ;;  %v8294_v27 = vsub.f32 %v8207_v14, %v4314_v31  ;;  %v4500_v40 = vadd.f32 1e-05, %v4468_v33  ;;  %v4034_v21 = vadd.f32 %v8139_v6, %v3999_v37  ;;  %v8302_v6 = vld [vmem:[%s8818_s13] ss:$0 sm:$0xff]  ;;  %v8332_v31 = vadd.f32 %v8070_v9, %v4200_v18 }
 0x641   : > { %v4535_v34 = vmul.f32 %v6308_v5, %v4534_v35  ;;  %v4541_v52 = vmul.f32 %v6310_v53, %v4499_v44  ;;  %vm4547_vm6 = vweird.f32 %v6310_v53 }
 0x642   : > { %6311 = vrsqrt.f32 %v4500_v40  ;;  %v4378_v30 = vmul.f32 %v8294_v27, %v8294_v27  ;;  %v4066_v0 = vmax.f32 %v4034_v21, 0.0  ;;  %vm4548_vm8 = vmor %vm4546_vm7, %vm4547_vm6  ;;  %vm4556_vm10 = vweird.f32 %v4500_v40 }
 0x643   : > { %v4539_v11 = vsel %vm4538_vm5, %v6308_v5, %v4535_v34  ;;  %v4542_v10 = vmul.f32 %v6310_v53, %v4541_v52 }
 0x644   : > { %4418 = vadd.xlane.f32.xlu2 %v4378_v30  ;;  %v4082_v59 = vpack.c.bf16 %v4066_v0, %v4065_v56  ;;  %v4850_v20 = vmul.f32 %v4539_v11, %v8179_v46  ;;  %v8316_v46 = vld [vmem:[%s8819_s14] ss:$0 sm:$0xff] }
 0x645   : > { %v4543_v14 = vmul.f32 0.5, %v4542_v10  ;;  %v4409_v38 = vpop.xlane.xlu0 %4408  ;;  %v4261_v17 = vpop.xlane.xlu2 %4260 }
 0x646   : > { %v4469_v26 = vmul.f32 %v4409_v38, %v7713_v23  ;;  %v4315_v57 = vmul.f32 %v4261_v17, %v7713_v23  ;;  %4234 = vmatmul.bf16.gmra.mxu0 %v4082_v59  ;;  %v4885_v49 = vmul.f32 %v8302_v6, %v4850_v20  ;;  %v4205_v38 = vpop.f32.mrf.mxu0 }
 0x647   : > { %v4544_v61 = vsub.f32 1.5, %v4543_v14 }
 0x648   : > { %v6312_v36 = vpop.eup %6311  ;;  %v4501_v62 = vadd.f32 1e-05, %v4469_v26  ;;  %v8308_v54 = vsub.f32 %v8219_v63, %v4315_v57  ;;  %v4920_v13 = vadd.f32 %v8316_v46, %v4885_v49  ;;  %v8344_v26 = vadd.f32 %v8070_v9, %v4202_v24 }
 0x649   : > { %v4545_v39 = vmul.f32 %v6310_v53, %v4544_v61  ;;  %v4551_v12 = vmul.f32 %v6312_v36, %v4500_v40  ;;  %vm4557_vm9 = vweird.f32 %v6312_v36 }
 0x64a   : > { %6313 = vrsqrt.f32 %v4501_v62  ;;  %v4379_v15 = vmul.f32 %v8308_v54, %v8308_v54  ;;  %vm4558_vm11 = vmor %vm4556_vm10, %vm4557_vm9  ;;  %v4952_v35 = vmax.f32 %v4920_v13, 0.0  ;;  %vm4566_vm13 = vweird.f32 %v4501_v62 }
 0x64b   : > { %v4549_v63 = vsel %vm4548_vm8, %v6310_v53, %v4545_v39  ;;  %v4552_v28 = vmul.f32 %v6312_v36, %v4551_v12 }
 0x64c   : > { %v4851_v5 = vmul.f32 %v4549_v63, %v8188_v42  ;;  %4272 = vadd.xlane.f32.xlu2 %v8311_v58  ;;  %4420 = vadd.xlane.f32.xlu0 %v4379_v15 }
 0x64d   : > { %v4553_v44 = vmul.f32 0.5, %v4552_v28  ;;  %v4411_v50 = vpop.xlane.xlu0 %4410  ;;  %v4263_v22 = vpop.xlane.xlu2 %4262 }
 0x64e   : > { %v4886_v8 = vmul.f32 %v8302_v6, %v4851_v5  ;;  %v4470_v19 = vmul.f32 %v4411_v50, %v7713_v23  ;;  %v4316_v3 = vmul.f32 %v4263_v22, %v7713_v23  ;;  %v8363_v22 = vld [vmem:[%s8817_s12] ss:$0 sm:$0xff] }
 0x64f   : > { %v4554_v32 = vsub.f32 1.5, %v4553_v44  ;;  %v8366_v13 = vadd.f32 %v8363_v22, %v4205_v38 }
 0x650   : > { %v6314_v16 = vpop.eup %6313  ;;  %v4921_v42 = vadd.f32 %v8316_v46, %v4886_v8  ;;  %v4502_v60 = vadd.f32 1e-05, %v4470_v19  ;;  %v8329_v1 = vsub.f32 %v8236_v43, %v4316_v3  ;;  %v4207_v3 = vpop.f32.mrf.mxu0 }
 0x651   : > { %v4555_v33 = vmul.f32 %v6312_v36, %v4554_v32  ;;  %v4561_v37 = vmul.f32 %v6314_v16, %v4501_v62  ;;  %vm4567_vm12 = vweird.f32 %v6314_v16 }
 0x652   : > { %6315 = vrsqrt.f32 %v4502_v60  ;;  %v4380_v2 = vmul.f32 %v8329_v1, %v8329_v1  ;;  %v4953_v53 = vmax.f32 %v4921_v42, 0.0  ;;  %vm4568_vm14 = vmor %vm4566_vm13, %vm4567_vm12  ;;  %vm4576_vm0 = vweird.f32 %v4502_v60 }
 0x653   : > { %v4559_v21 = vsel %vm4558_vm11, %v6312_v36, %v4555_v33  ;;  %v4562_v34 = vmul.f32 %v6314_v16, %v4561_v37 }
 0x654   : > { %4274 = vadd.xlane.f32.xlu2 %v8332_v31  ;;  %4422 = vadd.xlane.f32.xlu0 %v4380_v2  ;;  %v4984_v43 = vpack.c.bf16 %v4953_v53, %v4952_v35  ;;  %v4852_v0 = vmul.f32 %v4559_v21, %v8203_v7  ;;  %v8377_v21 = vadd.f32 %v8363_v22, %v4207_v3 }
 0x655   : > { %v4563_v52 = vmul.f32 0.5, %v4562_v34  ;;  %v4413_v30 = vpop.xlane.xlu1 %4412  ;;  %v4265_v56 = vpop.xlane.xlu0 %4264 }
 0x656   : > { %v4471_v40 = vmul.f32 %v4413_v30, %v7713_v23  ;;  %v4317_v11 = vmul.f32 %v4265_v56, %v7713_v23  ;;  %5076 = vmatmul.bf16.vlgmr.msra.gmra.mxu1 %v4984_v43  ;;  %v4887_v57 = vmul.f32 %v8302_v6, %v4852_v0 }
 0x657   : > { %v4564_v10 = vsub.f32 1.5, %v4563_v52 }
 0x658   : > { %v6316_v18 = vpop.eup %6315  ;;  %v4503_v59 = vadd.f32 1e-05, %v4471_v40  ;;  %v8341_v14 = vsub.f32 %v8247_v55, %v4317_v11  ;;  %v4922_v15 = vadd.f32 %v8316_v46, %v4887_v57  ;;  %v4210_v30 = vpop.f32.mrf.mxu0 }
 0x659   : > { %v4565_v17 = vmul.f32 %v6314_v16, %v4564_v10  ;;  %v4571_v20 = vmul.f32 %v6316_v18, %v4502_v60  ;;  %vm4577_vm15 = vweird.f32 %v6316_v18 }
 0x65a   : > { %6317 = vrsqrt.f32 %v4503_v59  ;;  %v4381_v7 = vmul.f32 %v8341_v14, %v8341_v14  ;;  %vm4578_vm1 = vmor %vm4576_vm0, %vm4577_vm15  ;;  %v4954_v19 = vmax.f32 %v4922_v15, 0.0  ;;  %vm4586_vm3 = vweird.f32 %v4503_v59 }
 0x65b   : > { %v4569_v61 = vsel %vm4568_vm14, %v6314_v16, %v4565_v17  ;;  %v4572_v36 = vmul.f32 %v6316_v18, %v4571_v20 }
 0x65c   : > { %v4853_v39 = vmul.f32 %v4569_v61, %v8216_v45  ;;  %4424 = vadd.xlane.f32.xlu1 %v4381_v7  ;;  %4276 = vadd.xlane.f32.xlu0 %v8344_v26 }
 0x65d   : > { %v4573_v55 = vmul.f32 0.5, %v4572_v36  ;;  %v8351_v62 = vpop.xlane.xlu1 %4414  ;;  %v4267_v12 = vpop.xlane.xlu0 %4266 }
 0x65e   : > { %v4318_v9 = vmul.f32 %v4267_v12, %v7713_v23  ;;  %v4888_v49 = vmul.f32 %v8302_v6, %v4853_v39  ;;  %v4472_v61 = vmul.f32 %v8351_v62, %v7713_v23 }
 0x65f   : > { %v4574_v63 = vsub.f32 1.5, %v4573_v55 }
 0x660   : > { %v6318_v28 = vpop.eup %6317  ;;  %v8357_v5 = vsub.f32 %v8262_v48, %v4318_v9  ;;  %v4923_v45 = vadd.f32 %v8316_v46, %v4888_v49  ;;  %v4212_v20 = vpop.f32.mrf.mxu0  ;;  %v4504_v36 = vadd.f32 1e-05, %v4472_v61 }
 0x661   : > { %v4575_v44 = vmul.f32 %v6316_v18, %v4574_v63  ;;  %v4581_v50 = vmul.f32 %v6318_v28, %v4503_v59  ;;  %vm4587_vm2 = vweird.f32 %v6318_v28  ;;  %v8398_v7 = vadd.f32 %v8363_v22, %v4212_v20 }
 0x662   : > { %v4382_v8 = vmul.f32 %v8357_v5, %v8357_v5  ;;  %v4955_v48 = vmax.f32 %v4923_v45, 0.0  ;;  %vm4588_vm4 = vmor %vm4586_vm3, %vm4587_vm2  ;;  %6319 = vrsqrt.f32 %v4504_v36  ;;  %vm4596_vm6 = vweird.f32 %v4504_v36 }
 0x663   : > { %v4579_v24 = vsel %vm4578_vm1, %v6316_v18, %v4575_v44  ;;  %v4582_v32 = vmul.f32 %v6318_v28, %v4581_v50  ;;  %v8392_v18 = vadd.f32 %v8363_v22, %v4210_v30 }
 0x664   : > { %4426 = vadd.xlane.f32.xlu1 %v4382_v8  ;;  %4278 = vadd.xlane.f32.xlu0 %v8366_v13  ;;  %v4985_v16 = vpack.c.bf16 %v4955_v48, %v4954_v19  ;;  %v4854_v33 = vmul.f32 %v4579_v24, %v8232_v51 }
 0x665   : > { %v4583_v42 = vmul.f32 0.5, %v4582_v32  ;;  %v4269_v60 = vpop.xlane.xlu1 %4268 }
 0x666   : > { %v4319_v37 = vmul.f32 %v4269_v60, %v7713_v23  ;;  %5081 = vmatmul.bf16.gmra.mxu1 %v4985_v16  ;;  %v4889_v43 = vmul.f32 %v8302_v6, %v4854_v33 }
 0x667   : > { %v4584_v2 = vsub.f32 1.5, %v4583_v42 }
 0x668   : > { %v8374_v35 = vsub.f32 %v8268_v25, %v4319_v37  ;;  %v4924_v40 = vadd.f32 %v8316_v46, %v4889_v43  ;;  %v6320_v39 = vpop.eup %6319 }
 0x669   : > { %v4585_v53 = vmul.f32 %v6318_v28, %v4584_v2  ;;  %v4591_v55 = vmul.f32 %v6320_v39, %v4504_v36  ;;  %vm4597_vm5 = vweird.f32 %v6320_v39 }
 0x66a   : > { %v4383_v34 = vmul.f32 %v8374_v35, %v8374_v35  ;;  %v4956_v59 = vmax.f32 %v4924_v40, 0.0  ;;  %vm4598_vm7 = vmor %vm4596_vm6, %vm4597_vm5 }
 0x66b   : > { %v4589_v51 = vsel %vm4588_vm4, %v6318_v28, %v4585_v53  ;;  %v4592_v12 = vmul.f32 %v6320_v39, %v4591_v55 }
 0x66c   : > { %v4855_v52 = vmul.f32 %v4589_v51, %v8244_v41  ;;  %4428 = vadd.xlane.f32.xlu2 %v4383_v34  ;;  %4280 = vadd.xlane.f32.xlu1 %v8377_v21 }
 0x66d   : > { %v4271_v25 = vpop.xlane.xlu1 %4270  ;;  %v4593_v15 = vmul.f32 0.5, %v4592_v12 }
 0x66e   : > { %v4320_v56 = vmul.f32 %v4271_v25, %v7713_v23  ;;  %v4890_v0 = vmul.f32 %v8302_v6, %v4855_v52 }
 0x66f   : > { %v4594_v28 = vsub.f32 1.5, %v4593_v15 }
 0x670   : > { %v8388_v11 = vsub.f32 %v8272_v4, %v4320_v56  ;;  %v4925_v10 = vadd.f32 %v8316_v46, %v4890_v0  ;;  %v4215_v4 = vpop.f32.mrf.mxu0 }
 0x671   : > { %v8402_v57 = vadd.f32 %v8363_v22, %v4215_v4  ;;  %v4595_v8 = vmul.f32 %v6320_v39, %v4594_v28 }
 0x672   : > { %v4384_v41 = vmul.f32 %v8388_v11, %v8388_v11  ;;  %v4957_v38 = vmax.f32 %v4925_v10, 0.0 }
 0x673   : > { %v4599_v3 = vsel %vm4598_vm7, %v6320_v39, %v4595_v8 }
 0x674   : > { %4430 = vadd.xlane.f32.xlu2 %v4384_v41  ;;  %4282 = vadd.xlane.f32.xlu1 %v8392_v18  ;;  %v4986_v17 = vpack.c.bf16 %v4957_v38, %v4956_v59  ;;  %v4856_v33 = vmul.f32 %v4599_v3, %v8258_v47 }
 0x676   : > { %5086 = vmatmul.bf16.gmra.mxu1 %v4986_v17  ;;  %v4891_v47 = vmul.f32 %v8302_v6, %v4856_v33 }
 0x678   : > { %v4217_v52 = vpop.f32.mrf.mxu0  ;;  %v4926_v20 = vadd.f32 %v8316_v46, %v4891_v47 }
 0x67a   : > { %v4958_v15 = vmax.f32 %v4926_v20, 0.0 }
 0x67c   : > { %4284 = vadd.xlane.f32.xlu2 %v8398_v7 }
 0x684   : > { %4286 = vadd.xlane.f32.xlu2 %v8402_v57 }
 0x6af   : > { %v4417_v9 = vpop.xlane.xlu2 %4416 }
 0x6b0   : > { %v4473_v49 = vmul.f32 %v4417_v9, %v7713_v23 }
 0x6b2   : > { %v4505_v63 = vadd.f32 1e-05, %v4473_v49 }
 0x6b4   : > { %6321 = vrsqrt.f32 %v4505_v63  ;;  %vm4606_vm9 = vweird.f32 %v4505_v63 }
 0x6b7   : > { %v4419_v45 = vpop.xlane.xlu2 %4418 }
 0x6b8   : > { %v4474_v44 = vmul.f32 %v4419_v45, %v7713_v23 }
 0x6ba   : > { %v6322_v50 = vpop.eup %6321  ;;  %v4506_v19 = vadd.f32 1e-05, %v4474_v44 }
 0x6bb   : > { %v4601_v62 = vmul.f32 %v6322_v50, %v4505_v63  ;;  %vm4607_vm8 = vweird.f32 %v6322_v50 }
 0x6bc   : > { %6323 = vrsqrt.f32 %v4506_v19  ;;  %vm4608_vm10 = vmor %vm4606_vm9, %vm4607_vm8  ;;  %vm4616_vm12 = vweird.f32 %v4506_v19 }
 0x6bd   : > { %v4602_v48 = vmul.f32 %v6322_v50, %v4601_v62 }
 0x6bf   : > { %v4603_v24 = vmul.f32 0.5, %v4602_v48  ;;  %v4421_v32 = vpop.xlane.xlu0 %4420  ;;  %v4273_v16 = vpop.xlane.xlu2 %4272  ;;  %v8446_v48 = vld [vmem:[%s8864_s0] ss:$0 sm:$0xff] }
 0x6c0   : > { %v4475_v42 = vmul.f32 %v4421_v32, %v7713_v23  ;;  %v4321_v60 = vmul.f32 %v4273_v16, %v7713_v23 }
 0x6c1   : > { %v4604_v37 = vsub.f32 1.5, %v4603_v24 }
 0x6c2   : > { %v6324_v2 = vpop.eup %6323  ;;  %v4507_v53 = vadd.f32 1e-05, %v4475_v42  ;;  %v8413_v34 = vsub.f32 %v8311_v58, %v4321_v60 }
 0x6c3   : > { %v4605_v43 = vmul.f32 %v6322_v50, %v4604_v37  ;;  %v4611_v51 = vmul.f32 %v6324_v2, %v4506_v19  ;;  %vm4617_vm11 = vweird.f32 %v6324_v2 }
 0x6c4   : > { %6325 = vrsqrt.f32 %v4507_v53  ;;  %v4385_v30 = vmul.f32 %v8413_v34, %v8413_v34  ;;  %vm8432_vm13 = vmor %vm4616_vm12, %vm4617_vm11  ;;  %vm4626_vm15 = vweird.f32 %v4507_v53 }
 0x6c5   : > { %v4609_v25 = vsel %vm4608_vm10, %v6322_v50, %v4605_v43  ;;  %v4612_v56 = vmul.f32 %v6324_v2, %v4611_v51 }
 0x6c6   : > { %v4857_v0 = vmul.f32 %v4609_v25, %v8283_v29  ;;  %4432 = vadd.xlane.f32.xlu0 %v4385_v30 }
 0x6c7   : > { %v4613_v40 = vmul.f32 0.5, %v4612_v56  ;;  %v4423_v10 = vpop.xlane.xlu0 %4422  ;;  %v4275_v58 = vpop.xlane.xlu2 %4274 }
 0x6c8   : > { %v4476_v41 = vmul.f32 %v4423_v10, %v7713_v23  ;;  %v4322_v59 = vmul.f32 %v4275_v58, %v7713_v23  ;;  %v4892_v38 = vmul.f32 %v8302_v6, %v4857_v0 }
 0x6c9   : > { %v4614_v17 = vsub.f32 1.5, %v4613_v40 }
 0x6ca   : > { %v6326_v4 = vpop.eup %6325  ;;  %v8423_v61 = vadd.f32 1e-05, %v4476_v41  ;;  %v8426_v29 = vsub.f32 %v8332_v31, %v4322_v59  ;;  %v4927_v36 = vadd.f32 %v8316_v46, %v4892_v38  ;;  %v4220_v31 = vpop.f32.mrf.mxu0 }
 0x6cb   : > { %v4615_v39 = vmul.f32 %v6324_v2, %v4614_v17  ;;  %v4621_v55 = vmul.f32 %v6326_v4, %v4507_v53  ;;  %vm4627_vm14 = vweird.f32 %v6326_v4  ;;  %v8479_v20 = vadd.f32 %v8363_v22, %v4220_v31 }
 0x6cc   : > { %6327 = vrsqrt.f32 %v8423_v61  ;;  %v4386_v12 = vmul.f32 %v8426_v29, %v8426_v29  ;;  %v4959_v63 = vmax.f32 %v4927_v36, 0.0  ;;  %vm4628_vm0 = vmor %vm4626_vm15, %vm4627_vm14  ;;  %vm4636_vm2 = vweird.f32 %v8423_v61 }
 0x6cd   : > { %v4622_v49 = vmul.f32 %v6326_v4, %v4621_v55  ;;  %v4619_v28 = vsel %vm8432_vm13, %v6324_v2, %v4615_v39  ;;  %v8456_v2 = vadd.f32 %v8363_v22, %v4217_v52 }
 0x6ce   : > { %4434 = vadd.xlane.f32.xlu0 %v4386_v12  ;;  %v4987_v8 = vpack.c.bf16 %v4959_v63, %v4958_v15  ;;  %v4858_v3 = vmul.f32 %v4619_v28, %v8294_v27 }
 0x6cf   : > { %v4623_v45 = vmul.f32 0.5, %v4622_v49  ;;  %v4425_v44 = vpop.xlane.xlu1 %4424  ;;  %v4277_v50 = vpop.xlane.xlu0 %4276 }
 0x6d0   : > { %v4477_v19 = vmul.f32 %v4425_v44, %v7713_v23  ;;  %v4323_v62 = vmul.f32 %v4277_v50, %v7713_v23  ;;  %5091 = vmatmul.bf16.gmra.mxu1 %v4987_v8 }
 0x6d1   : > { %v4624_v24 = vsub.f32 1.5, %v4623_v45 }
 0x6d2   : > { %v6328_v32 = vpop.eup %6327  ;;  %v8449_v16 = vadd.f32 1e-05, %v4477_v19  ;;  %v8452_v42 = vsub.f32 %v8344_v26, %v4323_v62  ;;  %v4893_v26 = vmul.f32 %v8302_v6, %v4858_v3  ;;  %v4222_v10 = vpop.f32.mrf.mxu0 }
 0x6d3   : > { %v4625_v60 = vmul.f32 %v6326_v4, %v4624_v24  ;;  %v4631_v33 = vmul.f32 %v6328_v32, %v8423_v61  ;;  %v5077_v37 = vpop.f32.mrf.mxu1  ;;  %vm4637_vm1 = vweird.f32 %v6328_v32 }
 0x6d4   : > { %6329 = vrsqrt.f32 %v8449_v16  ;;  %v5078_v27 = vadd.f32 %v8446_v48, %v5077_v37  ;;  %v4387_v43 = vmul.f32 %v8452_v42, %v8452_v42  ;;  %vm4638_vm3 = vmor %vm4636_vm2, %vm4637_vm1  ;;  %vm4646_vm5 = vweird.f32 %v8449_v16 }
 0x6d5   : > { %v4629_v51 = vsel %vm4628_vm0, %v6326_v4, %v4625_v60  ;;  %v4632_v30 = vmul.f32 %v6328_v32, %v4631_v33  ;;  %v8498_v37 = vadd.f32 %v8363_v22, %v4222_v10 }
 0x6d6   : > { %v4859_v53 = vmul.f32 %v4629_v51, %v8308_v54  ;;  %5157 = vst [vmem:[%s8464_s30] sm:$0xff] %v5078_v27  ;;  %4436 = vadd.xlane.f32.xlu1 %v4387_v43  ;;  %4288 = vadd.xlane.f32.xlu0 %v8456_v2  ;;  %v4928_v54 = vadd.f32 %v8316_v46, %v4893_v26 }
 0x6d7   : > { %v4633_v52 = vmul.f32 0.5, %v4632_v30  ;;  %v4427_v25 = vpop.xlane.xlu1 %4426  ;;  %v4279_v56 = vpop.xlane.xlu0 %4278 }
 0x6d8   : > { %v4478_v47 = vmul.f32 %v4427_v25, %v7713_v23  ;;  %v4324_v0 = vmul.f32 %v4279_v56, %v7713_v23  ;;  %v4894_v40 = vmul.f32 %v8302_v6, %v4859_v53  ;;  %v4960_v9 = vmax.f32 %v4928_v54, 0.0 }
 0x6d9   : > { %v4634_v58 = vsub.f32 1.5, %v4633_v52 }
 0x6da   : > { %v6330_v41 = vpop.eup %6329  ;;  %v8472_v59 = vadd.f32 1e-05, %v4478_v47  ;;  %v8475_v38 = vsub.f32 %v8366_v13, %v4324_v0  ;;  %v4929_v17 = vadd.f32 %v8316_v46, %v4894_v40  ;;  %v4225_v24 = vpop.f32.mrf.mxu0 }
 0x6db   : > { %v4635_v4 = vmul.f32 %v6328_v32, %v4634_v58  ;;  %v4641_v36 = vmul.f32 %v6330_v41, %v8449_v16  ;;  %v5079_v39 = vpop.f32.mrf.mxu1  ;;  %vm4647_vm4 = vweird.f32 %v6330_v41 }
 0x6dc   : > { %6331 = vrsqrt.f32 %v8472_v59  ;;  %v5080_v55 = vadd.f32 %v8446_v48, %v5079_v39  ;;  %v4388_v12 = vmul.f32 %v8475_v38, %v8475_v38  ;;  %v4961_v49 = vmax.f32 %v4929_v17, 0.0  ;;  %vm4648_vm6 = vmor %vm4646_vm5, %vm4647_vm4 }
 0x6dd   : > { %v4642_v13 = vmul.f32 %v6330_v41, %v4641_v36  ;;  %v4639_v15 = vsel %vm4638_vm3, %v6328_v32, %v4635_v4  ;;  %vm4656_vm8 = vweird.f32 %v8472_v59 }
 0x6de   : > { %5158 = vst [vmem:[%s8464_s30 + $0x8] sm:$0xff] %v5080_v55  ;;  %4438 = vadd.xlane.f32.xlu1 %v4388_v12  ;;  %4290 = vadd.xlane.f32.xlu0 %v8479_v20  ;;  %v4988_v61 = vpack.c.bf16 %v4961_v49, %v4960_v9  ;;  %v4860_v50 = vmul.f32 %v4639_v15, %v8329_v1 }
 0x6df   : > { %v4643_v63 = vmul.f32 0.5, %v4642_v13  ;;  %v4281_v31 = vpop.xlane.xlu1 %4280  ;;  %v4429_v28 = vpop.xlane.xlu2 %4428 }
 0x6e0   : > { %v4325_v45 = vmul.f32 %v4281_v31, %v7713_v23  ;;  %v4479_v44 = vmul.f32 %v4429_v28, %v7713_v23  ;;  %5096 = vmatmul.bf16.gmra.mxu1 %v4988_v61  ;;  %v4895_v51 = vmul.f32 %v8302_v6, %v4860_v50 }
 0x6e1   : > { %v4644_v8 = vsub.f32 1.5, %v4643_v63 }
 0x6e2   : > { %v6332_v19 = vpop.eup %6331  ;;  %v8493_v62 = vsub.f32 %v8377_v21, %v4325_v45  ;;  %v4511_v3 = vadd.f32 1e-05, %v4479_v44  ;;  %v4930_v47 = vadd.f32 %v8316_v46, %v4895_v51  ;;  %v4227_v36 = vpop.f32.mrf.mxu0 }
 0x6e3   : > { %v4645_v32 = vmul.f32 %v6330_v41, %v4644_v8  ;;  %v4651_v60 = vmul.f32 %v6332_v19, %v8472_v59  ;;  %v5082_v33 = vpop.f32.mrf.mxu1  ;;  %vm4657_vm7 = vweird.f32 %v6332_v19  ;;  %v8531_v45 = vadd.f32 %v8363_v22, %v4227_v36 }
 0x6e4   : > { %6333 = vrsqrt.f32 %v4511_v3  ;;  %v5083_v1 = vadd.f32 %v8446_v48, %v5082_v33  ;;  %v4389_v21 = vmul.f32 %v8493_v62, %v8493_v62  ;;  %vm4658_vm9 = vmor %vm4656_vm8, %vm4657_vm7  ;;  %v4962_v55 = vmax.f32 %v4930_v47, 0.0 }
 0x6e5   : > { %v4649_v27 = vsel %vm4648_vm6, %v6330_v41, %v4645_v32  ;;  %v4652_v43 = vmul.f32 %v6332_v19, %v4651_v60  ;;  %v8518_v41 = vadd.f32 %v8363_v22, %v4225_v24  ;;  %vm4666_vm11 = vweird.f32 %v4511_v3 }
 0x6e6   : > { %v4861_v30 = vmul.f32 %v4649_v27, %v8341_v14  ;;  %5159 = vst [vmem:[%s8464_s30 + $0x10] sm:$0xff] %v5083_v1  ;;  %4440 = vadd.xlane.f32.xlu2 %v4389_v21  ;;  %4292 = vadd.xlane.f32.xlu1 %v8498_v37 }
 0x6e7   : > { %v4653_v16 = vmul.f32 0.5, %v4652_v43  ;;  %v4283_v26 = vpop.xlane.xlu1 %4282  ;;  %v8507_v53 = vpop.xlane.xlu2 %4430 }
 0x6e8   : > { %v4326_v52 = vmul.f32 %v4283_v26, %v7713_v23  ;;  %v4896_v25 = vmul.f32 %v8302_v6, %v4861_v30 }
 0x6e9   : > { %v4654_v56 = vsub.f32 1.5, %v4653_v16 }
 0x6ea   : > { %v6334_v0 = vpop.eup %6333  ;;  %v8513_v14 = vsub.f32 %v8392_v18, %v4326_v52  ;;  %v4931_v40 = vadd.f32 %v8316_v46, %v4896_v25 }
 0x6eb   : > { %v4655_v10 = vmul.f32 %v6332_v19, %v4654_v56  ;;  %v4661_v58 = vmul.f32 %v6334_v0, %v4511_v3  ;;  %v5084_v54 = vpop.f32.mrf.mxu1  ;;  %vm4667_vm10 = vweird.f32 %v6334_v0  ;;  %v4480_v56 = vmul.f32 %v8507_v53, %v7713_v23 }
 0x6ec   : > { %v5085_v17 = vadd.f32 %v8446_v48, %v5084_v54  ;;  %v4390_v4 = vmul.f32 %v8513_v14, %v8513_v14  ;;  %v4963_v12 = vmax.f32 %v4931_v40, 0.0  ;;  %vm4668_vm12 = vmor %vm4666_vm11, %vm4667_vm10 }
 0x6ed   : > { %v4659_v39 = vsel %vm4658_vm9, %v6332_v19, %v4655_v10  ;;  %v4662_v18 = vmul.f32 %v6334_v0, %v4661_v58  ;;  %v4512_v47 = vadd.f32 1e-05, %v4480_v56 }
 0x6ee   : > { %5160 = vst [vmem:[%s8464_s30 + $0x18] sm:$0xff] %v5085_v17  ;;  %4442 = vadd.xlane.f32.xlu2 %v4390_v4  ;;  %4294 = vadd.xlane.f32.xlu1 %v8518_v41  ;;  %v4989_v9 = vpack.c.bf16 %v4963_v12, %v4962_v55  ;;  %v4862_v49 = vmul.f32 %v4659_v39, %v8357_v5 }
 0x6ef   : > { %v4663_v59 = vmul.f32 0.5, %v4662_v18  ;;  %v4285_v13 = vpop.xlane.xlu2 %4284  ;;  %6335 = vrsqrt.f32 %v4512_v47  ;;  %vm4676_vm14 = vweird.f32 %v4512_v47 }
 0x6f0   : > { %v4327_v15 = vmul.f32 %v4285_v13, %v7713_v23  ;;  %5101 = vmatmul.bf16.gmra.mxu1 %v4989_v9  ;;  %v4897_v50 = vmul.f32 %v8302_v6, %v4862_v49 }
 0x6f1   : > { %v4664_v63 = vsub.f32 1.5, %v4663_v59 }
 0x6f2   : > { %v8528_v31 = vsub.f32 %v8398_v7, %v4327_v15  ;;  %v4230_v7 = vpop.f32.mrf.mxu0  ;;  %v4932_v60 = vadd.f32 %v8316_v46, %v4897_v50 }
 0x6f3   : > { %v4665_v28 = vmul.f32 %v6334_v0, %v4664_v63  ;;  %v5087_v61 = vpop.f32.mrf.mxu1 }
 0x6f4   : > { %v5088_v44 = vadd.f32 %v8446_v48, %v5087_v61  ;;  %v4391_v5 = vmul.f32 %v8528_v31, %v8528_v31  ;;  %v4964_v51 = vmax.f32 %v4932_v60, 0.0 }
 0x6f5   : > { %v4669_v8 = vsel %vm4668_vm12, %v6334_v0, %v4665_v28  ;;  %v6336_v0 = vpop.eup %6335 }
 0x6f6   : > { %v4863_v19 = vmul.f32 %v4669_v8, %v8374_v35  ;;  %5161 = vst [vmem:[%s8464_s30 + $0x20] sm:$0xff] %v5088_v44  ;;  %4296 = vadd.xlane.f32.xlu2 %v8531_v45  ;;  %4444 = vadd.xlane.f32.xlu0 %v4391_v5  ;;  %v8548_v35 = vadd.f32 %v8363_v22, %v4230_v7  ;;  %vm4677_vm13 = vweird.f32 %v6336_v0 }
 0x6f7   : > { %v4287_v3 = vpop.xlane.xlu2 %4286  ;;  %v4671_v40 = vmul.f32 %v6336_v0, %v4512_v47  ;;  %vm4678_vm15 = vmor %vm4676_vm14, %vm4677_vm13 }
 0x6f8   : > { %v4328_v24 = vmul.f32 %v4287_v3, %v7713_v23  ;;  %v4898_v32 = vmul.f32 %v8302_v6, %v4863_v19 }
 0x6f9   : > { %v4672_v10 = vmul.f32 %v6336_v0, %v4671_v40 }
 0x6fa   : > { %v8544_v33 = vsub.f32 %v8402_v57, %v4328_v24  ;;  %v4933_v1 = vadd.f32 %v8316_v46, %v4898_v32  ;;  %v4232_v57 = vpop.f32.mrf.mxu0 }
 0x6fb   : > { %v5089_v21 = vpop.f32.mrf.mxu1  ;;  %v8556_v26 = vadd.f32 %v8363_v22, %v4232_v57  ;;  %v4673_v17 = vmul.f32 0.5, %v4672_v10 }
 0x6fc   : > { %v5090_v27 = vadd.f32 %v8446_v48, %v5089_v21  ;;  %v4392_v43 = vmul.f32 %v8544_v33, %v8544_v33  ;;  %v4965_v30 = vmax.f32 %v4933_v1, 0.0 }
 0x6fd   : > { %v4674_v36 = vsub.f32 1.5, %v4673_v17 }
 0x6fe   : > { %5162 = vst [vmem:[%s8464_s30 + $0x28] sm:$0xff] %v5090_v27  ;;  %4298 = vadd.xlane.f32.xlu2 %v8548_v35  ;;  %4446 = vadd.xlane.f32.xlu0 %v4392_v43  ;;  %v4990_v16 = vpack.c.bf16 %v4965_v30, %v4964_v51 }
 0x6ff   : > { %v4675_v55 = vmul.f32 %v6336_v0, %v4674_v36 }
 0x700   : > { %5106 = vmatmul.bf16.gmra.mxu1 %v4990_v16 }
 0x701   : > { %v4679_v13 = vsel %vm4678_vm15, %v6336_v0, %v4675_v55 }
 0x702   : > { %v4235_v52 = vpop.f32.mrf.mxu0  ;;  %v4864_v28 = vmul.f32 %v4679_v13, %v8388_v11 }
 0x703   : > { %v8560_v25 = vadd.f32 %v8363_v22, %v4235_v52 }
 0x704   : > { %v4899_v32 = vmul.f32 %v8302_v6, %v4864_v28 }
 0x706   : > { %4300 = vadd.xlane.f32.xlu0 %v8556_v26  ;;  %v4934_v52 = vadd.f32 %v8316_v46, %v4899_v32 }
 0x70e   : > { %4302 = vadd.xlane.f32.xlu0 %v8560_v25 }
 0x739   : > { %v4433_v58 = vpop.xlane.xlu0 %4432 }
 0x73a   : > { %v4481_v54 = vmul.f32 %v4433_v58, %v7713_v23 }
 0x73c   : > { %v4513_v4 = vadd.f32 1e-05, %v4481_v54 }
 0x73e   : > { %6337 = vrsqrt.f32 %v4513_v4  ;;  %vm4686_vm1 = vweird.f32 %v4513_v4 }
 0x741   : > { %v4435_v39 = vpop.xlane.xlu0 %4434 }
 0x742   : > { %v4482_v18 = vmul.f32 %v4435_v39, %v7713_v23 }
 0x744   : > { %v6338_v12 = vpop.eup %6337  ;;  %v4514_v59 = vadd.f32 1e-05, %v4482_v18 }
 0x745   : > { %v4681_v53 = vmul.f32 %v6338_v12, %v4513_v4  ;;  %vm4687_vm0 = vweird.f32 %v6338_v12  ;;  %v4966_v4 = vmax.f32 %v4934_v52, 0.0 }
 0x746   : > { %6339 = vrsqrt.f32 %v4514_v59  ;;  %vm4688_vm2 = vmor %vm4686_vm1, %vm4687_vm0  ;;  %vm4696_vm4 = vweird.f32 %v4514_v59 }
 0x747   : > { %v4682_v9 = vmul.f32 %v6338_v12, %v4681_v53 }
 0x749   : > { %v4683_v49 = vmul.f32 0.5, %v4682_v9  ;;  %v4437_v15 = vpop.xlane.xlu1 %4436  ;;  %v4289_v63 = vpop.xlane.xlu0 %4288 }
 0x74a   : > { %v4483_v61 = vmul.f32 %v4437_v15, %v7713_v23  ;;  %v4329_v44 = vmul.f32 %v4289_v63, %v7713_v23  ;;  %v4237_v15 = vpop.f32.mrf.mxu0 }
 0x74b   : > { %v4684_v5 = vsub.f32 1.5, %v4683_v49 }
 0x74c   : > { %v6340_v50 = vpop.eup %6339  ;;  %v4515_v8 = vadd.f32 1e-05, %v4483_v61  ;;  %v8571_v19 = vsub.f32 %v8456_v2, %v4329_v44 }
 0x74d   : > { %v4685_v7 = vmul.f32 %v6338_v12, %v4684_v5  ;;  %v4691_v3 = vmul.f32 %v6340_v50, %v4514_v59  ;;  %v5092_v24 = vpop.f32.mrf.mxu1  ;;  %vm4697_vm3 = vweird.f32 %v6340_v50 }
 0x74e   : > { %6341 = vrsqrt.f32 %v4515_v8  ;;  %v4393_v11 = vmul.f32 %v8571_v19, %v8571_v19  ;;  %v5093_v21 = vadd.f32 %v8446_v48, %v5092_v24  ;;  %vm4698_vm5 = vmor %vm4696_vm4, %vm4697_vm3  ;;  %vm4706_vm7 = vweird.f32 %v4515_v8 }
 0x74f   : > { %v4689_v60 = vsel %vm4688_vm2, %v6338_v12, %v4685_v7  ;;  %v4692_v1 = vmul.f32 %v6340_v50, %v4691_v3 }
 0x750   : > { %v4865_v27 = vmul.f32 %v4689_v60, %v8413_v34  ;;  %4448 = vadd.xlane.f32.xlu1 %v4393_v11  ;;  %5163 = vst [vmem:[%s8464_s30 + $0x30] sm:$0xff] %v5093_v21 }
 0x751   : > { %v4693_v2 = vmul.f32 0.5, %v4692_v1  ;;  %v4439_v43 = vpop.xlane.xlu1 %4438  ;;  %v4291_v51 = vpop.xlane.xlu0 %4290 }
 0x752   : > { %v4484_v30 = vmul.f32 %v4439_v43, %v7713_v23  ;;  %v4330_v16 = vmul.f32 %v4291_v51, %v7713_v23  ;;  %v4900_v57 = vmul.f32 %v8302_v6, %v4865_v27 }
 0x753   : > { %v4694_v56 = vsub.f32 1.5, %v4693_v2 }
 0x754   : > { %v6342_v47 = vpop.eup %6341  ;;  %v8583_v0 = vadd.f32 1e-05, %v4484_v30  ;;  %v8586_v34 = vsub.f32 %v8479_v20, %v4330_v16  ;;  %v4935_v40 = vadd.f32 %v8316_v46, %v4900_v57 }
 0x755   : > { %v4695_v10 = vmul.f32 %v6340_v50, %v4694_v56  ;;  %v4701_v58 = vmul.f32 %v6342_v47, %v4515_v8  ;;  %v5094_v54 = vpop.f32.mrf.mxu1  ;;  %vm4707_vm6 = vweird.f32 %v6342_v47 }
 0x756   : > { %6343 = vrsqrt.f32 %v8583_v0  ;;  %v4394_v17 = vmul.f32 %v8586_v34, %v8586_v34  ;;  %v4967_v36 = vmax.f32 %v4935_v40, 0.0  ;;  %v5095_v20 = vadd.f32 %v8446_v48, %v5094_v54  ;;  %vm4708_vm8 = vmor %vm4706_vm7, %vm4707_vm6 }
 0x757   : > { %v4699_v39 = vsel %vm4698_vm5, %v6340_v50, %v4695_v10  ;;  %v4702_v18 = vmul.f32 %v6342_v47, %v4701_v58  ;;  %vm4716_vm10 = vweird.f32 %v8583_v0 }
 0x758   : > { %4450 = vadd.xlane.f32.xlu1 %v4394_v17  ;;  %v4991_v55 = vpack.c.bf16 %v4967_v36, %v4966_v4  ;;  %5164 = vst [vmem:[%s8464_s30 + $0x38] sm:$0xff] %v5095_v20  ;;  %v4866_v13 = vmul.f32 %v4699_v39, %v8426_v29  ;;  %v8602_v29 = vadd.f32 %v8363_v22, %v4237_v15 }
 0x759   : > { %v4703_v12 = vmul.f32 0.5, %v4702_v18  ;;  %v4293_v53 = vpop.xlane.xlu1 %4292  ;;  %v4441_v59 = vpop.xlane.xlu2 %4440 }
 0x75a   : > { %v4331_v9 = vmul.f32 %v4293_v53, %v7713_v23  ;;  %v4485_v49 = vmul.f32 %v4441_v59, %v7713_v23  ;;  %5111 = vmatmul.bf16.gmra.mxu1 %v4991_v55  ;;  %v4901_v24 = vmul.f32 %v8302_v6, %v4866_v13 }
 0x75b   : > { %v4704_v63 = vsub.f32 1.5, %v4703_v12 }
 0x75c   : > { %v6344_v28 = vpop.eup %6343  ;;  %v8598_v61 = vsub.f32 %v8498_v37, %v4331_v9  ;;  %v4517_v44 = vadd.f32 1e-05, %v4485_v49  ;;  %v4936_v43 = vadd.f32 %v8316_v46, %v4901_v24  ;;  %v8635_v49 = vld [vmem:[%s8818_s13] ss:$0 sm:$0xff] }
 0x75d   : > { %v4705_v5 = vmul.f32 %v6342_v47, %v4704_v63  ;;  %v4711_v50 = vmul.f32 %v6344_v28, %v8583_v0  ;;  %v5097_v7 = vpop.f32.mrf.mxu1  ;;  %vm4717_vm9 = vweird.f32 %v6344_v28 }
 0x75e   : > { %6345 = vrsqrt.f32 %v4517_v44  ;;  %v4395_v3 = vmul.f32 %v8598_v61, %v8598_v61  ;;  %v5098_v32 = vadd.f32 %v8446_v48, %v5097_v7  ;;  %vm4718_vm11 = vmor %vm4716_vm10, %vm4717_vm9  ;;  %v4968_v40 = vmax.f32 %v4936_v43, 0.0 }
 0x75f   : > { %v4709_v11 = vsel %vm4708_vm8, %v6342_v47, %v4705_v5  ;;  %v4712_v37 = vmul.f32 %v6344_v28, %v4711_v50  ;;  %vm4726_vm13 = vweird.f32 %v4517_v44 }
 0x760   : > { %v4867_v60 = vmul.f32 %v4709_v11, %v8452_v42  ;;  %4452 = vadd.xlane.f32.xlu2 %v4395_v3  ;;  %4304 = vadd.xlane.f32.xlu1 %v8602_v29  ;;  %5165 = vst [vmem:[%s8464_s30 + $0x40] sm:$0xff] %v5098_v32  ;;  %v8646_v11 = vld [vmem:[%s8819_s14] ss:$0 sm:$0xff] }
 0x761   : > { %v4713_v8 = vmul.f32 0.5, %v4712_v37  ;;  %v4295_v22 = vpop.xlane.xlu1 %4294  ;;  %v4443_v1 = vpop.xlane.xlu2 %4442 }
 0x762   : > { %v4332_v21 = vmul.f32 %v4295_v22, %v7713_v23  ;;  %v4486_v27 = vmul.f32 %v4443_v1, %v7713_v23  ;;  %v4902_v2 = vmul.f32 %v8302_v6, %v4867_v60 }
 0x763   : > { %v4714_v51 = vsub.f32 1.5, %v4713_v8 }
 0x764   : > { %v6346_v30 = vpop.eup %6345  ;;  %v8616_v42 = vsub.f32 %v8518_v41, %v4332_v21  ;;  %v4518_v16 = vadd.f32 1e-05, %v4486_v27  ;;  %v4937_v57 = vadd.f32 %v8316_v46, %v4902_v2 }
 0x765   : > { %v4715_v52 = vmul.f32 %v6344_v28, %v4714_v51  ;;  %v4721_v56 = vmul.f32 %v6346_v30, %v4517_v44  ;;  %v5099_v47 = vpop.f32.mrf.mxu1  ;;  %vm4727_vm12 = vweird.f32 %v6346_v30 }
 0x766   : > { %6347 = vrsqrt.f32 %v4518_v16  ;;  %v4396_v6 = vmul.f32 %v8616_v42, %v8616_v42  ;;  %v4969_v10 = vmax.f32 %v4937_v57, 0.0  ;;  %v5100_v41 = vadd.f32 %v8446_v48, %v5099_v47  ;;  %vm4728_vm14 = vmor %vm4726_vm13, %vm4727_vm12 }
 0x767   : > { %v4719_v58 = vsel %vm4718_vm11, %v6344_v28, %v4715_v52  ;;  %v4722_v54 = vmul.f32 %v6346_v30, %v4721_v56  ;;  %vm4736_vm0 = vweird.f32 %v4518_v16 }
 0x768   : > { %4454 = vadd.xlane.f32.xlu2 %v4396_v6  ;;  %v4992_v17 = vpack.c.bf16 %v4969_v10, %v4968_v40  ;;  %5166 = vst [vmem:[%s8464_s30 + $0x48] sm:$0xff] %v5100_v41  ;;  %v4868_v0 = vmul.f32 %v4719_v58, %v8475_v38 }
 0x769   : > { %v4723_v46 = vmul.f32 0.5, %v4722_v54  ;;  %v4445_v4 = vpop.xlane.xlu0 %4444  ;;  %v4297_v36 = vpop.xlane.xlu2 %4296 }
 0x76a   : > { %v4487_v39 = vmul.f32 %v4445_v4, %v7713_v23  ;;  %v4333_v18 = vmul.f32 %v4297_v36, %v7713_v23  ;;  %5116 = vmatmul.bf16.gmra.mxu1 %v4992_v17  ;;  %v4903_v15 = vmul.f32 %v8635_v49, %v4868_v0 }
 0x76b   : > { %v4724_v20 = vsub.f32 1.5, %v4723_v46 }
 0x76c   : > { %v6348_v55 = vpop.eup %6347  ;;  %v4519_v12 = vadd.f32 1e-05, %v4487_v39  ;;  %v8628_v53 = vsub.f32 %v8531_v45, %v4333_v18  ;;  %v4938_v37 = vadd.f32 %v8646_v11, %v4903_v15 }
 0x76d   : > { %v4725_v59 = vmul.f32 %v6346_v30, %v4724_v20  ;;  %v4731_v13 = vmul.f32 %v6348_v55, %v4518_v16  ;;  %v5102_v9 = vpop.f32.mrf.mxu1  ;;  %vm4737_vm15 = vweird.f32 %v6348_v55 }
 0x76e   : > { %6349 = vrsqrt.f32 %v4519_v12  ;;  %v4397_v38 = vmul.f32 %v8628_v53, %v8628_v53  ;;  %v5103_v28 = vadd.f32 %v8446_v48, %v5102_v9  ;;  %vm4738_vm1 = vmor %vm4736_vm0, %vm4737_vm15  ;;  %v4970_v2 = vmax.f32 %v4938_v37, 0.0 }
 0x76f   : > { %v4729_v63 = vsel %vm4728_vm14, %v6346_v30, %v4725_v59  ;;  %v4732_v45 = vmul.f32 %v6348_v55, %v4731_v13  ;;  %vm4746_vm3 = vweird.f32 %v4519_v12 }
 0x770   : > { %v4869_v44 = vmul.f32 %v4729_v63, %v8493_v62  ;;  %4456 = vadd.xlane.f32.xlu0 %v4397_v38  ;;  %5167 = vst [vmem:[%s8464_s30 + $0x50] sm:$0xff] %v5103_v28 }
 0x771   : > { %v4733_v5 = vmul.f32 0.5, %v4732_v45  ;;  %v4447_v50 = vpop.xlane.xlu0 %4446  ;;  %v4299_v7 = vpop.xlane.xlu2 %4298 }
 0x772   : > { %v4334_v3 = vmul.f32 %v4299_v7, %v7713_v23  ;;  %v4904_v24 = vmul.f32 %v8635_v49, %v4869_v44  ;;  %v4488_v9 = vmul.f32 %v4447_v50, %v7713_v23 }
 0x773   : > { %v4734_v32 = vsub.f32 1.5, %v4733_v5 }
 0x774   : > { %v6350_v60 = vpop.eup %6349  ;;  %v8650_v62 = vsub.f32 %v8548_v35, %v4334_v3  ;;  %v4939_v8 = vadd.f32 %v8646_v11, %v4904_v24  ;;  %v4520_v38 = vadd.f32 1e-05, %v4488_v9 }
 0x775   : > { %v4735_v22 = vmul.f32 %v6348_v55, %v4734_v32  ;;  %v4741_v1 = vmul.f32 %v6350_v60, %v4519_v12  ;;  %v5104_v21 = vpop.f32.mrf.mxu1  ;;  %vm4747_vm2 = vweird.f32 %v6350_v60 }
 0x776   : > { %v4398_v27 = vmul.f32 %v8650_v62, %v8650_v62  ;;  %v4971_v43 = vmax.f32 %v4939_v8, 0.0  ;;  %v5105_v57 = vadd.f32 %v8446_v48, %v5104_v21  ;;  %vm4748_vm4 = vmor %vm4746_vm3, %vm4747_vm2  ;;  %6351 = vrsqrt.f32 %v4520_v38 }
 0x777   : > { %v4739_v51 = vsel %vm4738_vm1, %v6348_v55, %v4735_v22  ;;  %v4742_v30 = vmul.f32 %v6350_v60, %v4741_v1  ;;  %vm4756_vm6 = vweird.f32 %v4520_v38 }
 0x778   : > { %4458 = vadd.xlane.f32.xlu1 %v4398_v27  ;;  %v4993_v35 = vpack.c.bf16 %v4971_v43, %v4970_v2  ;;  %5168 = vst [vmem:[%s8464_s30 + $0x58] sm:$0xff] %v5105_v57  ;;  %v4870_v47 = vmul.f32 %v4739_v51, %v8513_v14 }
 0x779   : > { %v4743_v52 = vmul.f32 0.5, %v4742_v30  ;;  %v4301_v56 = vpop.xlane.xlu0 %4300 }
 0x77a   : > { %v4335_v16 = vmul.f32 %v4301_v56, %v7713_v23  ;;  %5121 = vmatmul.bf16.gmra.mxu1 %v4993_v35  ;;  %v4905_v41 = vmul.f32 %v8635_v49, %v4870_v47 }
 0x77b   : > { %v4744_v6 = vsub.f32 1.5, %v4743_v52 }
 0x77c   : > { %v8660_v40 = vsub.f32 %v8556_v26, %v4335_v16  ;;  %v4940_v0 = vadd.f32 %v8646_v11, %v4905_v41 }
 0x77d   : > { %v4745_v10 = vmul.f32 %v6350_v60, %v4744_v6  ;;  %v5107_v58 = vpop.f32.mrf.mxu1 }
 0x77e   : > { %v4399_v54 = vmul.f32 %v8660_v40, %v8660_v40  ;;  %v5108_v14 = vadd.f32 %v8446_v48, %v5107_v58 }
 0x77f   : > { %v4749_v17 = vsel %vm4748_vm4, %v6350_v60, %v4745_v10 }
 0x780   : > { %v4871_v46 = vmul.f32 %v4749_v17, %v8528_v31  ;;  %4460 = vadd.xlane.f32.xlu2 %v4399_v54  ;;  %5169 = vst [vmem:[%s8464_s30 + $0x60] sm:$0xff] %v5108_v14  ;;  %v4972_v31 = vmax.f32 %v4940_v0, 0.0 }
 0x781   : > { %v4303_v4 = vpop.xlane.xlu0 %4302 }
 0x782   : > { %v4336_v26 = vmul.f32 %v4303_v4, %v7713_v23  ;;  %v4906_v36 = vmul.f32 %v8635_v49, %v4871_v46 }
 0x784   : > { %v8672_v39 = vsub.f32 %v8560_v25, %v4336_v26  ;;  %v4941_v18 = vadd.f32 %v8646_v11, %v4906_v36  ;;  %v6352_v25 = vpop.eup %6351 }
 0x785   : > { %v5109_v20 = vpop.f32.mrf.mxu1  ;;  %v4751_v15 = vmul.f32 %v6352_v25, %v4520_v38  ;;  %vm4757_vm5 = vweird.f32 %v6352_v25 }
 0x786   : > { %v4400_v55 = vmul.f32 %v8672_v39, %v8672_v39  ;;  %v4973_v12 = vmax.f32 %v4941_v18, 0.0  ;;  %v5110_v59 = vadd.f32 %v8446_v48, %v5109_v20  ;;  %vm4758_vm7 = vmor %vm4756_vm6, %vm4757_vm5 }
 0x787   : > { %v4752_v63 = vmul.f32 %v6352_v25, %v4751_v15 }
 0x788   : > { %4462 = vadd.xlane.f32.xlu0 %v4400_v55  ;;  %v4994_v13 = vpack.c.bf16 %v4973_v12, %v4972_v31  ;;  %5170 = vst [vmem:[%s8464_s30 + $0x68] sm:$0xff] %v5110_v59 }
 0x789   : > { %v4753_v44 = vmul.f32 0.5, %v4752_v63 }
 0x78a   : > { %5126 = vmatmul.bf16.gmra.mxu1 %v4994_v13 }
 0x78b   : > { %v4754_v7 = vsub.f32 1.5, %v4753_v44 }
 0x78d   : > { %v4755_v37 = vmul.f32 %v6352_v25, %v4754_v7 }
 0x78f   : > { %v4759_v8 = vsel %vm4758_vm7, %v6352_v25, %v4755_v37 }
 0x790   : > { %v4872_v2 = vmul.f32 %v4759_v8, %v8544_v33 }
 0x792   : > { %v4907_v10 = vmul.f32 %v8635_v49, %v4872_v2 }
 0x794   : > { %v4942_v4 = vadd.f32 %v8646_v11, %v4907_v10 }
 0x796   : > { %v4974_v12 = vmax.f32 %v4942_v4, 0.0 }
 0x7c3   : > { %v4449_v45 = vpop.xlane.xlu1 %4448 }
 0x7c4   : > { %v4489_v28 = vmul.f32 %v4449_v45, %v7713_v23 }
 0x7c6   : > { %v4521_v5 = vadd.f32 1e-05, %v4489_v28 }
 0x7c8   : > { %6353 = vrsqrt.f32 %v4521_v5  ;;  %vm4766_vm9 = vweird.f32 %v4521_v5 }
 0x7cb   : > { %v4451_v3 = vpop.xlane.xlu1 %4450 }
 0x7cc   : > { %v4490_v24 = vmul.f32 %v4451_v3, %v7713_v23 }
 0x7ce   : > { %v6354_v32 = vpop.eup %6353  ;;  %v4522_v60 = vadd.f32 1e-05, %v4490_v24 }
 0x7cf   : > { %v4761_v50 = vmul.f32 %v6354_v32, %v4521_v5  ;;  %vm4767_vm8 = vweird.f32 %v6354_v32 }
 0x7d0   : > { %6355 = vrsqrt.f32 %v4522_v60  ;;  %vm4768_vm10 = vmor %vm4766_vm9, %vm4767_vm8  ;;  %vm4776_vm12 = vweird.f32 %v4522_v60 }
 0x7d1   : > { %v4762_v22 = vmul.f32 %v6354_v32, %v4761_v50 }
 0x7d3   : > { %v4763_v1 = vmul.f32 0.5, %v4762_v22  ;;  %v4305_v21 = vpop.xlane.xlu1 %4304  ;;  %v4453_v27 = vpop.xlane.xlu2 %4452 }
 0x7d4   : > { %v4337_v43 = vmul.f32 %v4305_v21, %v7713_v23  ;;  %v4491_v51 = vmul.f32 %v4453_v27, %v7713_v23 }
 0x7d5   : > { %v4764_v30 = vsub.f32 1.5, %v4763_v1 }
 0x7d6   : > { %v6356_v57 = vpop.eup %6355  ;;  %v8686_v35 = vsub.f32 %v8602_v29, %v4337_v43  ;;  %v4523_v52 = vadd.f32 1e-05, %v4491_v51 }
 0x7d7   : > { %v4765_v56 = vmul.f32 %v6354_v32, %v4764_v30  ;;  %v4771_v47 = vmul.f32 %v6356_v57, %v4522_v60  ;;  %v5112_v16 = vpop.f32.mrf.mxu1  ;;  %vm4777_vm11 = vweird.f32 %v6356_v57 }
 0x7d8   : > { %6357 = vrsqrt.f32 %v4523_v52  ;;  %v5113_v33 = vadd.f32 %v8446_v48, %v5112_v16  ;;  %v4401_v6 = vmul.f32 %v8686_v35, %v8686_v35  ;;  %vm4778_vm13 = vmor %vm4776_vm12, %vm4777_vm11  ;;  %vm4786_vm15 = vweird.f32 %v4523_v52 }
 0x7d9   : > { %v4769_v58 = vsel %vm4768_vm10, %v6354_v32, %v4765_v56  ;;  %v4772_v54 = vmul.f32 %v6356_v57, %v4771_v47 }
 0x7da   : > { %v4873_v41 = vmul.f32 %v4769_v58, %v8571_v19  ;;  %5171 = vst [vmem:[%s8464_s30 + $0x70] sm:$0xff] %v5113_v33  ;;  %4464 = vadd.xlane.f32.xlu1 %v4401_v6 }
 0x7db   : > { %v4773_v29 = vmul.f32 0.5, %v4772_v54  ;;  %v4455_v17 = vpop.xlane.xlu2 %4454 }
 0x7dc   : > { %v4492_v14 = vmul.f32 %v4455_v17, %v7713_v23  ;;  %v4908_v46 = vmul.f32 %v8635_v49, %v4873_v41 }
 0x7dd   : > { %v4774_v26 = vsub.f32 1.5, %v4773_v29 }
 0x7de   : > { %v6358_v36 = vpop.eup %6357  ;;  %v4524_v0 = vadd.f32 1e-05, %v4492_v14  ;;  %v4943_v18 = vadd.f32 %v8646_v11, %v4908_v46 }
 0x7df   : > { %v4775_v20 = vmul.f32 %v6356_v57, %v4774_v26  ;;  %v4781_v19 = vmul.f32 %v6358_v36, %v4523_v52  ;;  %v5114_v55 = vpop.f32.mrf.mxu1  ;;  %vm4787_vm14 = vweird.f32 %v6358_v36 }
 0x7e0   : > { %6359 = vrsqrt.f32 %v4524_v0  ;;  %v5115_v31 = vadd.f32 %v8446_v48, %v5114_v55  ;;  %v4975_v59 = vmax.f32 %v4943_v18, 0.0  ;;  %vm4788_vm0 = vmor %vm4786_vm15, %vm4787_vm14  ;;  %vm4796_vm2 = vweird.f32 %v4524_v0 }
 0x7e1   : > { %v4779_v13 = vsel %vm4778_vm13, %v6356_v57, %v4775_v20  ;;  %v4782_v9 = vmul.f32 %v6358_v36, %v4781_v19 }
 0x7e2   : > { %5172 = vst [vmem:[%s8464_s30 + $0x78] sm:$0xff] %v5115_v31  ;;  %v4995_v38 = vpack.c.bf16 %v4975_v59, %v4974_v12  ;;  %v4874_v63 = vmul.f32 %v4779_v13, %v8586_v34 }
 0x7e3   : > { %v4783_v25 = vmul.f32 0.5, %v4782_v9  ;;  %v4457_v15 = vpop.xlane.xlu0 %4456 }
 0x7e4   : > { %v4493_v45 = vmul.f32 %v4457_v15, %v7713_v23  ;;  %5131 = vmatmul.bf16.gmra.mxu1 %v4995_v38  ;;  %v4909_v32 = vmul.f32 %v8635_v49, %v4874_v63 }
 0x7e5   : > { %v4784_v28 = vsub.f32 1.5, %v4783_v25 }
 0x7e6   : > { %v6360_v44 = vpop.eup %6359  ;;  %v4525_v5 = vadd.f32 1e-05, %v4493_v45  ;;  %v4944_v27 = vadd.f32 %v8646_v11, %v4909_v32 }
 0x7e7   : > { %v4785_v7 = vmul.f32 %v6358_v36, %v4784_v28  ;;  %v4791_v3 = vmul.f32 %v6360_v44, %v4524_v0  ;;  %v5117_v24 = vpop.f32.mrf.mxu1  ;;  %vm4797_vm1 = vweird.f32 %v6360_v44 }
 0x7e8   : > { %6361 = vrsqrt.f32 %v4525_v5  ;;  %v5118_v37 = vadd.f32 %v8446_v48, %v5117_v24  ;;  %vm4798_vm3 = vmor %vm4796_vm2, %vm4797_vm1  ;;  %v4976_v47 = vmax.f32 %v4944_v27, 0.0  ;;  %vm4806_vm5 = vweird.f32 %v4525_v5 }
 0x7e9   : > { %v4789_v60 = vsel %vm4788_vm0, %v6358_v36, %v4785_v7  ;;  %v4792_v34 = vmul.f32 %v6360_v44, %v4791_v3 }
 0x7ea   : > { %v4875_v50 = vmul.f32 %v4789_v60, %v8598_v61  ;;  %5173 = vst [vmem:[%s8464_s30 + $0x80] sm:$0xff] %v5118_v37 }
 0x7eb   : > { %v4793_v8 = vmul.f32 0.5, %v4792_v34  ;;  %v4459_v22 = vpop.xlane.xlu1 %4458 }
 0x7ec   : > { %v4494_v1 = vmul.f32 %v4459_v22, %v7713_v23  ;;  %v4910_v21 = vmul.f32 %v8635_v49, %v4875_v50 }
 0x7ed   : > { %v4794_v2 = vsub.f32 1.5, %v4793_v8 }
 0x7ee   : > { %v6362_v43 = vpop.eup %6361  ;;  %v4526_v51 = vadd.f32 1e-05, %v4494_v1  ;;  %v4945_v30 = vadd.f32 %v8646_v11, %v4910_v21 }
 0x7ef   : > { %v4795_v57 = vmul.f32 %v6360_v44, %v4794_v2  ;;  %v4801_v52 = vmul.f32 %v6362_v43, %v4525_v5  ;;  %v5119_v61 = vpop.f32.mrf.mxu1  ;;  %vm4807_vm4 = vweird.f32 %v6362_v43 }
 0x7f0   : > { %6363 = vrsqrt.f32 %v4526_v51  ;;  %v5120_v56 = vadd.f32 %v8446_v48, %v5119_v61  ;;  %v4977_v16 = vmax.f32 %v4945_v30, 0.0  ;;  %vm4808_vm6 = vmor %vm4806_vm5, %vm4807_vm4  ;;  %vm4816_vm8 = vweird.f32 %v4526_v51 }
 0x7f1   : > { %v4799_v33 = vsel %vm4798_vm3, %v6360_v44, %v4795_v57  ;;  %v4802_v6 = vmul.f32 %v6362_v43, %v4801_v52 }
 0x7f2   : > { %5174 = vst [vmem:[%s8464_s30 + $0x88] sm:$0xff] %v5120_v56  ;;  %v4996_v10 = vpack.c.bf16 %v4977_v16, %v4976_v47  ;;  %v4876_v41 = vmul.f32 %v4799_v33, %v8616_v42 }
 0x7f3   : > { %v4803_v58 = vmul.f32 0.5, %v4802_v6  ;;  %v4461_v54 = vpop.xlane.xlu2 %4460 }
 0x7f4   : > { %v4495_v29 = vmul.f32 %v4461_v54, %v7713_v23  ;;  %5136 = vmatmul.bf16.gmra.mxu1 %v4996_v10  ;;  %v4911_v18 = vmul.f32 %v8635_v49, %v4876_v41 }
 0x7f5   : > { %v4804_v17 = vsub.f32 1.5, %v4803_v58 }
 0x7f6   : > { %v6364_v14 = vpop.eup %6363  ;;  %v4527_v46 = vadd.f32 1e-05, %v4495_v29  ;;  %v4946_v12 = vadd.f32 %v8646_v11, %v4911_v18 }
 0x7f7   : > { %v4805_v4 = vmul.f32 %v6362_v43, %v4804_v17  ;;  %v4811_v26 = vmul.f32 %v6364_v14, %v4526_v51  ;;  %v5122_v36 = vpop.f32.mrf.mxu1  ;;  %vm4817_vm7 = vweird.f32 %v6364_v14 }
 0x7f8   : > { %6365 = vrsqrt.f32 %v4527_v46  ;;  %v5123_v0 = vadd.f32 %v8446_v48, %v5122_v36  ;;  %vm4818_vm9 = vmor %vm4816_vm8, %vm4817_vm7  ;;  %v4978_v63 = vmax.f32 %v4946_v12, 0.0  ;;  %vm4826_vm11 = vweird.f32 %v4527_v46 }
 0x7f9   : > { %v4809_v20 = vsel %vm4808_vm6, %v6362_v43, %v4805_v4  ;;  %v4812_v42 = vmul.f32 %v6364_v14, %v4811_v26 }
 0x7fa   : > { %v4877_v19 = vmul.f32 %v4809_v20, %v8628_v53  ;;  %5175 = vst [vmem:[%s8464_s30 + $0x90] sm:$0xff] %v5123_v0  ;;  %v8724_v53 = vld [vmem:[%s8864_s0] ss:$0 sm:$0xff] }
 0x7fb   : > { %v4813_v55 = vmul.f32 0.5, %v4812_v42  ;;  %v4463_v30 = vpop.xlane.xlu0 %4462 }
 0x7fc   : > { %v4912_v31 = vmul.f32 %v8635_v49, %v4877_v19  ;;  %v4496_v57 = vmul.f32 %v4463_v30, %v7713_v23 }
 0x7fd   : > { %v4814_v59 = vsub.f32 1.5, %v4813_v55 }
 0x7fe   : > { %v6366_v13 = vpop.eup %6365  ;;  %v4947_v9 = vadd.f32 %v8646_v11, %v4912_v31  ;;  %v4528_v52 = vadd.f32 1e-05, %v4496_v57 }
 0x7ff   : > { %v4815_v38 = vmul.f32 %v6364_v14, %v4814_v59  ;;  %v4821_v48 = vmul.f32 %v6366_v13, %v4527_v46  ;;  %v5124_v25 = vpop.f32.mrf.mxu1  ;;  %vm4827_vm10 = vweird.f32 %v6366_v13 }
 0x800   : > { %v5125_v15 = vadd.f32 %v8724_v53, %v5124_v25  ;;  %v4979_v45 = vmax.f32 %v4947_v9, 0.0  ;;  %vm4828_vm12 = vmor %vm4826_vm11, %vm4827_vm10  ;;  %6367 = vrsqrt.f32 %v4528_v52  ;;  %vm4836_vm14 = vweird.f32 %v4528_v52 }
 0x801   : > { %v4819_v28 = vsel %vm4818_vm9, %v6364_v14, %v4815_v38  ;;  %v4822_v44 = vmul.f32 %v6366_v13, %v4821_v48 }
 0x802   : > { %5176 = vst [vmem:[%s8464_s30 + $0x98] sm:$0xff] %v5125_v15  ;;  %v4997_v5 = vpack.c.bf16 %v4979_v45, %v4978_v63  ;;  %v4878_v3 = vmul.f32 %v4819_v28, %v8650_v62 }
 0x803   : > { %v4823_v7 = vmul.f32 0.5, %v4822_v44 }
 0x804   : > { %5141 = vmatmul.bf16.gmra.mxu1 %v4997_v5  ;;  %v4913_v34 = vmul.f32 %v8635_v49, %v4878_v3 }
 0x805   : > { %v4824_v24 = vsub.f32 1.5, %v4823_v7 }
 0x806   : > { %v4948_v62 = vadd.f32 %v8646_v11, %v4913_v34 }
 0x807   : > { %v4825_v37 = vmul.f32 %v6366_v13, %v4824_v24  ;;  %v5127_v32 = vpop.f32.mrf.mxu1 }
 0x808   : > { %v5128_v60 = vadd.f32 %v8724_v53, %v5127_v32  ;;  %v4980_v2 = vmax.f32 %v4948_v62, 0.0 }
 0x809   : > { %v4829_v50 = vsel %vm4828_vm12, %v6366_v13, %v4825_v37 }
 0x80a   : > { %v4879_v8 = vmul.f32 %v4829_v50, %v8660_v40  ;;  %5177 = vst [vmem:[%s8464_s30 + $0xa0] sm:$0xff] %v5128_v60  ;;  %v6368_v40 = vpop.eup %6367 }
 0x80b   : > { %v4831_v61 = vmul.f32 %v6368_v40, %v4528_v52  ;;  %vm4837_vm13 = vweird.f32 %v6368_v40 }
 0x80c   : > { %v4914_v22 = vmul.f32 %v8635_v49, %v4879_v8  ;;  %vm4838_vm15 = vmor %vm4836_vm14, %vm4837_vm13 }
 0x80d   : > { %v4832_v56 = vmul.f32 %v6368_v40, %v4831_v61 }
 0x80e   : > { %v4949_v1 = vadd.f32 %v8646_v11, %v4914_v22 }
 0x80f   : > { %v5129_v21 = vpop.f32.mrf.mxu1  ;;  %v4833_v33 = vmul.f32 0.5, %v4832_v56 }
 0x810   : > { %v5130_v27 = vadd.f32 %v8724_v53, %v5129_v21  ;;  %v4981_v43 = vmax.f32 %v4949_v1, 0.0 }
 0x811   : > { %v4834_v10 = vsub.f32 1.5, %v4833_v33 }
 0x812   : > { %5178 = vst [vmem:[%s8464_s30 + $0xa8] sm:$0xff] %v5130_v27  ;;  %v4998_v51 = vpack.c.bf16 %v4981_v43, %v4980_v2 }
 0x813   : > { %v4835_v58 = vmul.f32 %v6368_v40, %v4834_v10 }
 0x814   : > { %5146 = vmatmul.bf16.gmra.mxu1 %v4998_v51 }
 0x815   : > { %v4839_v29 = vsel %vm4838_vm15, %v6368_v40, %v4835_v58 }
 0x816   : > { %v4880_v46 = vmul.f32 %v4839_v29, %v8672_v39 }
 0x818   : > { %v4915_v0 = vmul.f32 %v8635_v49, %v4880_v46 }
 0x81a   : > { %v4950_v39 = vadd.f32 %v8646_v11, %v4915_v0 }
 0x81c   : > { %v4982_v12 = vmax.f32 %v4950_v39, 0.0 }
 0x84d   : > { %v4465_v47 = vpop.xlane.xlu1 %4464 }
 0x84e   : > { %v4497_v16 = vmul.f32 %v4465_v47, %v7713_v23 }
 0x850   : > { %v4529_v6 = vadd.f32 1e-05, %v4497_v16 }
 0x852   : > { %6369 = vrsqrt.f32 %v4529_v6  ;;  %vm4846_vm1 = vweird.f32 %v4529_v6 }
 0x858   : > { %v6370_v54 = vpop.eup %6369 }
 0x859   : > { %v4841_v41 = vmul.f32 %v6370_v54, %v4529_v6  ;;  %vm4847_vm0 = vweird.f32 %v6370_v54 }
 0x85a   : > { %vm4848_vm2 = vmor %vm4846_vm1, %vm4847_vm0 }
 0x85b   : > { %v4842_v17 = vmul.f32 %v6370_v54, %v4841_v41 }
 0x85d   : > { %v4843_v14 = vmul.f32 0.5, %v4842_v17 }
 0x85f   : > { %v4844_v4 = vsub.f32 1.5, %v4843_v14 }
 0x861   : > { %v4845_v26 = vmul.f32 %v6370_v54, %v4844_v4  ;;  %v5132_v23 = vpop.f32.mrf.mxu1 }
 0x862   : > { %v5133_v36 = vadd.f32 %v8724_v53, %v5132_v23 }
 0x863   : > { %v4849_v18 = vsel %vm4848_vm2, %v6370_v54, %v4845_v26 }
 0x864   : > { %v4881_v20 = vmul.f32 %v4849_v18, %v8686_v35  ;;  %5179 = vst [vmem:[%s8464_s30 + $0xb0] sm:$0xff] %v5133_v36 }
 0x866   : > { %v4916_v42 = vmul.f32 %v8635_v49, %v4881_v20 }
 0x868   : > { %v4951_v19 = vadd.f32 %v8646_v11, %v4916_v42 }
 0x869   : > { %v5134_v55 = vpop.f32.mrf.mxu1 }
 0x86a   : > { %v5135_v31 = vadd.f32 %v8724_v53, %v5134_v55  ;;  %v4983_v59 = vmax.f32 %v4951_v19, 0.0 }
 0x86c   : > { %5180 = vst [vmem:[%s8464_s30 + $0xb8] sm:$0xff] %v5135_v31  ;;  %v4999_v13 = vpack.c.bf16 %v4983_v59, %v4982_v12 }
 0x86e   : > { %5151 = vmatmul.bf16.gmra.mxu1 %v4999_v13 }
 0x871   : > { %v5137_v35 = vpop.f32.mrf.mxu1 }
 0x872   : > { %v5138_v9 = vadd.f32 %v8724_v53, %v5137_v35 }
 0x874   : > { %5181 = vst [vmem:[%s8464_s30 + $0xc0] sm:$0xff] %v5138_v9 }
 0x879   : > { %v5139_v49 = vpop.f32.mrf.mxu1 }
 0x87a   : > { %v5140_v11 = vadd.f32 %v8724_v53, %v5139_v49 }
 0x87c   : > { %5182 = vst [vmem:[%s8464_s30 + $0xc8] sm:$0xff] %v5140_v11 }
 0x881   : > { %v5142_v38 = vpop.f32.mrf.mxu1 }
 0x882   : > { %v5143_v48 = vadd.f32 %v8724_v53, %v5142_v38 }
 0x884   : > { %5183 = vst [vmem:[%s8464_s30 + $0xd0] sm:$0xff] %v5143_v48 }
 0x889   : > { %v5144_v25 = vpop.f32.mrf.mxu1 }
 0x88a   : > { %v5145_v15 = vadd.f32 %v8724_v53, %v5144_v25 }
 0x88c   : > { %5184 = vst [vmem:[%s8464_s30 + $0xd8] sm:$0xff] %v5145_v15 }
 0x891   : > { %v5147_v63 = vpop.f32.mrf.mxu1 }
 0x892   : > { %v5148_v45 = vadd.f32 %v8724_v53, %v5147_v63 }
 0x894   : > { %5185 = vst [vmem:[%s8464_s30 + $0xe0] sm:$0xff] %v5148_v45 }
 0x899   : > { %v5149_v28 = vpop.f32.mrf.mxu1 }
 0x89a   : > { %v5150_v44 = vadd.f32 %v8724_v53, %v5149_v28 }
 0x89c   : > { %5186 = vst [vmem:[%s8464_s30 + $0xe8] sm:$0xff] %v5150_v44 }
 0x8eb   : > { %v5152_v5 = vpop.f32.mrf.mxu1 }
 0x8ec   : > { %v5153_v7 = vadd.f32 %v8724_v53, %v5152_v5 }
 0x8ee   : > { %5187 = vst [vmem:[%s8464_s30 + $0xf0] sm:$0xff] %v5153_v7 }
 0x8f3   : > { %v5154_v3 = vpop.f32.mrf.mxu1 }
 0x8f4   : > { %v5155_v24 = vadd.f32 %v8724_v53, %v5154_v3 }
 0x8f6   : > { %5188 = vst [vmem:[%s8464_s30 + $0xf8] sm:$0xff] %v5155_v24 }
 0x8f7   : > { %6495 = shalt.err (!%p6492_p9)
}
 0x8f8   : > { %s6564_s22 = smov 128   ;;  %s6565_s1 = smov 8  }
 0x8f9   : > { %6149 = dma.vmem_to_hbm [thread:$0]  (%p6696_p4), %s5203_s20, 4096, %s5205_s11, %s5190_s16, %s6564_s22, %s6564_s22, %s6565_s1  }
 0x8fa PF: > { %s8867_s30 = sld [smem:[#allocation17_spill]] }
 0x8fb   : > { %s8868_s19 = sld [smem:[#allocation13_spill]] }
 0x900   : > { %p6171_p10 = scmp.ge.s32.totalorder %s8867_s30, 2 }
 0x901   : > { %s5219_s28 = sand.u32 1, %s8868_s19  }
 0x902   : > { %p6162_p11 = pnand %p6171_p10, %p6703_p8  ;;  %s5220_s17 = scalar_lea.sflag [#allocation5], %s5219_s28 }
 0x904   : > { %p6163_p12 = pneg %p6162_p11 }
 0x906   : > { %6529 = dma.done.wait (%p6163_p12), %s5220_s17, 4096  }
 0x907   : > { %6531 = vsyncadd (%p6163_p12), %s5220_s17, 4294963200  ;;  %s32_s29 = sadd.s32 1, %s8867_s30   ;;  %s8870_s24 = sld [smem:[#allocation14_spill]] }
 0x908   : > { %p29_p13 = scmp.ge.s32.totalorder %s32_s29, 4   ;;  %s8871_s25 = sld [smem:[#allocation15_spill]] }
 0x909   : > { %s8872_s26 = sld [smem:[#allocation21_spill]] }
 0x90a   : > { %s8873_s27 = sld [smem:[#allocation16_spill]]  ;;  %31 = sbr.rel (!%p29_p13) target bundleno = 12 (0xc), region = 151 }
 0x90b   : > { %s8874_s28 = sld [smem:[#allocation18_spill]] }
 0x90f   :  { %5226 = vsyncpa [#allocation4], 1 }
 0x910   :  { %5228 = vsyncpa [#allocation4 + $0x1], 1 }
 0x911   :  { %5229 = vsyncpa [#allocation7], 1 }
 0x912   :  { %5230 = vsyncpa [#allocation5], 1 }
 0x913   :  { %5232 = vsyncpa [#allocation5 + $0x1], 1 }

</bundles_post_ra>
